<compile_context>
chip_gen: v7x
topology: tpu7x:2x2x1
jax: 0.10.0
libtpu: 0.0.40
codegen_flags: <defaults>
</compile_context>

<pallas_src>
import functools

import jax
import jax.numpy as jnp
from jax import lax
from jax.experimental import pallas as pl
from jax.experimental.pallas import tpu as pltpu


def _pad_to(n, m):
    return ((n + m - 1) // m) * m


def _has_bf16_eup():
    """bf16 transcendentals are native on v6e/v7x; v5e and older emulate them."""
    try:
        kind = jax.devices()[0].device_kind.lower()
    except Exception:
        return False
    return any(tag in kind for tag in ("v6", "v7", "7x"))


def lstm_classifier_kernel(x_ref, w_ref, u_ref, b_ref, fcw_ref, fcb_ref,
                           out_ref, h_sc, c_sc, xw_sc,
                           *, seq, batch, nhid_p, t_chunk, unroll, gate_dtype):
    H = nhid_p
    t_blk = pl.program_id(0)
    n_blk = pl.num_programs(0)

    @pl.when(t_blk == 0)
    def _init():
        h_sc[...] = jnp.zeros_like(h_sc)
        c_sc[...] = jnp.zeros_like(c_sc)

    # ---- time-parallel input projection: one big MXU matmul per chunk -------
    # Materialized into explicit VMEM scratch (review: bounds vreg pressure).
    tb, bp, ip = x_ref.shape
    x2d = x_ref[...].reshape(tb * bp, ip)                          # bf16
    xw = jnp.dot(x2d, w_ref[...], preferred_element_type=jnp.float32) + b_ref[...]
    xw_sc[...] = xw.reshape(tb, bp, 4 * H)

    # ---- serial recurrence: only h @ U_all on the critical path -------------
    def step(t, carry, *, masked):
        h, c = carry
        gates = xw_sc[t] + jnp.dot(h.astype(jnp.bfloat16), u_ref[...],
                                   preferred_element_type=jnp.float32)
        g_ = gates.astype(gate_dtype)          # bf16 EUP on v6e/v7x, f32 on v5e
        i = jax.nn.sigmoid(g_[:, 0 * H:1 * H])
        f = jax.nn.sigmoid(g_[:, 1 * H:2 * H])
        g = jnp.tanh(g_[:, 2 * H:3 * H])
        o = jax.nn.sigmoid(g_[:, 3 * H:4 * H])
        c_new = (f * c + i * g).astype(jnp.float32)        # f32 accumulation
        h_new = (o * jnp.tanh(c_new.astype(gate_dtype))).astype(jnp.float32)
        if masked:                      # only traced for the tail chunk
            valid = (t_blk * t_chunk + t) < seq
            h_new = jnp.where(valid, h_new, h)
            c_new = jnp.where(valid, c_new, c)
        return h_new, c_new

    fast_step = functools.partial(step, masked=False)
    tail_step = functools.partial(step, masked=True)
    carry0 = (h_sc[...], c_sc[...])

    if seq % t_chunk == 0:
        h, c = lax.fori_loop(0, t_chunk, fast_step, carry0, unroll=unroll)
        h_sc[...] = h
        c_sc[...] = c
    else:
        is_tail = t_blk == n_blk - 1

        @pl.when(jnp.logical_not(is_tail))
        def _body():
            h, c = lax.fori_loop(0, t_chunk, fast_step, carry0, unroll=unroll)
            h_sc[...] = h
            c_sc[...] = c

        @pl.when(is_tail)
        def _tail():
            h, c = lax.fori_loop(0, t_chunk, tail_step, carry0, unroll=unroll)
            h_sc[...] = h
            c_sc[...] = c

    # ---- classifier head + log_softmax, last chunk only ---------------------
    @pl.when(t_blk == n_blk - 1)
    def _finalize():
        hf = h_sc[...]
        logits = (jnp.dot(hf.astype(jnp.bfloat16), fcw_ref[...],
                          preferred_element_type=jnp.float32) + fcb_ref[...])
        # PyTorch: F.log_softmax(out, dim=1) on (seq, batch, ncls) normalizes
        # over the BATCH axis; out[-1] only needs the last-step logits.
        # Mask padded batch rows so they don't pollute the reduction.
        row = lax.broadcasted_iota(jnp.int32, logits.shape, 0)
        lm = jnp.where(row < batch, logits, jnp.float32(-1e30))
        m = jnp.max(lm, axis=0, keepdims=True)
        z = lm - m
        lse = jnp.log(jnp.sum(jnp.exp(z), axis=0, keepdims=True))
        out_ref[...] = z - lse


def my_lstm_classifier(x, W, U, b, fc_w, fc_b, *, t_chunk=32, gate_dtype=None):
    """x: (batch, seq, ninput) f32. Returns (batch, nclasses) = out[-1]."""
    batch, seq, ninput = x.shape
    nhid = U.shape[0]
    nclasses = fc_w.shape[0]

    if gate_dtype is None:
        gate_dtype = jnp.bfloat16 if _has_bf16_eup() else jnp.float32

    # ---- padded, lane-aligned layout (plain-JAX glue) -----------------------
    batch_p = _pad_to(batch, 16)
    ninput_p = _pad_to(ninput, 128)
    nhid_p = _pad_to(nhid, 128)
    ncls_p = _pad_to(nclasses, 128)
    four_h = 4 * nhid_p

    t_chunk = max(1, min(t_chunk, seq))

    # Resident VMEM working set (bytes) for a given chunk size:
    #   2x only for the streamed x chunk, 1x for single-buffered weights,
    #   explicit xw/h/c scratch, double-buffered output block.
    def _vmem_bytes(tc):
        return (2 * tc * batch_p * ninput_p * 2            # x chunk (bf16, 2 bufs)
                + ninput_p * four_h * 2                    # W (bf16, 1 buf)
                + nhid_p * four_h * 2                      # U (bf16, 1 buf)
                + 8 * four_h * 4                           # b (f32, sublane-padded)
                + nhid_p * ncls_p * 2 + 8 * ncls_p * 4     # fc weights/bias
                + 2 * batch_p * ncls_p * 4                 # out block
                + 2 * batch_p * nhid_p * 4                 # h/c scratch
                + tc * batch_p * four_h * 4)               # xw scratch (f32)

    VMEM_TARGET = 20 << 20         # working-set cap; leaves headroom on v7x (64 MiB/TC)
    while t_chunk > 8 and _vmem_bytes(t_chunk) > VMEM_TARGET:
        t_chunk //= 2
    seq_p = _pad_to(seq, t_chunk)
    unroll = min(t_chunk, 8)
    vmem_limit = int(min(max(2 * _vmem_bytes(t_chunk) + (2 << 20), 16 << 20),
                         40 << 20))

    # ---- operand staging (bf16 before transpose/pad; review item) -----------
    x_tm = jnp.transpose(x.astype(jnp.bfloat16), (1, 0, 2))       # (seq,batch,nin)
    x_p = (jnp.zeros((seq_p, batch_p, ninput_p), jnp.bfloat16)
           .at[:seq, :batch, :ninput].set(x_tm))

    # gate order along the 4*nhid axis is [i | f | g | o]
    w_p = (jnp.zeros((ninput_p, 4, nhid_p), jnp.float32)
           .at[:ninput, :, :nhid].set(W.reshape(ninput, 4, nhid))
           .reshape(ninput_p, four_h).astype(jnp.bfloat16))
    u_p = (jnp.zeros((nhid_p, 4, nhid_p), jnp.float32)
           .at[:nhid, :, :nhid].set(U.reshape(nhid, 4, nhid))
           .reshape(nhid_p, four_h).astype(jnp.bfloat16))
    b_p = (jnp.zeros((1, 4, nhid_p), jnp.float32)
           .at[0, :, :nhid].set(b.reshape(4, nhid))
           .reshape(1, four_h))
    fcw_p = (jnp.zeros((nhid_p, ncls_p), jnp.float32)
             .at[:nhid, :nclasses].set(fc_w.T).astype(jnp.bfloat16))
    fcb_p = jnp.zeros((1, ncls_p), jnp.float32).at[0, :nclasses].set(fc_b)

    kernel = functools.partial(lstm_classifier_kernel, seq=seq, batch=batch,
                               nhid_p=nhid_p, t_chunk=t_chunk, unroll=unroll,
                               gate_dtype=gate_dtype)

    def _const_spec(shape, single_buffer):
        if single_buffer:
            return pl.BlockSpec(shape, lambda t: tuple(0 for _ in shape),
                                pipeline_mode=pl.Buffered(1))
        return pl.BlockSpec(shape, lambda t: tuple(0 for _ in shape))

    def _run(single_buffer_weights):
        const = lambda shape: _const_spec(shape, single_buffer_weights)
        call = pl.pallas_call(
            kernel,
            out_shape=jax.ShapeDtypeStruct((batch_p, ncls_p), jnp.float32),
            grid_spec=pltpu.PrefetchScalarGridSpec(
                num_scalar_prefetch=0,
                grid=(seq_p // t_chunk,),
                in_specs=[
                    pl.BlockSpec((t_chunk, batch_p, ninput_p),
                                 lambda t: (t, 0, 0)),
                    const((ninput_p, four_h)),
                    const((nhid_p, four_h)),
                    const((1, four_h)),
                    const((nhid_p, ncls_p)),
                    const((1, ncls_p)),
                ],
                out_specs=pl.BlockSpec((batch_p, ncls_p), lambda t: (0, 0)),
                scratch_shapes=[pltpu.VMEM((batch_p, nhid_p), jnp.float32),
                                pltpu.VMEM((batch_p, nhid_p), jnp.float32),
                                pltpu.VMEM((t_chunk, batch_p, four_h),
                                           jnp.float32)],
            ),
            compiler_params=pltpu.CompilerParams(
                dimension_semantics=("arbitrary",),
                vmem_limit_bytes=vmem_limit),
        )
        return call(x_p, w_p, u_p, b_p, fcw_p, fcb_p)

    try:
        out_p = jax.block_until_ready(_run(True))
    except Exception:
        # pl.Buffered(1) not accepted by this jax/libtpu build: fall back to
        # default double-buffering of the constant weights (correctness-identical).
        out_p = _run(False)

    return out_p[:batch, :nclasses]


def _reference(x, W, U, b, fc_w, fc_b):
    """Pure-JAX f32 mirror of the PyTorch forward (dropout = identity)."""
    xt = jnp.transpose(x, (1, 0, 2))
    seq, batch, _ = xt.shape
    nhid = U.shape[0]
    h = jnp.zeros((batch, nhid), jnp.float32)
    c = jnp.zeros((batch, nhid), jnp.float32)
    for t in range(seq):
        gates = xt[t] @ W + h @ U + b
        i = jax.nn.sigmoid(gates[:, :nhid])
        f = jax.nn.sigmoid(gates[:, nhid:2 * nhid])
        g = jnp.tanh(gates[:, 2 * nhid:3 * nhid])
        o = jax.nn.sigmoid(gates[:, 3 * nhid:])
        c = f * c + i * g
        h = o * jnp.tanh(c)
    logits = h @ fc_w.T + fc_b
    return jax.nn.log_softmax(logits, axis=0)  # dim=1 of (seq,batch,ncls) == batch


if __name__ == "__main__":
    batch, seq, ninput, nhid, nclasses = 2, 8, 4, 6, 2

    key = jax.random.PRNGKey(0)
    kx, kw, ku, kb, kfw, kfb = jax.random.split(key, 6)

    x = jax.random.normal(kx, (batch, seq, ninput), dtype=jnp.float32)
    # (module inits W/U/b to zeros; use small deterministic random values so the
    # kernel exercises a non-trivial path)
    W = 0.1 * jax.random.normal(kw, (ninput, nhid * 4), dtype=jnp.float32)
    U = 0.1 * jax.random.normal(ku, (nhid, nhid * 4), dtype=jnp.float32)
    b = 0.1 * jax.random.normal(kb, (nhid * 4,), dtype=jnp.float32)
    fc_w = 0.1 * jax.random.normal(kfw, (nclasses, nhid), dtype=jnp.float32)
    fc_b = 0.1 * jax.random.normal(kfb, (nclasses,), dtype=jnp.float32)

    out = my_lstm_classifier(x, W, U, b, fc_w, fc_b)
    out = jax.block_until_ready(out)

    ref = _reference(x, W, U, b, fc_w, fc_b)
    assert out.shape == (batch, nclasses)
    # bf16 MXU inputs (+ bf16 EUP gates on v6e/v7x) vs f32 reference.
    assert jnp.allclose(out, ref, atol=4e-2, rtol=4e-2), (out, ref)

    print("KERNEL_OK")
</pallas_src>

<mosaic_0001>
module attributes {stable_mosaic.version = 11 : i64} {
  func.func @lstm_classifier_kernel(%arg0: i32, %arg1: memref<8x16x128xbf16, #tpu.memory_space<vmem>>, %arg2: memref<128x512xbf16, #tpu.memory_space<vmem>>, %arg3: memref<128x512xbf16, #tpu.memory_space<vmem>>, %arg4: memref<1x512xf32, #tpu.memory_space<vmem>>, %arg5: memref<128x128xbf16, #tpu.memory_space<vmem>>, %arg6: memref<1x128xf32, #tpu.memory_space<vmem>>, %arg7: memref<16x128xf32, #tpu.memory_space<vmem>>, %arg8: memref<16x128xf32, #tpu.memory_space<vmem>>, %arg9: memref<16x128xf32, #tpu.memory_space<vmem>>, %arg10: memref<8x16x512xf32, #tpu.memory_space<vmem>>) attributes {dimension_semantics = [#tpu.dimension_semantics<arbitrary>], iteration_bounds = array<i64: 1>, scalar_prefetch = 0 : i64, scratch_operands = 3 : i64, tpu.core_type = #tpu.core_type<tc>, window_params = [{transform_indices = @transform_0, window_bounds = array<i64: 8, 16, 128>}, {pipeline_mode = #tpu.pipeline_mode<synchronous>, transform_indices = @transform_1, window_bounds = array<i64: 128, 512>}, {pipeline_mode = #tpu.pipeline_mode<synchronous>, transform_indices = @transform_2, window_bounds = array<i64: 128, 512>}, {pipeline_mode = #tpu.pipeline_mode<synchronous>, transform_indices = @transform_3, window_bounds = array<i64: 1, 512>}, {pipeline_mode = #tpu.pipeline_mode<synchronous>, transform_indices = @transform_4, window_bounds = array<i64: 128, 128>}, {pipeline_mode = #tpu.pipeline_mode<synchronous>, transform_indices = @transform_5, window_bounds = array<i64: 1, 128>}, {pipeline_mode = #tpu.pipeline_mode<synchronous>, transform_indices = @transform_6, window_bounds = array<i64: 16, 128>}]} {
    %c0_i32 = arith.constant 0 : i32
    %0 = arith.cmpi eq, %arg0, %c0_i32 : i32
    %1 = arith.extui %0 : i1 to i32
    %c0_i32_0 = arith.constant 0 : i32
    %2 = arith.cmpi ne, %1, %c0_i32_0 : i32
    scf.if %2 {
      %cst_85 = arith.constant 0.000000e+00 : f32
      %275 = vector.broadcast %cst_85 : f32 to vector<16x128xf32>
      %c0_86 = arith.constant 0 : index
      %c0_87 = arith.constant 0 : index
      %276 = vector.load %arg8[%c0_86, %c0_87] : memref<16x128xf32, #tpu.memory_space<vmem>>, vector<16x128xf32>
      tpu.vector_store %arg8[%c0_86, %c0_87], %275 {strides = array<i32>} : memref<16x128xf32, #tpu.memory_space<vmem>>, vector<16x128xf32>,
      %cst_88 = arith.constant 0.000000e+00 : f32
      %277 = vector.broadcast %cst_88 : f32 to vector<16x128xf32>
      %c0_89 = arith.constant 0 : index
      %c0_90 = arith.constant 0 : index
      %278 = vector.load %arg9[%c0_89, %c0_90] : memref<16x128xf32, #tpu.memory_space<vmem>>, vector<16x128xf32>
      tpu.vector_store %arg9[%c0_89, %c0_90], %277 {strides = array<i32>} : memref<16x128xf32, #tpu.memory_space<vmem>>, vector<16x128xf32>,
    } else {
    }
    %c0 = arith.constant 0 : index
    %c0_1 = arith.constant 0 : index
    %c0_2 = arith.constant 0 : index
    %3 = vector.load %arg1[%c0, %c0_1, %c0_2] : memref<8x16x128xbf16, #tpu.memory_space<vmem>>, vector<8x16x128xbf16>
    %4 = vector.shape_cast %3 : vector<8x16x128xbf16> to vector<128x128xbf16>
    %c0_3 = arith.constant 0 : index
    %c0_4 = arith.constant 0 : index
    %5 = vector.load %arg2[%c0_3, %c0_4] : memref<128x512xbf16, #tpu.memory_space<vmem>>, vector<128x512xbf16>
    %cst = arith.constant dense<0.000000e+00> : vector<128x512xf32>
    %6 = tpu.matmul %4, %5, %cst {dimension_numbers = #tpu.dot_dimension_numbers<[1], [0], [0], [1], [0, 0, 1, 1], [], []>} : vector<128x128xbf16>, vector<128x512xbf16>, vector<128x512xf32> -> vector<128x512xf32>
    %c0_5 = arith.constant 0 : index
    %c0_6 = arith.constant 0 : index
    %7 = vector.load %arg4[%c0_5, %c0_6] : memref<1x512xf32, #tpu.memory_space<vmem>>, vector<1x512xf32>
    %8 = vector.broadcast %7 : vector<1x512xf32> to vector<128x512xf32>
    %9 = arith.addf %6, %8 : vector<128x512xf32>
    %10 = vector.shape_cast %9 : vector<128x512xf32> to vector<8x16x512xf32>
    %c0_7 = arith.constant 0 : index
    %c0_8 = arith.constant 0 : index
    %c0_9 = arith.constant 0 : index
    %11 = vector.load %arg10[%c0_7, %c0_8, %c0_9] : memref<8x16x512xf32, #tpu.memory_space<vmem>>, vector<8x16x512xf32>
    tpu.vector_store %arg10[%c0_7, %c0_8, %c0_9], %10 {strides = array<i32>} : memref<8x16x512xf32, #tpu.memory_space<vmem>>, vector<8x16x512xf32>,
    %c0_10 = arith.constant 0 : index
    %c0_11 = arith.constant 0 : index
    %12 = vector.load %arg8[%c0_10, %c0_11] : memref<16x128xf32, #tpu.memory_space<vmem>>, vector<16x128xf32>
    %c0_12 = arith.constant 0 : index
    %c0_13 = arith.constant 0 : index
    %13 = vector.load %arg9[%c0_12, %c0_13] : memref<16x128xf32, #tpu.memory_space<vmem>>, vector<16x128xf32>
    %c0_i32_14 = arith.constant 0 : i32
    %14 = arith.index_cast %c0_i32_14 : i32 to index
    %c0_15 = arith.constant 0 : index
    %c0_16 = arith.constant 0 : index
    %15 = vector.load %arg10[%14, %c0_15, %c0_16] : memref<8x16x512xf32, #tpu.memory_space<vmem>>, vector<1x16x512xf32>
    %16 = vector.shape_cast %15 : vector<1x16x512xf32> to vector<16x512xf32>
    %17 = arith.truncf %12 : vector<16x128xf32> to vector<16x128xbf16>
    %c0_17 = arith.constant 0 : index
    %c0_18 = arith.constant 0 : index
    %18 = vector.load %arg3[%c0_17, %c0_18] : memref<128x512xbf16, #tpu.memory_space<vmem>>, vector<128x512xbf16>
    %cst_19 = arith.constant dense<0.000000e+00> : vector<16x512xf32>
    %19 = tpu.matmul %17, %18, %cst_19 {dimension_numbers = #tpu.dot_dimension_numbers<[1], [0], [0], [1], [0, 0, 1, 1], [], []>} : vector<16x128xbf16>, vector<128x512xbf16>, vector<16x512xf32> -> vector<16x512xf32>
    %20 = arith.addf %16, %19 : vector<16x512xf32>
    %21 = vector.extract_strided_slice %20 {offsets = [0, 0], sizes = [16, 128], strides = [1, 1]} : vector<16x512xf32> to vector<16x128xf32>
    %22 = arith.negf %21 : vector<16x128xf32>
    %23 = math.exp %22 : vector<16x128xf32>
    %cst_20 = arith.constant 1.000000e+00 : f32
    %24 = vector.broadcast %cst_20 : f32 to vector<16x128xf32>
    %25 = arith.addf %24, %23 : vector<16x128xf32>
    %26 = arith.divf %24, %25 : vector<16x128xf32>
    %27 = vector.extract_strided_slice %20 {offsets = [0, 128], sizes = [16, 128], strides = [1, 1]} : vector<16x512xf32> to vector<16x128xf32>
    %28 = arith.negf %27 : vector<16x128xf32>
    %29 = math.exp %28 : vector<16x128xf32>
    %cst_21 = arith.constant 1.000000e+00 : f32
    %30 = vector.broadcast %cst_21 : f32 to vector<16x128xf32>
    %31 = arith.addf %30, %29 : vector<16x128xf32>
    %32 = arith.divf %30, %31 : vector<16x128xf32>
    %33 = vector.extract_strided_slice %20 {offsets = [0, 256], sizes = [16, 128], strides = [1, 1]} : vector<16x512xf32> to vector<16x128xf32>
    %34 = math.tanh %33 : vector<16x128xf32>
    %35 = vector.extract_strided_slice %20 {offsets = [0, 384], sizes = [16, 128], strides = [1, 1]} : vector<16x512xf32> to vector<16x128xf32>
    %36 = arith.negf %35 : vector<16x128xf32>
    %37 = math.exp %36 : vector<16x128xf32>
    %cst_22 = arith.constant 1.000000e+00 : f32
    %38 = vector.broadcast %cst_22 : f32 to vector<16x128xf32>
    %39 = arith.addf %38, %37 : vector<16x128xf32>
    %40 = arith.divf %38, %39 : vector<16x128xf32>
    %41 = arith.mulf %32, %13 : vector<16x128xf32>
    %42 = arith.mulf %26, %34 : vector<16x128xf32>
    %43 = arith.addf %41, %42 : vector<16x128xf32>
    %44 = math.tanh %43 : vector<16x128xf32>
    %45 = arith.mulf %40, %44 : vector<16x128xf32>
    %c1_i32 = arith.constant 1 : i32
    %46 = arith.index_cast %c1_i32 : i32 to index
    %c0_23 = arith.constant 0 : index
    %c0_24 = arith.constant 0 : index
    %47 = vector.load %arg10[%46, %c0_23, %c0_24] : memref<8x16x512xf32, #tpu.memory_space<vmem>>, vector<1x16x512xf32>
    %48 = vector.shape_cast %47 : vector<1x16x512xf32> to vector<16x512xf32>
    %49 = arith.truncf %45 : vector<16x128xf32> to vector<16x128xbf16>
    %c0_25 = arith.constant 0 : index
    %c0_26 = arith.constant 0 : index
    %50 = vector.load %arg3[%c0_25, %c0_26] : memref<128x512xbf16, #tpu.memory_space<vmem>>, vector<128x512xbf16>
    %cst_27 = arith.constant dense<0.000000e+00> : vector<16x512xf32>
    %51 = tpu.matmul %49, %50, %cst_27 {dimension_numbers = #tpu.dot_dimension_numbers<[1], [0], [0], [1], [0, 0, 1, 1], [], []>} : vector<16x128xbf16>, vector<128x512xbf16>, vector<16x512xf32> -> vector<16x512xf32>
    %52 = arith.addf %48, %51 : vector<16x512xf32>
    %53 = vector.extract_strided_slice %52 {offsets = [0, 0], sizes = [16, 128], strides = [1, 1]} : vector<16x512xf32> to vector<16x128xf32>
    %54 = arith.negf %53 : vector<16x128xf32>
    %55 = math.exp %54 : vector<16x128xf32>
    %cst_28 = arith.constant 1.000000e+00 : f32
    %56 = vector.broadcast %cst_28 : f32 to vector<16x128xf32>
    %57 = arith.addf %56, %55 : vector<16x128xf32>
    %58 = arith.divf %56, %57 : vector<16x128xf32>
    %59 = vector.extract_strided_slice %52 {offsets = [0, 128], sizes = [16, 128], strides = [1, 1]} : vector<16x512xf32> to vector<16x128xf32>
    %60 = arith.negf %59 : vector<16x128xf32>
    %61 = math.exp %60 : vector<16x128xf32>
    %cst_29 = arith.constant 1.000000e+00 : f32
    %62 = vector.broadcast %cst_29 : f32 to vector<16x128xf32>
    %63 = arith.addf %62, %61 : vector<16x128xf32>
    %64 = arith.divf %62, %63 : vector<16x128xf32>
    %65 = vector.extract_strided_slice %52 {offsets = [0, 256], sizes = [16, 128], strides = [1, 1]} : vector<16x512xf32> to vector<16x128xf32>
    %66 = math.tanh %65 : vector<16x128xf32>
    %67 = vector.extract_strided_slice %52 {offsets = [0, 384], sizes = [16, 128], strides = [1, 1]} : vector<16x512xf32> to vector<16x128xf32>
    %68 = arith.negf %67 : vector<16x128xf32>
    %69 = math.exp %68 : vector<16x128xf32>
    %cst_30 = arith.constant 1.000000e+00 : f32
    %70 = vector.broadcast %cst_30 : f32 to vector<16x128xf32>
    %71 = arith.addf %70, %69 : vector<16x128xf32>
    %72 = arith.divf %70, %71 : vector<16x128xf32>
    %73 = arith.mulf %64, %43 : vector<16x128xf32>
    %74 = arith.mulf %58, %66 : vector<16x128xf32>
    %75 = arith.addf %73, %74 : vector<16x128xf32>
    %76 = math.tanh %75 : vector<16x128xf32>
    %77 = arith.mulf %72, %76 : vector<16x128xf32>
    %c2_i32 = arith.constant 2 : i32
    %78 = arith.index_cast %c2_i32 : i32 to index
    %c0_31 = arith.constant 0 : index
    %c0_32 = arith.constant 0 : index
    %79 = vector.load %arg10[%78, %c0_31, %c0_32] : memref<8x16x512xf32, #tpu.memory_space<vmem>>, vector<1x16x512xf32>
    %80 = vector.shape_cast %79 : vector<1x16x512xf32> to vector<16x512xf32>
    %81 = arith.truncf %77 : vector<16x128xf32> to vector<16x128xbf16>
    %c0_33 = arith.constant 0 : index
    %c0_34 = arith.constant 0 : index
    %82 = vector.load %arg3[%c0_33, %c0_34] : memref<128x512xbf16, #tpu.memory_space<vmem>>, vector<128x512xbf16>
    %cst_35 = arith.constant dense<0.000000e+00> : vector<16x512xf32>
    %83 = tpu.matmul %81, %82, %cst_35 {dimension_numbers = #tpu.dot_dimension_numbers<[1], [0], [0], [1], [0, 0, 1, 1], [], []>} : vector<16x128xbf16>, vector<128x512xbf16>, vector<16x512xf32> -> vector<16x512xf32>
    %84 = arith.addf %80, %83 : vector<16x512xf32>
    %85 = vector.extract_strided_slice %84 {offsets = [0, 0], sizes = [16, 128], strides = [1, 1]} : vector<16x512xf32> to vector<16x128xf32>
    %86 = arith.negf %85 : vector<16x128xf32>
    %87 = math.exp %86 : vector<16x128xf32>
    %cst_36 = arith.constant 1.000000e+00 : f32
    %88 = vector.broadcast %cst_36 : f32 to vector<16x128xf32>
    %89 = arith.addf %88, %87 : vector<16x128xf32>
    %90 = arith.divf %88, %89 : vector<16x128xf32>
    %91 = vector.extract_strided_slice %84 {offsets = [0, 128], sizes = [16, 128], strides = [1, 1]} : vector<16x512xf32> to vector<16x128xf32>
    %92 = arith.negf %91 : vector<16x128xf32>
    %93 = math.exp %92 : vector<16x128xf32>
    %cst_37 = arith.constant 1.000000e+00 : f32
    %94 = vector.broadcast %cst_37 : f32 to vector<16x128xf32>
    %95 = arith.addf %94, %93 : vector<16x128xf32>
    %96 = arith.divf %94, %95 : vector<16x128xf32>
    %97 = vector.extract_strided_slice %84 {offsets = [0, 256], sizes = [16, 128], strides = [1, 1]} : vector<16x512xf32> to vector<16x128xf32>
    %98 = math.tanh %97 : vector<16x128xf32>
    %99 = vector.extract_strided_slice %84 {offsets = [0, 384], sizes = [16, 128], strides = [1, 1]} : vector<16x512xf32> to vector<16x128xf32>
    %100 = arith.negf %99 : vector<16x128xf32>
    %101 = math.exp %100 : vector<16x128xf32>
    %cst_38 = arith.constant 1.000000e+00 : f32
    %102 = vector.broadcast %cst_38 : f32 to vector<16x128xf32>
    %103 = arith.addf %102, %101 : vector<16x128xf32>
    %104 = arith.divf %102, %103 : vector<16x128xf32>
    %105 = arith.mulf %96, %75 : vector<16x128xf32>
    %106 = arith.mulf %90, %98 : vector<16x128xf32>
    %107 = arith.addf %105, %106 : vector<16x128xf32>
    %108 = math.tanh %107 : vector<16x128xf32>
    %109 = arith.mulf %104, %108 : vector<16x128xf32>
    %c3_i32 = arith.constant 3 : i32
    %110 = arith.index_cast %c3_i32 : i32 to index
    %c0_39 = arith.constant 0 : index
    %c0_40 = arith.constant 0 : index
    %111 = vector.load %arg10[%110, %c0_39, %c0_40] : memref<8x16x512xf32, #tpu.memory_space<vmem>>, vector<1x16x512xf32>
    %112 = vector.shape_cast %111 : vector<1x16x512xf32> to vector<16x512xf32>
    %113 = arith.truncf %109 : vector<16x128xf32> to vector<16x128xbf16>
    %c0_41 = arith.constant 0 : index
    %c0_42 = arith.constant 0 : index
    %114 = vector.load %arg3[%c0_41, %c0_42] : memref<128x512xbf16, #tpu.memory_space<vmem>>, vector<128x512xbf16>
    %cst_43 = arith.constant dense<0.000000e+00> : vector<16x512xf32>
    %115 = tpu.matmul %113, %114, %cst_43 {dimension_numbers = #tpu.dot_dimension_numbers<[1], [0], [0], [1], [0, 0, 1, 1], [], []>} : vector<16x128xbf16>, vector<128x512xbf16>, vector<16x512xf32> -> vector<16x512xf32>
    %116 = arith.addf %112, %115 : vector<16x512xf32>
    %117 = vector.extract_strided_slice %116 {offsets = [0, 0], sizes = [16, 128], strides = [1, 1]} : vector<16x512xf32> to vector<16x128xf32>
    %118 = arith.negf %117 : vector<16x128xf32>
    %119 = math.exp %118 : vector<16x128xf32>
    %cst_44 = arith.constant 1.000000e+00 : f32
    %120 = vector.broadcast %cst_44 : f32 to vector<16x128xf32>
    %121 = arith.addf %120, %119 : vector<16x128xf32>
    %122 = arith.divf %120, %121 : vector<16x128xf32>
    %123 = vector.extract_strided_slice %116 {offsets = [0, 128], sizes = [16, 128], strides = [1, 1]} : vector<16x512xf32> to vector<16x128xf32>
    %124 = arith.negf %123 : vector<16x128xf32>
    %125 = math.exp %124 : vector<16x128xf32>
    %cst_45 = arith.constant 1.000000e+00 : f32
    %126 = vector.broadcast %cst_45 : f32 to vector<16x128xf32>
    %127 = arith.addf %126, %125 : vector<16x128xf32>
    %128 = arith.divf %126, %127 : vector<16x128xf32>
    %129 = vector.extract_strided_slice %116 {offsets = [0, 256], sizes = [16, 128], strides = [1, 1]} : vector<16x512xf32> to vector<16x128xf32>
    %130 = math.tanh %129 : vector<16x128xf32>
    %131 = vector.extract_strided_slice %116 {offsets = [0, 384], sizes = [16, 128], strides = [1, 1]} : vector<16x512xf32> to vector<16x128xf32>
    %132 = arith.negf %131 : vector<16x128xf32>
    %133 = math.exp %132 : vector<16x128xf32>
    %cst_46 = arith.constant 1.000000e+00 : f32
    %134 = vector.broadcast %cst_46 : f32 to vector<16x128xf32>
    %135 = arith.addf %134, %133 : vector<16x128xf32>
    %136 = arith.divf %134, %135 : vector<16x128xf32>
    %137 = arith.mulf %128, %107 : vector<16x128xf32>
    %138 = arith.mulf %122, %130 : vector<16x128xf32>
    %139 = arith.addf %137, %138 : vector<16x128xf32>
    %140 = math.tanh %139 : vector<16x128xf32>
    %141 = arith.mulf %136, %140 : vector<16x128xf32>
    %c4_i32 = arith.constant 4 : i32
    %142 = arith.index_cast %c4_i32 : i32 to index
    %c0_47 = arith.constant 0 : index
    %c0_48 = arith.constant 0 : index
    %143 = vector.load %arg10[%142, %c0_47, %c0_48] : memref<8x16x512xf32, #tpu.memory_space<vmem>>, vector<1x16x512xf32>
    %144 = vector.shape_cast %143 : vector<1x16x512xf32> to vector<16x512xf32>
    %145 = arith.truncf %141 : vector<16x128xf32> to vector<16x128xbf16>
    %c0_49 = arith.constant 0 : index
    %c0_50 = arith.constant 0 : index
    %146 = vector.load %arg3[%c0_49, %c0_50] : memref<128x512xbf16, #tpu.memory_space<vmem>>, vector<128x512xbf16>
    %cst_51 = arith.constant dense<0.000000e+00> : vector<16x512xf32>
    %147 = tpu.matmul %145, %146, %cst_51 {dimension_numbers = #tpu.dot_dimension_numbers<[1], [0], [0], [1], [0, 0, 1, 1], [], []>} : vector<16x128xbf16>, vector<128x512xbf16>, vector<16x512xf32> -> vector<16x512xf32>
    %148 = arith.addf %144, %147 : vector<16x512xf32>
    %149 = vector.extract_strided_slice %148 {offsets = [0, 0], sizes = [16, 128], strides = [1, 1]} : vector<16x512xf32> to vector<16x128xf32>
    %150 = arith.negf %149 : vector<16x128xf32>
    %151 = math.exp %150 : vector<16x128xf32>
    %cst_52 = arith.constant 1.000000e+00 : f32
    %152 = vector.broadcast %cst_52 : f32 to vector<16x128xf32>
    %153 = arith.addf %152, %151 : vector<16x128xf32>
    %154 = arith.divf %152, %153 : vector<16x128xf32>
    %155 = vector.extract_strided_slice %148 {offsets = [0, 128], sizes = [16, 128], strides = [1, 1]} : vector<16x512xf32> to vector<16x128xf32>
    %156 = arith.negf %155 : vector<16x128xf32>
    %157 = math.exp %156 : vector<16x128xf32>
    %cst_53 = arith.constant 1.000000e+00 : f32
    %158 = vector.broadcast %cst_53 : f32 to vector<16x128xf32>
    %159 = arith.addf %158, %157 : vector<16x128xf32>
    %160 = arith.divf %158, %159 : vector<16x128xf32>
    %161 = vector.extract_strided_slice %148 {offsets = [0, 256], sizes = [16, 128], strides = [1, 1]} : vector<16x512xf32> to vector<16x128xf32>
    %162 = math.tanh %161 : vector<16x128xf32>
    %163 = vector.extract_strided_slice %148 {offsets = [0, 384], sizes = [16, 128], strides = [1, 1]} : vector<16x512xf32> to vector<16x128xf32>
    %164 = arith.negf %163 : vector<16x128xf32>
    %165 = math.exp %164 : vector<16x128xf32>
    %cst_54 = arith.constant 1.000000e+00 : f32
    %166 = vector.broadcast %cst_54 : f32 to vector<16x128xf32>
    %167 = arith.addf %166, %165 : vector<16x128xf32>
    %168 = arith.divf %166, %167 : vector<16x128xf32>
    %169 = arith.mulf %160, %139 : vector<16x128xf32>
    %170 = arith.mulf %154, %162 : vector<16x128xf32>
    %171 = arith.addf %169, %170 : vector<16x128xf32>
    %172 = math.tanh %171 : vector<16x128xf32>
    %173 = arith.mulf %168, %172 : vector<16x128xf32>
    %c5_i32 = arith.constant 5 : i32
    %174 = arith.index_cast %c5_i32 : i32 to index
    %c0_55 = arith.constant 0 : index
    %c0_56 = arith.constant 0 : index
    %175 = vector.load %arg10[%174, %c0_55, %c0_56] : memref<8x16x512xf32, #tpu.memory_space<vmem>>, vector<1x16x512xf32>
    %176 = vector.shape_cast %175 : vector<1x16x512xf32> to vector<16x512xf32>
    %177 = arith.truncf %173 : vector<16x128xf32> to vector<16x128xbf16>
    %c0_57 = arith.constant 0 : index
    %c0_58 = arith.constant 0 : index
    %178 = vector.load %arg3[%c0_57, %c0_58] : memref<128x512xbf16, #tpu.memory_space<vmem>>, vector<128x512xbf16>
    %cst_59 = arith.constant dense<0.000000e+00> : vector<16x512xf32>
    %179 = tpu.matmul %177, %178, %cst_59 {dimension_numbers = #tpu.dot_dimension_numbers<[1], [0], [0], [1], [0, 0, 1, 1], [], []>} : vector<16x128xbf16>, vector<128x512xbf16>, vector<16x512xf32> -> vector<16x512xf32>
    %180 = arith.addf %176, %179 : vector<16x512xf32>
    %181 = vector.extract_strided_slice %180 {offsets = [0, 0], sizes = [16, 128], strides = [1, 1]} : vector<16x512xf32> to vector<16x128xf32>
    %182 = arith.negf %181 : vector<16x128xf32>
    %183 = math.exp %182 : vector<16x128xf32>
    %cst_60 = arith.constant 1.000000e+00 : f32
    %184 = vector.broadcast %cst_60 : f32 to vector<16x128xf32>
    %185 = arith.addf %184, %183 : vector<16x128xf32>
    %186 = arith.divf %184, %185 : vector<16x128xf32>
    %187 = vector.extract_strided_slice %180 {offsets = [0, 128], sizes = [16, 128], strides = [1, 1]} : vector<16x512xf32> to vector<16x128xf32>
    %188 = arith.negf %187 : vector<16x128xf32>
    %189 = math.exp %188 : vector<16x128xf32>
    %cst_61 = arith.constant 1.000000e+00 : f32
    %190 = vector.broadcast %cst_61 : f32 to vector<16x128xf32>
    %191 = arith.addf %190, %189 : vector<16x128xf32>
    %192 = arith.divf %190, %191 : vector<16x128xf32>
    %193 = vector.extract_strided_slice %180 {offsets = [0, 256], sizes = [16, 128], strides = [1, 1]} : vector<16x512xf32> to vector<16x128xf32>
    %194 = math.tanh %193 : vector<16x128xf32>
    %195 = vector.extract_strided_slice %180 {offsets = [0, 384], sizes = [16, 128], strides = [1, 1]} : vector<16x512xf32> to vector<16x128xf32>
    %196 = arith.negf %195 : vector<16x128xf32>
    %197 = math.exp %196 : vector<16x128xf32>
    %cst_62 = arith.constant 1.000000e+00 : f32
    %198 = vector.broadcast %cst_62 : f32 to vector<16x128xf32>
    %199 = arith.addf %198, %197 : vector<16x128xf32>
    %200 = arith.divf %198, %199 : vector<16x128xf32>
    %201 = arith.mulf %192, %171 : vector<16x128xf32>
    %202 = arith.mulf %186, %194 : vector<16x128xf32>
    %203 = arith.addf %201, %202 : vector<16x128xf32>
    %204 = math.tanh %203 : vector<16x128xf32>
    %205 = arith.mulf %200, %204 : vector<16x128xf32>
    %c6_i32 = arith.constant 6 : i32
    %206 = arith.index_cast %c6_i32 : i32 to index
    %c0_63 = arith.constant 0 : index
    %c0_64 = arith.constant 0 : index
    %207 = vector.load %arg10[%206, %c0_63, %c0_64] : memref<8x16x512xf32, #tpu.memory_space<vmem>>, vector<1x16x512xf32>
    %208 = vector.shape_cast %207 : vector<1x16x512xf32> to vector<16x512xf32>
    %209 = arith.truncf %205 : vector<16x128xf32> to vector<16x128xbf16>
    %c0_65 = arith.constant 0 : index
    %c0_66 = arith.constant 0 : index
    %210 = vector.load %arg3[%c0_65, %c0_66] : memref<128x512xbf16, #tpu.memory_space<vmem>>, vector<128x512xbf16>
    %cst_67 = arith.constant dense<0.000000e+00> : vector<16x512xf32>
    %211 = tpu.matmul %209, %210, %cst_67 {dimension_numbers = #tpu.dot_dimension_numbers<[1], [0], [0], [1], [0, 0, 1, 1], [], []>} : vector<16x128xbf16>, vector<128x512xbf16>, vector<16x512xf32> -> vector<16x512xf32>
    %212 = arith.addf %208, %211 : vector<16x512xf32>
    %213 = vector.extract_strided_slice %212 {offsets = [0, 0], sizes = [16, 128], strides = [1, 1]} : vector<16x512xf32> to vector<16x128xf32>
    %214 = arith.negf %213 : vector<16x128xf32>
    %215 = math.exp %214 : vector<16x128xf32>
    %cst_68 = arith.constant 1.000000e+00 : f32
    %216 = vector.broadcast %cst_68 : f32 to vector<16x128xf32>
    %217 = arith.addf %216, %215 : vector<16x128xf32>
    %218 = arith.divf %216, %217 : vector<16x128xf32>
    %219 = vector.extract_strided_slice %212 {offsets = [0, 128], sizes = [16, 128], strides = [1, 1]} : vector<16x512xf32> to vector<16x128xf32>
    %220 = arith.negf %219 : vector<16x128xf32>
    %221 = math.exp %220 : vector<16x128xf32>
    %cst_69 = arith.constant 1.000000e+00 : f32
    %222 = vector.broadcast %cst_69 : f32 to vector<16x128xf32>
    %223 = arith.addf %222, %221 : vector<16x128xf32>
    %224 = arith.divf %222, %223 : vector<16x128xf32>
    %225 = vector.extract_strided_slice %212 {offsets = [0, 256], sizes = [16, 128], strides = [1, 1]} : vector<16x512xf32> to vector<16x128xf32>
    %226 = math.tanh %225 : vector<16x128xf32>
    %227 = vector.extract_strided_slice %212 {offsets = [0, 384], sizes = [16, 128], strides = [1, 1]} : vector<16x512xf32> to vector<16x128xf32>
    %228 = arith.negf %227 : vector<16x128xf32>
    %229 = math.exp %228 : vector<16x128xf32>
    %cst_70 = arith.constant 1.000000e+00 : f32
    %230 = vector.broadcast %cst_70 : f32 to vector<16x128xf32>
    %231 = arith.addf %230, %229 : vector<16x128xf32>
    %232 = arith.divf %230, %231 : vector<16x128xf32>
    %233 = arith.mulf %224, %203 : vector<16x128xf32>
    %234 = arith.mulf %218, %226 : vector<16x128xf32>
    %235 = arith.addf %233, %234 : vector<16x128xf32>
    %236 = math.tanh %235 : vector<16x128xf32>
    %237 = arith.mulf %232, %236 : vector<16x128xf32>
    %c7_i32 = arith.constant 7 : i32
    %238 = arith.index_cast %c7_i32 : i32 to index
    %c0_71 = arith.constant 0 : index
    %c0_72 = arith.constant 0 : index
    %239 = vector.load %arg10[%238, %c0_71, %c0_72] : memref<8x16x512xf32, #tpu.memory_space<vmem>>, vector<1x16x512xf32>
    %240 = vector.shape_cast %239 : vector<1x16x512xf32> to vector<16x512xf32>
    %241 = arith.truncf %237 : vector<16x128xf32> to vector<16x128xbf16>
    %c0_73 = arith.constant 0 : index
    %c0_74 = arith.constant 0 : index
    %242 = vector.load %arg3[%c0_73, %c0_74] : memref<128x512xbf16, #tpu.memory_space<vmem>>, vector<128x512xbf16>
    %cst_75 = arith.constant dense<0.000000e+00> : vector<16x512xf32>
    %243 = tpu.matmul %241, %242, %cst_75 {dimension_numbers = #tpu.dot_dimension_numbers<[1], [0], [0], [1], [0, 0, 1, 1], [], []>} : vector<16x128xbf16>, vector<128x512xbf16>, vector<16x512xf32> -> vector<16x512xf32>
    %244 = arith.addf %240, %243 : vector<16x512xf32>
    %245 = vector.extract_strided_slice %244 {offsets = [0, 0], sizes = [16, 128], strides = [1, 1]} : vector<16x512xf32> to vector<16x128xf32>
    %246 = arith.negf %245 : vector<16x128xf32>
    %247 = math.exp %246 : vector<16x128xf32>
    %cst_76 = arith.constant 1.000000e+00 : f32
    %248 = vector.broadcast %cst_76 : f32 to vector<16x128xf32>
    %249 = arith.addf %248, %247 : vector<16x128xf32>
    %250 = arith.divf %248, %249 : vector<16x128xf32>
    %251 = vector.extract_strided_slice %244 {offsets = [0, 128], sizes = [16, 128], strides = [1, 1]} : vector<16x512xf32> to vector<16x128xf32>
    %252 = arith.negf %251 : vector<16x128xf32>
    %253 = math.exp %252 : vector<16x128xf32>
    %cst_77 = arith.constant 1.000000e+00 : f32
    %254 = vector.broadcast %cst_77 : f32 to vector<16x128xf32>
    %255 = arith.addf %254, %253 : vector<16x128xf32>
    %256 = arith.divf %254, %255 : vector<16x128xf32>
    %257 = vector.extract_strided_slice %244 {offsets = [0, 256], sizes = [16, 128], strides = [1, 1]} : vector<16x512xf32> to vector<16x128xf32>
    %258 = math.tanh %257 : vector<16x128xf32>
    %259 = vector.extract_strided_slice %244 {offsets = [0, 384], sizes = [16, 128], strides = [1, 1]} : vector<16x512xf32> to vector<16x128xf32>
    %260 = arith.negf %259 : vector<16x128xf32>
    %261 = math.exp %260 : vector<16x128xf32>
    %cst_78 = arith.constant 1.000000e+00 : f32
    %262 = vector.broadcast %cst_78 : f32 to vector<16x128xf32>
    %263 = arith.addf %262, %261 : vector<16x128xf32>
    %264 = arith.divf %262, %263 : vector<16x128xf32>
    %265 = arith.mulf %256, %235 : vector<16x128xf32>
    %266 = arith.mulf %250, %258 : vector<16x128xf32>
    %267 = arith.addf %265, %266 : vector<16x128xf32>
    %268 = math.tanh %267 : vector<16x128xf32>
    %269 = arith.mulf %264, %268 : vector<16x128xf32>
    %c8_i32 = arith.constant 8 : i32
    %c0_79 = arith.constant 0 : index
    %c0_80 = arith.constant 0 : index
    %270 = vector.load %arg8[%c0_79, %c0_80] : memref<16x128xf32, #tpu.memory_space<vmem>>, vector<16x128xf32>
    tpu.vector_store %arg8[%c0_79, %c0_80], %269 {strides = array<i32>} : memref<16x128xf32, #tpu.memory_space<vmem>>, vector<16x128xf32>,
    %c0_81 = arith.constant 0 : index
    %c0_82 = arith.constant 0 : index
    %271 = vector.load %arg9[%c0_81, %c0_82] : memref<16x128xf32, #tpu.memory_space<vmem>>, vector<16x128xf32>
    tpu.vector_store %arg9[%c0_81, %c0_82], %267 {strides = array<i32>} : memref<16x128xf32, #tpu.memory_space<vmem>>, vector<16x128xf32>,
    %c0_i32_83 = arith.constant 0 : i32
    %272 = arith.cmpi eq, %arg0, %c0_i32_83 : i32
    %273 = arith.extui %272 : i1 to i32
    %c0_i32_84 = arith.constant 0 : i32
    %274 = arith.cmpi ne, %273, %c0_i32_84 : i32
    scf.if %274 {
      %c0_85 = arith.constant 0 : index
      %c0_86 = arith.constant 0 : index
      %275 = vector.load %arg8[%c0_85, %c0_86] : memref<16x128xf32, #tpu.memory_space<vmem>>, vector<16x128xf32>
      %276 = arith.truncf %275 : vector<16x128xf32> to vector<16x128xbf16>
      %c0_87 = arith.constant 0 : index
      %c0_88 = arith.constant 0 : index
      %277 = vector.load %arg5[%c0_87, %c0_88] : memref<128x128xbf16, #tpu.memory_space<vmem>>, vector<128x128xbf16>
      %cst_89 = arith.constant dense<0.000000e+00> : vector<16x128xf32>
      %278 = tpu.matmul %276, %277, %cst_89 {dimension_numbers = #tpu.dot_dimension_numbers<[1], [0], [0], [1], [0, 0, 1, 1], [], []>} : vector<16x128xbf16>, vector<128x128xbf16>, vector<16x128xf32> -> vector<16x128xf32>
      %c0_90 = arith.constant 0 : index
      %c0_91 = arith.constant 0 : index
      %279 = vector.load %arg6[%c0_90, %c0_91] : memref<1x128xf32, #tpu.memory_space<vmem>>, vector<1x128xf32>
      %280 = vector.broadcast %279 : vector<1x128xf32> to vector<16x128xf32>
      %281 = arith.addf %278, %280 : vector<16x128xf32>
      %282 = tpu.iota {dimensions = array<i32: 0>} : vector<16x128xi32>
      %c2_i32_92 = arith.constant 2 : i32
      %283 = vector.broadcast %c2_i32_92 : i32 to vector<16x128xi32>
      %284 = arith.cmpi slt, %282, %283 : vector<16x128xi32>
      %cst_93 = arith.constant -1.000000e+30 : f32
      %285 = vector.broadcast %cst_93 : f32 to vector<16x128xf32>
      %286 = arith.select %284, %281, %285 : vector<16x128xi1>, vector<16x128xf32>
      %cst_94 = arith.constant dense<0xFF800000> : vector<128xf32>
      %287 = vector.multi_reduction <maximumf>, %286, %cst_94 [0] : vector<16x128xf32> to vector<128xf32>
      %288 = vector.shape_cast %287 : vector<128xf32> to vector<1x128xf32>
      %289 = vector.broadcast %288 : vector<1x128xf32> to vector<16x128xf32>
      %290 = arith.subf %286, %289 : vector<16x128xf32>
      %291 = math.exp %290 : vector<16x128xf32>
      %cst_95 = arith.constant dense<0.000000e+00> : vector<128xf32>
      %292 = vector.multi_reduction <add>, %291, %cst_95 [0] : vector<16x128xf32> to vector<128xf32>
      %293 = vector.shape_cast %292 : vector<128xf32> to vector<1x128xf32>
      %294 = math.log %293 : vector<1x128xf32>
      %295 = vector.broadcast %294 : vector<1x128xf32> to vector<16x128xf32>
      %296 = arith.subf %290, %295 : vector<16x128xf32>
      %c0_96 = arith.constant 0 : index
      %c0_97 = arith.constant 0 : index
      %297 = vector.load %arg7[%c0_96, %c0_97] : memref<16x128xf32, #tpu.memory_space<vmem>>, vector<16x128xf32>
      tpu.vector_store %arg7[%c0_96, %c0_97], %296 {strides = array<i32>} : memref<16x128xf32, #tpu.memory_space<vmem>>, vector<16x128xf32>,
    } else {
    }
    return
  }
  func.func @transform_0(%arg0: i32) -> (i32, i32, i32) {
    %c0_i32 = arith.constant 0 : i32
    %c0_i32_0 = arith.constant 0 : i32
    %c0_i32_1 = arith.constant 0 : i32
    return %arg0, %c0_i32, %c0_i32_0 : i32, i32, i32
  }
  func.func @transform_1(%arg0: i32) -> (i32, i32) {
    %c0_i32 = arith.constant 0 : i32
    %c0_i32_0 = arith.constant 0 : i32
    %c0_i32_1 = arith.constant 0 : i32
    return %c0_i32, %c0_i32_0 : i32, i32
  }
  func.func @transform_2(%arg0: i32) -> (i32, i32) {
    %c0_i32 = arith.constant 0 : i32
    %c0_i32_0 = arith.constant 0 : i32
    %c0_i32_1 = arith.constant 0 : i32
    return %c0_i32, %c0_i32_0 : i32, i32
  }
  func.func @transform_3(%arg0: i32) -> (i32, i32) {
    %c0_i32 = arith.constant 0 : i32
    %c0_i32_0 = arith.constant 0 : i32
    %c0_i32_1 = arith.constant 0 : i32
    return %c0_i32, %c0_i32_0 : i32, i32
  }
  func.func @transform_4(%arg0: i32) -> (i32, i32) {
    %c0_i32 = arith.constant 0 : i32
    %c0_i32_0 = arith.constant 0 : i32
    %c0_i32_1 = arith.constant 0 : i32
    return %c0_i32, %c0_i32_0 : i32, i32
  }
  func.func @transform_5(%arg0: i32) -> (i32, i32) {
    %c0_i32 = arith.constant 0 : i32
    %c0_i32_0 = arith.constant 0 : i32
    %c0_i32_1 = arith.constant 0 : i32
    return %c0_i32, %c0_i32_0 : i32, i32
  }
  func.func @transform_6(%arg0: i32) -> (i32, i32) {
    %c0_i32 = arith.constant 0 : i32
    %c0_i32_0 = arith.constant 0 : i32
    %c0_i32_1 = arith.constant 0 : i32
    return %c0_i32, %c0_i32_0 : i32, i32
  }
}

module attributes {stable_mosaic.version = 11 : i64} {
  func.func @lstm_classifier_kernel(%arg0: i32, %arg1: memref<8x16x128xbf16, #tpu.memory_space<vmem>>, %arg2: memref<128x512xbf16, #tpu.memory_space<vmem>>, %arg3: memref<128x512xbf16, #tpu.memory_space<vmem>>, %arg4: memref<1x512xf32, #tpu.memory_space<vmem>>, %arg5: memref<128x128xbf16, #tpu.memory_space<vmem>>, %arg6: memref<1x128xf32, #tpu.memory_space<vmem>>, %arg7: memref<16x128xf32, #tpu.memory_space<vmem>>, %arg8: memref<16x128xf32, #tpu.memory_space<vmem>>, %arg9: memref<16x128xf32, #tpu.memory_space<vmem>>, %arg10: memref<8x16x512xf32, #tpu.memory_space<vmem>>) attributes {dimension_semantics = [#tpu.dimension_semantics<arbitrary>], iteration_bounds = array<i64: 1>, scalar_prefetch = 0 : i64, scratch_operands = 3 : i64, tpu.core_type = #tpu.core_type<tc>, window_params = [{transform_indices = @transform_0, window_bounds = array<i64: 8, 16, 128>}, {pipeline_mode = #tpu.pipeline_mode<synchronous>, transform_indices = @transform_1, window_bounds = array<i64: 128, 512>}, {pipeline_mode = #tpu.pipeline_mode<synchronous>, transform_indices = @transform_2, window_bounds = array<i64: 128, 512>}, {pipeline_mode = #tpu.pipeline_mode<synchronous>, transform_indices = @transform_3, window_bounds = array<i64: 1, 512>}, {pipeline_mode = #tpu.pipeline_mode<synchronous>, transform_indices = @transform_4, window_bounds = array<i64: 128, 128>}, {pipeline_mode = #tpu.pipeline_mode<synchronous>, transform_indices = @transform_5, window_bounds = array<i64: 1, 128>}, {pipeline_mode = #tpu.pipeline_mode<synchronous>, transform_indices = @transform_6, window_bounds = array<i64: 16, 128>}]} {
    %c0_i32 = arith.constant 0 : i32
    %0 = arith.cmpi eq, %arg0, %c0_i32 : i32
    %1 = arith.extui %0 : i1 to i32
    %c0_i32_0 = arith.constant 0 : i32
    %2 = arith.cmpi ne, %1, %c0_i32_0 : i32
    scf.if %2 {
      %cst_85 = arith.constant 0.000000e+00 : f32
      %275 = vector.broadcast %cst_85 : f32 to vector<16x128xf32>
      %c0_86 = arith.constant 0 : index
      %c0_87 = arith.constant 0 : index
      %276 = vector.load %arg8[%c0_86, %c0_87] : memref<16x128xf32, #tpu.memory_space<vmem>>, vector<16x128xf32>
      tpu.vector_store %arg8[%c0_86, %c0_87], %275 {strides = array<i32>} : memref<16x128xf32, #tpu.memory_space<vmem>>, vector<16x128xf32>,
      %cst_88 = arith.constant 0.000000e+00 : f32
      %277 = vector.broadcast %cst_88 : f32 to vector<16x128xf32>
      %c0_89 = arith.constant 0 : index
      %c0_90 = arith.constant 0 : index
      %278 = vector.load %arg9[%c0_89, %c0_90] : memref<16x128xf32, #tpu.memory_space<vmem>>, vector<16x128xf32>
      tpu.vector_store %arg9[%c0_89, %c0_90], %277 {strides = array<i32>} : memref<16x128xf32, #tpu.memory_space<vmem>>, vector<16x128xf32>,
    } else {
    }
    %c0 = arith.constant 0 : index
    %c0_1 = arith.constant 0 : index
    %c0_2 = arith.constant 0 : index
    %3 = vector.load %arg1[%c0, %c0_1, %c0_2] : memref<8x16x128xbf16, #tpu.memory_space<vmem>>, vector<8x16x128xbf16>
    %4 = vector.shape_cast %3 : vector<8x16x128xbf16> to vector<128x128xbf16>
    %c0_3 = arith.constant 0 : index
    %c0_4 = arith.constant 0 : index
    %5 = vector.load %arg2[%c0_3, %c0_4] : memref<128x512xbf16, #tpu.memory_space<vmem>>, vector<128x512xbf16>
    %cst = arith.constant dense<0.000000e+00> : vector<128x512xf32>
    %6 = tpu.matmul %4, %5, %cst {dimension_numbers = #tpu.dot_dimension_numbers<[1], [0], [0], [1], [0, 0, 1, 1], [], []>} : vector<128x128xbf16>, vector<128x512xbf16>, vector<128x512xf32> -> vector<128x512xf32>
    %c0_5 = arith.constant 0 : index
    %c0_6 = arith.constant 0 : index
    %7 = vector.load %arg4[%c0_5, %c0_6] : memref<1x512xf32, #tpu.memory_space<vmem>>, vector<1x512xf32>
    %8 = vector.broadcast %7 : vector<1x512xf32> to vector<128x512xf32>
    %9 = arith.addf %6, %8 : vector<128x512xf32>
    %10 = vector.shape_cast %9 : vector<128x512xf32> to vector<8x16x512xf32>
    %c0_7 = arith.constant 0 : index
    %c0_8 = arith.constant 0 : index
    %c0_9 = arith.constant 0 : index
    %11 = vector.load %arg10[%c0_7, %c0_8, %c0_9] : memref<8x16x512xf32, #tpu.memory_space<vmem>>, vector<8x16x512xf32>
    tpu.vector_store %arg10[%c0_7, %c0_8, %c0_9], %10 {strides = array<i32>} : memref<8x16x512xf32, #tpu.memory_space<vmem>>, vector<8x16x512xf32>,
    %c0_10 = arith.constant 0 : index
    %c0_11 = arith.constant 0 : index
    %12 = vector.load %arg8[%c0_10, %c0_11] : memref<16x128xf32, #tpu.memory_space<vmem>>, vector<16x128xf32>
    %c0_12 = arith.constant 0 : index
    %c0_13 = arith.constant 0 : index
    %13 = vector.load %arg9[%c0_12, %c0_13] : memref<16x128xf32, #tpu.memory_space<vmem>>, vector<16x128xf32>
    %c0_i32_14 = arith.constant 0 : i32
    %14 = arith.index_cast %c0_i32_14 : i32 to index
    %c0_15 = arith.constant 0 : index
    %c0_16 = arith.constant 0 : index
    %15 = vector.load %arg10[%14, %c0_15, %c0_16] : memref<8x16x512xf32, #tpu.memory_space<vmem>>, vector<1x16x512xf32>
    %16 = vector.shape_cast %15 : vector<1x16x512xf32> to vector<16x512xf32>
    %17 = arith.truncf %12 : vector<16x128xf32> to vector<16x128xbf16>
    %c0_17 = arith.constant 0 : index
    %c0_18 = arith.constant 0 : index
    %18 = vector.load %arg3[%c0_17, %c0_18] : memref<128x512xbf16, #tpu.memory_space<vmem>>, vector<128x512xbf16>
    %cst_19 = arith.constant dense<0.000000e+00> : vector<16x512xf32>
    %19 = tpu.matmul %17, %18, %cst_19 {dimension_numbers = #tpu.dot_dimension_numbers<[1], [0], [0], [1], [0, 0, 1, 1], [], []>} : vector<16x128xbf16>, vector<128x512xbf16>, vector<16x512xf32> -> vector<16x512xf32>
    %20 = arith.addf %16, %19 : vector<16x512xf32>
    %21 = vector.extract_strided_slice %20 {offsets = [0, 0], sizes = [16, 128], strides = [1, 1]} : vector<16x512xf32> to vector<16x128xf32>
    %22 = arith.negf %21 : vector<16x128xf32>
    %23 = math.exp %22 : vector<16x128xf32>
    %cst_20 = arith.constant 1.000000e+00 : f32
    %24 = vector.broadcast %cst_20 : f32 to vector<16x128xf32>
    %25 = arith.addf %24, %23 : vector<16x128xf32>
    %26 = arith.divf %24, %25 : vector<16x128xf32>
    %27 = vector.extract_strided_slice %20 {offsets = [0, 128], sizes = [16, 128], strides = [1, 1]} : vector<16x512xf32> to vector<16x128xf32>
    %28 = arith.negf %27 : vector<16x128xf32>
    %29 = math.exp %28 : vector<16x128xf32>
    %cst_21 = arith.constant 1.000000e+00 : f32
    %30 = vector.broadcast %cst_21 : f32 to vector<16x128xf32>
    %31 = arith.addf %30, %29 : vector<16x128xf32>
    %32 = arith.divf %30, %31 : vector<16x128xf32>
    %33 = vector.extract_strided_slice %20 {offsets = [0, 256], sizes = [16, 128], strides = [1, 1]} : vector<16x512xf32> to vector<16x128xf32>
    %34 = math.tanh %33 : vector<16x128xf32>
    %35 = vector.extract_strided_slice %20 {offsets = [0, 384], sizes = [16, 128], strides = [1, 1]} : vector<16x512xf32> to vector<16x128xf32>
    %36 = arith.negf %35 : vector<16x128xf32>
    %37 = math.exp %36 : vector<16x128xf32>
    %cst_22 = arith.constant 1.000000e+00 : f32
    %38 = vector.broadcast %cst_22 : f32 to vector<16x128xf32>
    %39 = arith.addf %38, %37 : vector<16x128xf32>
    %40 = arith.divf %38, %39 : vector<16x128xf32>
    %41 = arith.mulf %32, %13 : vector<16x128xf32>
    %42 = arith.mulf %26, %34 : vector<16x128xf32>
    %43 = arith.addf %41, %42 : vector<16x128xf32>
    %44 = math.tanh %43 : vector<16x128xf32>
    %45 = arith.mulf %40, %44 : vector<16x128xf32>
    %c1_i32 = arith.constant 1 : i32
    %46 = arith.index_cast %c1_i32 : i32 to index
    %c0_23 = arith.constant 0 : index
    %c0_24 = arith.constant 0 : index
    %47 = vector.load %arg10[%46, %c0_23, %c0_24] : memref<8x16x512xf32, #tpu.memory_space<vmem>>, vector<1x16x512xf32>
    %48 = vector.shape_cast %47 : vector<1x16x512xf32> to vector<16x512xf32>
    %49 = arith.truncf %45 : vector<16x128xf32> to vector<16x128xbf16>
    %c0_25 = arith.constant 0 : index
    %c0_26 = arith.constant 0 : index
    %50 = vector.load %arg3[%c0_25, %c0_26] : memref<128x512xbf16, #tpu.memory_space<vmem>>, vector<128x512xbf16>
    %cst_27 = arith.constant dense<0.000000e+00> : vector<16x512xf32>
    %51 = tpu.matmul %49, %50, %cst_27 {dimension_numbers = #tpu.dot_dimension_numbers<[1], [0], [0], [1], [0, 0, 1, 1], [], []>} : vector<16x128xbf16>, vector<128x512xbf16>, vector<16x512xf32> -> vector<16x512xf32>
    %52 = arith.addf %48, %51 : vector<16x512xf32>
    %53 = vector.extract_strided_slice %52 {offsets = [0, 0], sizes = [16, 128], strides = [1, 1]} : vector<16x512xf32> to vector<16x128xf32>
    %54 = arith.negf %53 : vector<16x128xf32>
    %55 = math.exp %54 : vector<16x128xf32>
    %cst_28 = arith.constant 1.000000e+00 : f32
    %56 = vector.broadcast %cst_28 : f32 to vector<16x128xf32>
    %57 = arith.addf %56, %55 : vector<16x128xf32>
    %58 = arith.divf %56, %57 : vector<16x128xf32>
    %59 = vector.extract_strided_slice %52 {offsets = [0, 128], sizes = [16, 128], strides = [1, 1]} : vector<16x512xf32> to vector<16x128xf32>
    %60 = arith.negf %59 : vector<16x128xf32>
    %61 = math.exp %60 : vector<16x128xf32>
    %cst_29 = arith.constant 1.000000e+00 : f32
    %62 = vector.broadcast %cst_29 : f32 to vector<16x128xf32>
    %63 = arith.addf %62, %61 : vector<16x128xf32>
    %64 = arith.divf %62, %63 : vector<16x128xf32>
    %65 = vector.extract_strided_slice %52 {offsets = [0, 256], sizes = [16, 128], strides = [1, 1]} : vector<16x512xf32> to vector<16x128xf32>
    %66 = math.tanh %65 : vector<16x128xf32>
    %67 = vector.extract_strided_slice %52 {offsets = [0, 384], sizes = [16, 128], strides = [1, 1]} : vector<16x512xf32> to vector<16x128xf32>
    %68 = arith.negf %67 : vector<16x128xf32>
    %69 = math.exp %68 : vector<16x128xf32>
    %cst_30 = arith.constant 1.000000e+00 : f32
    %70 = vector.broadcast %cst_30 : f32 to vector<16x128xf32>
    %71 = arith.addf %70, %69 : vector<16x128xf32>
    %72 = arith.divf %70, %71 : vector<16x128xf32>
    %73 = arith.mulf %64, %43 : vector<16x128xf32>
    %74 = arith.mulf %58, %66 : vector<16x128xf32>
    %75 = arith.addf %73, %74 : vector<16x128xf32>
    %76 = math.tanh %75 : vector<16x128xf32>
    %77 = arith.mulf %72, %76 : vector<16x128xf32>
    %c2_i32 = arith.constant 2 : i32
    %78 = arith.index_cast %c2_i32 : i32 to index
    %c0_31 = arith.constant 0 : index
    %c0_32 = arith.constant 0 : index
    %79 = vector.load %arg10[%78, %c0_31, %c0_32] : memref<8x16x512xf32, #tpu.memory_space<vmem>>, vector<1x16x512xf32>
    %80 = vector.shape_cast %79 : vector<1x16x512xf32> to vector<16x512xf32>
    %81 = arith.truncf %77 : vector<16x128xf32> to vector<16x128xbf16>
    %c0_33 = arith.constant 0 : index
    %c0_34 = arith.constant 0 : index
    %82 = vector.load %arg3[%c0_33, %c0_34] : memref<128x512xbf16, #tpu.memory_space<vmem>>, vector<128x512xbf16>
    %cst_35 = arith.constant dense<0.000000e+00> : vector<16x512xf32>
    %83 = tpu.matmul %81, %82, %cst_35 {dimension_numbers = #tpu.dot_dimension_numbers<[1], [0], [0], [1], [0, 0, 1, 1], [], []>} : vector<16x128xbf16>, vector<128x512xbf16>, vector<16x512xf32> -> vector<16x512xf32>
    %84 = arith.addf %80, %83 : vector<16x512xf32>
    %85 = vector.extract_strided_slice %84 {offsets = [0, 0], sizes = [16, 128], strides = [1, 1]} : vector<16x512xf32> to vector<16x128xf32>
    %86 = arith.negf %85 : vector<16x128xf32>
    %87 = math.exp %86 : vector<16x128xf32>
    %cst_36 = arith.constant 1.000000e+00 : f32
    %88 = vector.broadcast %cst_36 : f32 to vector<16x128xf32>
    %89 = arith.addf %88, %87 : vector<16x128xf32>
    %90 = arith.divf %88, %89 : vector<16x128xf32>
    %91 = vector.extract_strided_slice %84 {offsets = [0, 128], sizes = [16, 128], strides = [1, 1]} : vector<16x512xf32> to vector<16x128xf32>
    %92 = arith.negf %91 : vector<16x128xf32>
    %93 = math.exp %92 : vector<16x128xf32>
    %cst_37 = arith.constant 1.000000e+00 : f32
    %94 = vector.broadcast %cst_37 : f32 to vector<16x128xf32>
    %95 = arith.addf %94, %93 : vector<16x128xf32>
    %96 = arith.divf %94, %95 : vector<16x128xf32>
    %97 = vector.extract_strided_slice %84 {offsets = [0, 256], sizes = [16, 128], strides = [1, 1]} : vector<16x512xf32> to vector<16x128xf32>
    %98 = math.tanh %97 : vector<16x128xf32>
    %99 = vector.extract_strided_slice %84 {offsets = [0, 384], sizes = [16, 128], strides = [1, 1]} : vector<16x512xf32> to vector<16x128xf32>
    %100 = arith.negf %99 : vector<16x128xf32>
    %101 = math.exp %100 : vector<16x128xf32>
    %cst_38 = arith.constant 1.000000e+00 : f32
    %102 = vector.broadcast %cst_38 : f32 to vector<16x128xf32>
    %103 = arith.addf %102, %101 : vector<16x128xf32>
    %104 = arith.divf %102, %103 : vector<16x128xf32>
    %105 = arith.mulf %96, %75 : vector<16x128xf32>
    %106 = arith.mulf %90, %98 : vector<16x128xf32>
    %107 = arith.addf %105, %106 : vector<16x128xf32>
    %108 = math.tanh %107 : vector<16x128xf32>
    %109 = arith.mulf %104, %108 : vector<16x128xf32>
    %c3_i32 = arith.constant 3 : i32
    %110 = arith.index_cast %c3_i32 : i32 to index
    %c0_39 = arith.constant 0 : index
    %c0_40 = arith.constant 0 : index
    %111 = vector.load %arg10[%110, %c0_39, %c0_40] : memref<8x16x512xf32, #tpu.memory_space<vmem>>, vector<1x16x512xf32>
    %112 = vector.shape_cast %111 : vector<1x16x512xf32> to vector<16x512xf32>
    %113 = arith.truncf %109 : vector<16x128xf32> to vector<16x128xbf16>
    %c0_41 = arith.constant 0 : index
    %c0_42 = arith.constant 0 : index
    %114 = vector.load %arg3[%c0_41, %c0_42] : memref<128x512xbf16, #tpu.memory_space<vmem>>, vector<128x512xbf16>
    %cst_43 = arith.constant dense<0.000000e+00> : vector<16x512xf32>
    %115 = tpu.matmul %113, %114, %cst_43 {dimension_numbers = #tpu.dot_dimension_numbers<[1], [0], [0], [1], [0, 0, 1, 1], [], []>} : vector<16x128xbf16>, vector<128x512xbf16>, vector<16x512xf32> -> vector<16x512xf32>
    %116 = arith.addf %112, %115 : vector<16x512xf32>
    %117 = vector.extract_strided_slice %116 {offsets = [0, 0], sizes = [16, 128], strides = [1, 1]} : vector<16x512xf32> to vector<16x128xf32>
    %118 = arith.negf %117 : vector<16x128xf32>
    %119 = math.exp %118 : vector<16x128xf32>
    %cst_44 = arith.constant 1.000000e+00 : f32
    %120 = vector.broadcast %cst_44 : f32 to vector<16x128xf32>
    %121 = arith.addf %120, %119 : vector<16x128xf32>
    %122 = arith.divf %120, %121 : vector<16x128xf32>
    %123 = vector.extract_strided_slice %116 {offsets = [0, 128], sizes = [16, 128], strides = [1, 1]} : vector<16x512xf32> to vector<16x128xf32>
    %124 = arith.negf %123 : vector<16x128xf32>
    %125 = math.exp %124 : vector<16x128xf32>
    %cst_45 = arith.constant 1.000000e+00 : f32
    %126 = vector.broadcast %cst_45 : f32 to vector<16x128xf32>
    %127 = arith.addf %126, %125 : vector<16x128xf32>
    %128 = arith.divf %126, %127 : vector<16x128xf32>
    %129 = vector.extract_strided_slice %116 {offsets = [0, 256], sizes = [16, 128], strides = [1, 1]} : vector<16x512xf32> to vector<16x128xf32>
    %130 = math.tanh %129 : vector<16x128xf32>
    %131 = vector.extract_strided_slice %116 {offsets = [0, 384], sizes = [16, 128], strides = [1, 1]} : vector<16x512xf32> to vector<16x128xf32>
    %132 = arith.negf %131 : vector<16x128xf32>
    %133 = math.exp %132 : vector<16x128xf32>
    %cst_46 = arith.constant 1.000000e+00 : f32
    %134 = vector.broadcast %cst_46 : f32 to vector<16x128xf32>
    %135 = arith.addf %134, %133 : vector<16x128xf32>
    %136 = arith.divf %134, %135 : vector<16x128xf32>
    %137 = arith.mulf %128, %107 : vector<16x128xf32>
    %138 = arith.mulf %122, %130 : vector<16x128xf32>
    %139 = arith.addf %137, %138 : vector<16x128xf32>
    %140 = math.tanh %139 : vector<16x128xf32>
    %141 = arith.mulf %136, %140 : vector<16x128xf32>
    %c4_i32 = arith.constant 4 : i32
    %142 = arith.index_cast %c4_i32 : i32 to index
    %c0_47 = arith.constant 0 : index
    %c0_48 = arith.constant 0 : index
    %143 = vector.load %arg10[%142, %c0_47, %c0_48] : memref<8x16x512xf32, #tpu.memory_space<vmem>>, vector<1x16x512xf32>
    %144 = vector.shape_cast %143 : vector<1x16x512xf32> to vector<16x512xf32>
    %145 = arith.truncf %141 : vector<16x128xf32> to vector<16x128xbf16>
    %c0_49 = arith.constant 0 : index
    %c0_50 = arith.constant 0 : index
    %146 = vector.load %arg3[%c0_49, %c0_50] : memref<128x512xbf16, #tpu.memory_space<vmem>>, vector<128x512xbf16>
    %cst_51 = arith.constant dense<0.000000e+00> : vector<16x512xf32>
    %147 = tpu.matmul %145, %146, %cst_51 {dimension_numbers = #tpu.dot_dimension_numbers<[1], [0], [0], [1], [0, 0, 1, 1], [], []>} : vector<16x128xbf16>, vector<128x512xbf16>, vector<16x512xf32> -> vector<16x512xf32>
    %148 = arith.addf %144, %147 : vector<16x512xf32>
    %149 = vector.extract_strided_slice %148 {offsets = [0, 0], sizes = [16, 128], strides = [1, 1]} : vector<16x512xf32> to vector<16x128xf32>
    %150 = arith.negf %149 : vector<16x128xf32>
    %151 = math.exp %150 : vector<16x128xf32>
    %cst_52 = arith.constant 1.000000e+00 : f32
    %152 = vector.broadcast %cst_52 : f32 to vector<16x128xf32>
    %153 = arith.addf %152, %151 : vector<16x128xf32>
    %154 = arith.divf %152, %153 : vector<16x128xf32>
    %155 = vector.extract_strided_slice %148 {offsets = [0, 128], sizes = [16, 128], strides = [1, 1]} : vector<16x512xf32> to vector<16x128xf32>
    %156 = arith.negf %155 : vector<16x128xf32>
    %157 = math.exp %156 : vector<16x128xf32>
    %cst_53 = arith.constant 1.000000e+00 : f32
    %158 = vector.broadcast %cst_53 : f32 to vector<16x128xf32>
    %159 = arith.addf %158, %157 : vector<16x128xf32>
    %160 = arith.divf %158, %159 : vector<16x128xf32>
    %161 = vector.extract_strided_slice %148 {offsets = [0, 256], sizes = [16, 128], strides = [1, 1]} : vector<16x512xf32> to vector<16x128xf32>
    %162 = math.tanh %161 : vector<16x128xf32>
    %163 = vector.extract_strided_slice %148 {offsets = [0, 384], sizes = [16, 128], strides = [1, 1]} : vector<16x512xf32> to vector<16x128xf32>
    %164 = arith.negf %163 : vector<16x128xf32>
    %165 = math.exp %164 : vector<16x128xf32>
    %cst_54 = arith.constant 1.000000e+00 : f32
    %166 = vector.broadcast %cst_54 : f32 to vector<16x128xf32>
    %167 = arith.addf %166, %165 : vector<16x128xf32>
    %168 = arith.divf %166, %167 : vector<16x128xf32>
    %169 = arith.mulf %160, %139 : vector<16x128xf32>
    %170 = arith.mulf %154, %162 : vector<16x128xf32>
    %171 = arith.addf %169, %170 : vector<16x128xf32>
    %172 = math.tanh %171 : vector<16x128xf32>
    %173 = arith.mulf %168, %172 : vector<16x128xf32>
    %c5_i32 = arith.constant 5 : i32
    %174 = arith.index_cast %c5_i32 : i32 to index
    %c0_55 = arith.constant 0 : index
    %c0_56 = arith.constant 0 : index
    %175 = vector.load %arg10[%174, %c0_55, %c0_56] : memref<8x16x512xf32, #tpu.memory_space<vmem>>, vector<1x16x512xf32>
    %176 = vector.shape_cast %175 : vector<1x16x512xf32> to vector<16x512xf32>
    %177 = arith.truncf %173 : vector<16x128xf32> to vector<16x128xbf16>
    %c0_57 = arith.constant 0 : index
    %c0_58 = arith.constant 0 : index
    %178 = vector.load %arg3[%c0_57, %c0_58] : memref<128x512xbf16, #tpu.memory_space<vmem>>, vector<128x512xbf16>
    %cst_59 = arith.constant dense<0.000000e+00> : vector<16x512xf32>
    %179 = tpu.matmul %177, %178, %cst_59 {dimension_numbers = #tpu.dot_dimension_numbers<[1], [0], [0], [1], [0, 0, 1, 1], [], []>} : vector<16x128xbf16>, vector<128x512xbf16>, vector<16x512xf32> -> vector<16x512xf32>
    %180 = arith.addf %176, %179 : vector<16x512xf32>
    %181 = vector.extract_strided_slice %180 {offsets = [0, 0], sizes = [16, 128], strides = [1, 1]} : vector<16x512xf32> to vector<16x128xf32>
    %182 = arith.negf %181 : vector<16x128xf32>
    %183 = math.exp %182 : vector<16x128xf32>
    %cst_60 = arith.constant 1.000000e+00 : f32
    %184 = vector.broadcast %cst_60 : f32 to vector<16x128xf32>
    %185 = arith.addf %184, %183 : vector<16x128xf32>
    %186 = arith.divf %184, %185 : vector<16x128xf32>
    %187 = vector.extract_strided_slice %180 {offsets = [0, 128], sizes = [16, 128], strides = [1, 1]} : vector<16x512xf32> to vector<16x128xf32>
    %188 = arith.negf %187 : vector<16x128xf32>
    %189 = math.exp %188 : vector<16x128xf32>
    %cst_61 = arith.constant 1.000000e+00 : f32
    %190 = vector.broadcast %cst_61 : f32 to vector<16x128xf32>
    %191 = arith.addf %190, %189 : vector<16x128xf32>
    %192 = arith.divf %190, %191 : vector<16x128xf32>
    %193 = vector.extract_strided_slice %180 {offsets = [0, 256], sizes = [16, 128], strides = [1, 1]} : vector<16x512xf32> to vector<16x128xf32>
    %194 = math.tanh %193 : vector<16x128xf32>
    %195 = vector.extract_strided_slice %180 {offsets = [0, 384], sizes = [16, 128], strides = [1, 1]} : vector<16x512xf32> to vector<16x128xf32>
    %196 = arith.negf %195 : vector<16x128xf32>
    %197 = math.exp %196 : vector<16x128xf32>
    %cst_62 = arith.constant 1.000000e+00 : f32
    %198 = vector.broadcast %cst_62 : f32 to vector<16x128xf32>
    %199 = arith.addf %198, %197 : vector<16x128xf32>
    %200 = arith.divf %198, %199 : vector<16x128xf32>
    %201 = arith.mulf %192, %171 : vector<16x128xf32>
    %202 = arith.mulf %186, %194 : vector<16x128xf32>
    %203 = arith.addf %201, %202 : vector<16x128xf32>
    %204 = math.tanh %203 : vector<16x128xf32>
    %205 = arith.mulf %200, %204 : vector<16x128xf32>
    %c6_i32 = arith.constant 6 : i32
    %206 = arith.index_cast %c6_i32 : i32 to index
    %c0_63 = arith.constant 0 : index
    %c0_64 = arith.constant 0 : index
    %207 = vector.load %arg10[%206, %c0_63, %c0_64] : memref<8x16x512xf32, #tpu.memory_space<vmem>>, vector<1x16x512xf32>
    %208 = vector.shape_cast %207 : vector<1x16x512xf32> to vector<16x512xf32>
    %209 = arith.truncf %205 : vector<16x128xf32> to vector<16x128xbf16>
    %c0_65 = arith.constant 0 : index
    %c0_66 = arith.constant 0 : index
    %210 = vector.load %arg3[%c0_65, %c0_66] : memref<128x512xbf16, #tpu.memory_space<vmem>>, vector<128x512xbf16>
    %cst_67 = arith.constant dense<0.000000e+00> : vector<16x512xf32>
    %211 = tpu.matmul %209, %210, %cst_67 {dimension_numbers = #tpu.dot_dimension_numbers<[1], [0], [0], [1], [0, 0, 1, 1], [], []>} : vector<16x128xbf16>, vector<128x512xbf16>, vector<16x512xf32> -> vector<16x512xf32>
    %212 = arith.addf %208, %211 : vector<16x512xf32>
    %213 = vector.extract_strided_slice %212 {offsets = [0, 0], sizes = [16, 128], strides = [1, 1]} : vector<16x512xf32> to vector<16x128xf32>
    %214 = arith.negf %213 : vector<16x128xf32>
    %215 = math.exp %214 : vector<16x128xf32>
    %cst_68 = arith.constant 1.000000e+00 : f32
    %216 = vector.broadcast %cst_68 : f32 to vector<16x128xf32>
    %217 = arith.addf %216, %215 : vector<16x128xf32>
    %218 = arith.divf %216, %217 : vector<16x128xf32>
    %219 = vector.extract_strided_slice %212 {offsets = [0, 128], sizes = [16, 128], strides = [1, 1]} : vector<16x512xf32> to vector<16x128xf32>
    %220 = arith.negf %219 : vector<16x128xf32>
    %221 = math.exp %220 : vector<16x128xf32>
    %cst_69 = arith.constant 1.000000e+00 : f32
    %222 = vector.broadcast %cst_69 : f32 to vector<16x128xf32>
    %223 = arith.addf %222, %221 : vector<16x128xf32>
    %224 = arith.divf %222, %223 : vector<16x128xf32>
    %225 = vector.extract_strided_slice %212 {offsets = [0, 256], sizes = [16, 128], strides = [1, 1]} : vector<16x512xf32> to vector<16x128xf32>
    %226 = math.tanh %225 : vector<16x128xf32>
    %227 = vector.extract_strided_slice %212 {offsets = [0, 384], sizes = [16, 128], strides = [1, 1]} : vector<16x512xf32> to vector<16x128xf32>
    %228 = arith.negf %227 : vector<16x128xf32>
    %229 = math.exp %228 : vector<16x128xf32>
    %cst_70 = arith.constant 1.000000e+00 : f32
    %230 = vector.broadcast %cst_70 : f32 to vector<16x128xf32>
    %231 = arith.addf %230, %229 : vector<16x128xf32>
    %232 = arith.divf %230, %231 : vector<16x128xf32>
    %233 = arith.mulf %224, %203 : vector<16x128xf32>
    %234 = arith.mulf %218, %226 : vector<16x128xf32>
    %235 = arith.addf %233, %234 : vector<16x128xf32>
    %236 = math.tanh %235 : vector<16x128xf32>
    %237 = arith.mulf %232, %236 : vector<16x128xf32>
    %c7_i32 = arith.constant 7 : i32
    %238 = arith.index_cast %c7_i32 : i32 to index
    %c0_71 = arith.constant 0 : index
    %c0_72 = arith.constant 0 : index
    %239 = vector.load %arg10[%238, %c0_71, %c0_72] : memref<8x16x512xf32, #tpu.memory_space<vmem>>, vector<1x16x512xf32>
    %240 = vector.shape_cast %239 : vector<1x16x512xf32> to vector<16x512xf32>
    %241 = arith.truncf %237 : vector<16x128xf32> to vector<16x128xbf16>
    %c0_73 = arith.constant 0 : index
    %c0_74 = arith.constant 0 : index
    %242 = vector.load %arg3[%c0_73, %c0_74] : memref<128x512xbf16, #tpu.memory_space<vmem>>, vector<128x512xbf16>
    %cst_75 = arith.constant dense<0.000000e+00> : vector<16x512xf32>
    %243 = tpu.matmul %241, %242, %cst_75 {dimension_numbers = #tpu.dot_dimension_numbers<[1], [0], [0], [1], [0, 0, 1, 1], [], []>} : vector<16x128xbf16>, vector<128x512xbf16>, vector<16x512xf32> -> vector<16x512xf32>
    %244 = arith.addf %240, %243 : vector<16x512xf32>
    %245 = vector.extract_strided_slice %244 {offsets = [0, 0], sizes = [16, 128], strides = [1, 1]} : vector<16x512xf32> to vector<16x128xf32>
    %246 = arith.negf %245 : vector<16x128xf32>
    %247 = math.exp %246 : vector<16x128xf32>
    %cst_76 = arith.constant 1.000000e+00 : f32
    %248 = vector.broadcast %cst_76 : f32 to vector<16x128xf32>
    %249 = arith.addf %248, %247 : vector<16x128xf32>
    %250 = arith.divf %248, %249 : vector<16x128xf32>
    %251 = vector.extract_strided_slice %244 {offsets = [0, 128], sizes = [16, 128], strides = [1, 1]} : vector<16x512xf32> to vector<16x128xf32>
    %252 = arith.negf %251 : vector<16x128xf32>
    %253 = math.exp %252 : vector<16x128xf32>
    %cst_77 = arith.constant 1.000000e+00 : f32
    %254 = vector.broadcast %cst_77 : f32 to vector<16x128xf32>
    %255 = arith.addf %254, %253 : vector<16x128xf32>
    %256 = arith.divf %254, %255 : vector<16x128xf32>
    %257 = vector.extract_strided_slice %244 {offsets = [0, 256], sizes = [16, 128], strides = [1, 1]} : vector<16x512xf32> to vector<16x128xf32>
    %258 = math.tanh %257 : vector<16x128xf32>
    %259 = vector.extract_strided_slice %244 {offsets = [0, 384], sizes = [16, 128], strides = [1, 1]} : vector<16x512xf32> to vector<16x128xf32>
    %260 = arith.negf %259 : vector<16x128xf32>
    %261 = math.exp %260 : vector<16x128xf32>
    %cst_78 = arith.constant 1.000000e+00 : f32
    %262 = vector.broadcast %cst_78 : f32 to vector<16x128xf32>
    %263 = arith.addf %262, %261 : vector<16x128xf32>
    %264 = arith.divf %262, %263 : vector<16x128xf32>
    %265 = arith.mulf %256, %235 : vector<16x128xf32>
    %266 = arith.mulf %250, %258 : vector<16x128xf32>
    %267 = arith.addf %265, %266 : vector<16x128xf32>
    %268 = math.tanh %267 : vector<16x128xf32>
    %269 = arith.mulf %264, %268 : vector<16x128xf32>
    %c8_i32 = arith.constant 8 : i32
    %c0_79 = arith.constant 0 : index
    %c0_80 = arith.constant 0 : index
    %270 = vector.load %arg8[%c0_79, %c0_80] : memref<16x128xf32, #tpu.memory_space<vmem>>, vector<16x128xf32>
    tpu.vector_store %arg8[%c0_79, %c0_80], %269 {strides = array<i32>} : memref<16x128xf32, #tpu.memory_space<vmem>>, vector<16x128xf32>,
    %c0_81 = arith.constant 0 : index
    %c0_82 = arith.constant 0 : index
    %271 = vector.load %arg9[%c0_81, %c0_82] : memref<16x128xf32, #tpu.memory_space<vmem>>, vector<16x128xf32>
    tpu.vector_store %arg9[%c0_81, %c0_82], %267 {strides = array<i32>} : memref<16x128xf32, #tpu.memory_space<vmem>>, vector<16x128xf32>,
    %c0_i32_83 = arith.constant 0 : i32
    %272 = arith.cmpi eq, %arg0, %c0_i32_83 : i32
    %273 = arith.extui %272 : i1 to i32
    %c0_i32_84 = arith.constant 0 : i32
    %274 = arith.cmpi ne, %273, %c0_i32_84 : i32
    scf.if %274 {
      %c0_85 = arith.constant 0 : index
      %c0_86 = arith.constant 0 : index
      %275 = vector.load %arg8[%c0_85, %c0_86] : memref<16x128xf32, #tpu.memory_space<vmem>>, vector<16x128xf32>
      %276 = arith.truncf %275 : vector<16x128xf32> to vector<16x128xbf16>
      %c0_87 = arith.constant 0 : index
      %c0_88 = arith.constant 0 : index
      %277 = vector.load %arg5[%c0_87, %c0_88] : memref<128x128xbf16, #tpu.memory_space<vmem>>, vector<128x128xbf16>
      %cst_89 = arith.constant dense<0.000000e+00> : vector<16x128xf32>
      %278 = tpu.matmul %276, %277, %cst_89 {dimension_numbers = #tpu.dot_dimension_numbers<[1], [0], [0], [1], [0, 0, 1, 1], [], []>} : vector<16x128xbf16>, vector<128x128xbf16>, vector<16x128xf32> -> vector<16x128xf32>
      %c0_90 = arith.constant 0 : index
      %c0_91 = arith.constant 0 : index
      %279 = vector.load %arg6[%c0_90, %c0_91] : memref<1x128xf32, #tpu.memory_space<vmem>>, vector<1x128xf32>
      %280 = vector.broadcast %279 : vector<1x128xf32> to vector<16x128xf32>
      %281 = arith.addf %278, %280 : vector<16x128xf32>
      %282 = tpu.iota {dimensions = array<i32: 0>} : vector<16x128xi32>
      %c2_i32_92 = arith.constant 2 : i32
      %283 = vector.broadcast %c2_i32_92 : i32 to vector<16x128xi32>
      %284 = arith.cmpi slt, %282, %283 : vector<16x128xi32>
      %cst_93 = arith.constant -1.000000e+30 : f32
      %285 = vector.broadcast %cst_93 : f32 to vector<16x128xf32>
      %286 = arith.select %284, %281, %285 : vector<16x128xi1>, vector<16x128xf32>
      %cst_94 = arith.constant dense<0xFF800000> : vector<128xf32>
      %287 = vector.multi_reduction <maximumf>, %286, %cst_94 [0] : vector<16x128xf32> to vector<128xf32>
      %288 = vector.shape_cast %287 : vector<128xf32> to vector<1x128xf32>
      %289 = vector.broadcast %288 : vector<1x128xf32> to vector<16x128xf32>
      %290 = arith.subf %286, %289 : vector<16x128xf32>
      %291 = math.exp %290 : vector<16x128xf32>
      %cst_95 = arith.constant dense<0.000000e+00> : vector<128xf32>
      %292 = vector.multi_reduction <add>, %291, %cst_95 [0] : vector<16x128xf32> to vector<128xf32>
      %293 = vector.shape_cast %292 : vector<128xf32> to vector<1x128xf32>
      %294 = math.log %293 : vector<1x128xf32>
      %295 = vector.broadcast %294 : vector<1x128xf32> to vector<16x128xf32>
      %296 = arith.subf %290, %295 : vector<16x128xf32>
      %c0_96 = arith.constant 0 : index
      %c0_97 = arith.constant 0 : index
      %297 = vector.load %arg7[%c0_96, %c0_97] : memref<16x128xf32, #tpu.memory_space<vmem>>, vector<16x128xf32>
      tpu.vector_store %arg7[%c0_96, %c0_97], %296 {strides = array<i32>} : memref<16x128xf32, #tpu.memory_space<vmem>>, vector<16x128xf32>,
    } else {
    }
    return
  }
  func.func @transform_0(%arg0: i32) -> (i32, i32, i32) {
    %c0_i32 = arith.constant 0 : i32
    %c0_i32_0 = arith.constant 0 : i32
    %c0_i32_1 = arith.constant 0 : i32
    return %arg0, %c0_i32, %c0_i32_0 : i32, i32, i32
  }
  func.func @transform_1(%arg0: i32) -> (i32, i32) {
    %c0_i32 = arith.constant 0 : i32
    %c0_i32_0 = arith.constant 0 : i32
    %c0_i32_1 = arith.constant 0 : i32
    return %c0_i32, %c0_i32_0 : i32, i32
  }
  func.func @transform_2(%arg0: i32) -> (i32, i32) {
    %c0_i32 = arith.constant 0 : i32
    %c0_i32_0 = arith.constant 0 : i32
    %c0_i32_1 = arith.constant 0 : i32
    return %c0_i32, %c0_i32_0 : i32, i32
  }
  func.func @transform_3(%arg0: i32) -> (i32, i32) {
    %c0_i32 = arith.constant 0 : i32
    %c0_i32_0 = arith.constant 0 : i32
    %c0_i32_1 = arith.constant 0 : i32
    return %c0_i32, %c0_i32_0 : i32, i32
  }
  func.func @transform_4(%arg0: i32) -> (i32, i32) {
    %c0_i32 = arith.constant 0 : i32
    %c0_i32_0 = arith.constant 0 : i32
    %c0_i32_1 = arith.constant 0 : i32
    return %c0_i32, %c0_i32_0 : i32, i32
  }
  func.func @transform_5(%arg0: i32) -> (i32, i32) {
    %c0_i32 = arith.constant 0 : i32
    %c0_i32_0 = arith.constant 0 : i32
    %c0_i32_1 = arith.constant 0 : i32
    return %c0_i32, %c0_i32_0 : i32, i32
  }
  func.func @transform_6(%arg0: i32) -> (i32, i32) {
    %c0_i32 = arith.constant 0 : i32
    %c0_i32_0 = arith.constant 0 : i32
    %c0_i32_1 = arith.constant 0 : i32
    return %c0_i32, %c0_i32_0 : i32, i32
  }
}

</mosaic_0001>

<bundles_post_ra>
// kernel: tpu_custom_call.1
= control target key start
LH: loop header
LB: loop body
LE: loop exit
PB: predicated region body
PF: predicated region fallthrough
CT: control target
= control target key end

     0   :  { %11 = vsyncpa [#allocation6], 0  ;;  %s3752_s0 = inlined_call_operand.hbm [shape: bf16[8,16,128], index: 0, kind: input, shape index: {}]   ;;  %s3753_s1 = inlined_call_operand.hbm [shape: bf16[128,512], index: 1, kind: input, shape index: {}]   ;;  %s3754_s2 = inlined_call_operand.hbm [shape: bf16[128,512], index: 2, kind: input, shape index: {}]   ;;  %s3755_s3 = inlined_call_operand.vmem [shape: f32[1,512], index: 3, kind: input, shape index: {}]   ;;  %s3756_s4 = inlined_call_operand.hbm [shape: bf16[128,128], index: 4, kind: input, shape index: {}]   ;;  %s3757_s5 = inlined_call_operand.vmem [shape: f32[1,128], index: 5, kind: input, shape index: {}]   ;;  %s3758_s6 = inlined_call_operand.hbm [shape: f32[16,128], index: 6, kind: output, shape index: {}]  }
   0x1   :  { %12 = vsyncpa [#allocation9], 0 }
   0x2   :  { %13 = vsyncpa [#allocation12], 0 }
   0x3   :  { %14 = vsyncpa [#allocation7], 0  ;;  %s3066_s21 = smov [#allocation8]   ;;  %s2948_s25 = scalar_lea.hbm %s3753_s1, 4096 }
   0x4   :  { %s32_s22 = sshll.u32 %s3066_s21, 4  ;;  %p2949_p0 = scmp.ne.s32.totalorder %s3753_s1, %s2948_s25  ;;  %s33_s22 = int_to_ptr.vmem [resolvable:$true] %s32_s22 }
   0x5   :  { %p2952_p1 = scmp.lt.u32.totalorder %s2948_s25, %s3753_s1 }
   0x7   :  { %p2954_p2 = pnand %p2952_p1, %p2949_p0 }
   0x9   :  { %2957 = shalt.err (!%p2954_p2)
}
   0xa   :  { %s2958_s30 = scalar_lea.vmem %s33_s22, 4096  ;;  %p2963_p4 = scmp.lt.s32.totalorder %s33_s22, %s33_s22 }
   0xb   :  { %p2959_p3 = scmp.ne.s32.totalorder %s33_s22, %s2958_s30  ;;  %p2964_p5 = scmp.lt.s32.totalorder %s2958_s30, %s2958_s30 }
   0xd   :  { %p2965_p6 = por %p2964_p5, %p2963_p4 }
   0xf   :  { %p2966_p7 = pnand %p2965_p6, %p2959_p3 }
  0x11   :  { %2969 = shalt.err (!%p2966_p7)
}
  0x12   :  { %s3067_s7 = smov 256   ;;  %s3068_s8 = smov 16  }
  0x13   :  { %38 = dma.hbm_to_vmem [thread:$0]  %s3753_s1, 4096, %s33_s22, [#allocation9], %s3067_s7, %s3067_s7, %s3068_s8  }
  0x14   :  { %s3069_s11 = smov [#allocation5]   ;;  %s2970_s15 = scalar_lea.hbm %s3752_s0, 1024 }
  0x15   :  { %s20_s12 = sshll.u32 %s3069_s11, 4  ;;  %p2971_p8 = scmp.ne.s32.totalorder %s3752_s0, %s2970_s15  ;;  %s21_s12 = int_to_ptr.vmem [resolvable:$true] %s20_s12 }
  0x16   :  { %p2974_p9 = scmp.lt.u32.totalorder %s2970_s15, %s3752_s0 }
  0x18   :  { %p2976_p10 = pnand %p2974_p9, %p2971_p8 }
  0x1a   :  { %2979 = shalt.err (!%p2976_p10)
}
  0x1b   :  { %s2980_s20 = scalar_lea.vmem %s21_s12, 1024  ;;  %p2985_p12 = scmp.lt.s32.totalorder %s21_s12, %s21_s12 }
  0x1c   :  { %p2981_p11 = scmp.ne.s32.totalorder %s21_s12, %s2980_s20  ;;  %p2986_p13 = scmp.lt.s32.totalorder %s2980_s20, %s2980_s20 }
  0x1e   :  { %p2987_p0 = por %p2986_p13, %p2985_p12 }
  0x20   :  { %p2988_p1 = pnand %p2987_p0, %p2981_p11 }
  0x22   :  { %2991 = shalt.err (!%p2988_p1)
}
  0x23   :  { %s3070_s1 = smov 64   ;;  %s3071_s21 = smov 4  }
  0x24   :  { %26 = dma.hbm_to_vmem [thread:$0]  %s3752_s0, 1024, %s21_s12, [#allocation6], %s3070_s1, %s3070_s1, %s3071_s21  }
  0x25   :  { %s3072_s24 = smov [#allocation10]   ;;  %s3073_s26 = smov [#allocation11]  }
  0x26   :  { %s44_s25 = sshll.u32 %s3072_s24, 4  ;;  %s58_s27 = sshll.u32 %s3073_s26, 4  ;;  %s45_s25 = int_to_ptr.vmem [resolvable:$true] %s44_s25  ;;  %s3146_s27 = int_to_ptr.vmem [resolvable:$true] %s58_s27 }
  0x27   :  { %s2992_s30 = scalar_lea.hbm %s3754_s2, 4096 }
  0x28   :  { %p2993_p2 = scmp.ne.s32.totalorder %s3754_s2, %s2992_s30  ;;  %p2996_p3 = scmp.lt.u32.totalorder %s2992_s30, %s3754_s2 }
  0x2a   :  { %p2998_p4 = pnand %p2996_p3, %p2993_p2 }
  0x2c   :  { %3001 = shalt.err (!%p2998_p4)
}
  0x2d   :  { %s3002_s0 = scalar_lea.vmem %s45_s25, 4096  ;;  %p3007_p6 = scmp.lt.s32.totalorder %s45_s25, %s45_s25 }
  0x2e   :  { %p3003_p5 = scmp.ne.s32.totalorder %s45_s25, %s3002_s0  ;;  %p3008_p7 = scmp.lt.s32.totalorder %s3002_s0, %s3002_s0 }
  0x30   :  { %p3009_p8 = por %p3008_p7, %p3007_p6 }
  0x32   :  { %p3010_p9 = pnand %p3009_p8, %p3003_p5 }
  0x34   :  { %3013 = shalt.err (!%p3010_p9)
}
  0x35   :  { %50 = dma.hbm_to_vmem [thread:$0]  %s3754_s2, 4096, %s45_s25, [#allocation9], %s3067_s7, %s3067_s7, %s3068_s8  }
  0x36   :  { %s3014_s17 = scalar_lea.hbm %s3756_s4, 1024 }
  0x37   :  { %p3015_p10 = scmp.ne.s32.totalorder %s3756_s4, %s3014_s17  ;;  %p3018_p11 = scmp.lt.u32.totalorder %s3014_s17, %s3756_s4 }
  0x39   :  { %p3020_p12 = pnand %p3018_p11, %p3015_p10 }
  0x3b   :  { %3023 = shalt.err (!%p3020_p12)
}
  0x3c   :  { %s3024_s23 = scalar_lea.vmem %s3146_s27, 1024  ;;  %p3029_p0 = scmp.lt.s32.totalorder %s3146_s27, %s3146_s27 }
  0x3d   :  { %p3025_p13 = scmp.ne.s32.totalorder %s3146_s27, %s3024_s23  ;;  %p3030_p1 = scmp.lt.s32.totalorder %s3024_s23, %s3024_s23 }
  0x3f   :  { %p3031_p2 = por %p3030_p1, %p3029_p0 }
  0x41   :  { %p3032_p3 = pnand %p3031_p2, %p3025_p13 }
  0x43   :  { %3035 = shalt.err (!%p3032_p3)
}
  0x44   :  { %64 = dma.hbm_to_vmem [thread:$0]  %s3756_s4, 1024, %s3146_s27, [#allocation12], %s3070_s1, %s3070_s1, %s3071_s21  }
  0x45   :  { %3058 = dma.done.wait [#allocation6], 1024  }
  0x46   :  { %3059 = vsyncadd [#allocation6], 4294966272 }
  0x47   :  { %3060 = dma.done.wait [#allocation9], 8192  }
  0x48   :  { %3061 = vsyncadd [#allocation9], 4294959104 }
  0x49   :  { %3062 = dma.done.wait [#allocation12], 1024  }
  0x4a   :  { %3063 = vsyncadd [#allocation12], 4294966272  ;;  %v3074_v0 = vmov 0   ;;  %v2542_v1 = vld [vmem:[#allocation8 + $0x4] ss:$16 sps:$4 sm:$0xff]   ;;  %v2594_v43 = vld [vmem:[#allocation5 + $0x8] sm:$0xff]  }
  0x4b   :  { %398 = vmatprep.mubr.bf16.mxu0 %v3074_v0  ;;  %511 = vmatprep.mubr.bf16.mxu1 %v3074_v0  ;;  %v2544_v2 = vld [vmem:[#allocation8 + $0xc] ss:$16 sps:$4 sm:$0xff]   ;;  %v2546_v3 = vld [vmem:[#allocation8] ss:$16 sps:$4 sm:$0xff]   ;;  %v2547_v4 = vld [vmem:[#allocation8 + $0x8] ss:$16 sps:$4 sm:$0xff]  }
  0x4c   :  { %366 = vmatprep.subr.bf16.mxu0 %v2542_v1  ;;  %479 = vmatprep.subr.bf16.mxu1 %v2544_v2  ;;  %v2548_v5 = vld [vmem:[#allocation8 + $0x24] ss:$16 sps:$4 sm:$0xff]   ;;  %v2550_v6 = vld [vmem:[#allocation8 + $0x2c] ss:$16 sps:$4 sm:$0xff]   ;;  %v2552_v7 = vld [vmem:[#allocation8 + $0x20] ss:$16 sps:$4 sm:$0xff]  }
  0x4d   :  { %367 = vmatpush1.bf16.msra.mxu0 %v2546_v3  ;;  %480 = vmatpush1.bf16.msra.mxu1 %v2547_v4  ;;  %v2553_v8 = vld [vmem:[#allocation8 + $0x28] ss:$16 sps:$4 sm:$0xff]   ;;  %v2554_v9 = vld [vmem:[#allocation8 + $0x44] ss:$16 sps:$4 sm:$0xff]   ;;  %v2556_v10 = vld [vmem:[#allocation8 + $0x4c] ss:$16 sps:$4 sm:$0xff]  }
  0x4e   :  { %368 = vmatprep.subr.bf16.mxu0 %v2548_v5  ;;  %481 = vmatprep.subr.bf16.mxu1 %v2550_v6  ;;  %v2558_v11 = vld [vmem:[#allocation8 + $0x40] ss:$16 sps:$4 sm:$0xff]   ;;  %v2559_v12 = vld [vmem:[#allocation8 + $0x48] ss:$16 sps:$4 sm:$0xff]   ;;  %v2560_v13 = vld [vmem:[#allocation8 + $0x64] ss:$16 sps:$4 sm:$0xff]  }
  0x4f   :  { %v2562_v14 = vld [vmem:[#allocation8 + $0x6c] ss:$16 sps:$4 sm:$0xff]   ;;  %v2564_v15 = vld [vmem:[#allocation8 + $0x60] ss:$16 sps:$4 sm:$0xff]   ;;  %v2565_v16 = vld [vmem:[#allocation8 + $0x68] ss:$16 sps:$4 sm:$0xff]  }
  0x50   :  { %v2566_v17 = vld [vmem:[#allocation8 + $0x84] ss:$16 sps:$4 sm:$0xff]   ;;  %v2568_v18 = vld [vmem:[#allocation8 + $0x8c] ss:$16 sps:$4 sm:$0xff]   ;;  %v2570_v19 = vld [vmem:[#allocation8 + $0x80] ss:$16 sps:$4 sm:$0xff]  }
  0x51   :  { %369 = vmatpush1.bf16.msra.mxu0 %v2552_v7  ;;  %482 = vmatpush1.bf16.msra.mxu1 %v2553_v8  ;;  %v2571_v20 = vld [vmem:[#allocation8 + $0x88] ss:$16 sps:$4 sm:$0xff]   ;;  %v2572_v21 = vld [vmem:[#allocation8 + $0xa4] ss:$16 sps:$4 sm:$0xff]   ;;  %v2574_v22 = vld [vmem:[#allocation8 + $0xac] ss:$16 sps:$4 sm:$0xff]  }
  0x52   :  { %370 = vmatprep.subr.bf16.mxu0 %v2554_v9  ;;  %483 = vmatprep.subr.bf16.mxu1 %v2556_v10  ;;  %v2576_v23 = vld [vmem:[#allocation8 + $0xa0] ss:$16 sps:$4 sm:$0xff]   ;;  %v2577_v24 = vld [vmem:[#allocation8 + $0xa8] ss:$16 sps:$4 sm:$0xff]   ;;  %v2578_v25 = vld [vmem:[#allocation8 + $0xc4] ss:$16 sps:$4 sm:$0xff]  }
  0x53   :  { %v2580_v26 = vld [vmem:[#allocation8 + $0xcc] ss:$16 sps:$4 sm:$0xff]   ;;  %v2582_v27 = vld [vmem:[#allocation8 + $0xc0] ss:$16 sps:$4 sm:$0xff]   ;;  %v2583_v28 = vld [vmem:[#allocation8 + $0xc8] ss:$16 sps:$4 sm:$0xff]  }
  0x54   :  { %v2584_v29 = vld [vmem:[#allocation8 + $0xe4] ss:$16 sps:$4 sm:$0xff]   ;;  %v2586_v30 = vld [vmem:[#allocation8 + $0xec] ss:$16 sps:$4 sm:$0xff]   ;;  %v2588_v31 = vld [vmem:[#allocation8 + $0xe0] ss:$16 sps:$4 sm:$0xff]  }
  0x55   :  { %371 = vmatpush1.bf16.msra.mxu0 %v2558_v11  ;;  %484 = vmatpush1.bf16.msra.mxu1 %v2559_v12  ;;  %v2589_v32 = vld [vmem:[#allocation8 + $0xe8] ss:$16 sps:$4 sm:$0xff]   ;;  %v3185_v33 = vld [vmem:[#allocation10 + $0x4] ss:$16 sps:$4 sm:$0xff]   ;;  %v3187_v34 = vld [vmem:[#allocation10 + $0xc] ss:$16 sps:$4 sm:$0xff]   ;;  %v138_v11 = vlaneseq }
  0x56   :  { %372 = vmatprep.subr.bf16.mxu0 %v2560_v13  ;;  %485 = vmatprep.subr.bf16.mxu1 %v2562_v14  ;;  %v2590_v35 = vld [vmem:[#allocation5] sm:$0xff]   ;;  %v3195_v38 = vld [vmem:[#allocation10 + $0x8] ss:$16 sps:$4 sm:$0xff]   ;;  %v3197_v39 = vld [vmem:[#allocation10 + $0x2c] ss:$16 sps:$4 sm:$0xff]   ;;  %v3075_v10 = vmov 0.0|0.0  }
  0x57   :  { %v3189_v36 = vld [vmem:[#allocation10] ss:$16 sps:$4 sm:$0xff]   ;;  %v3192_v37 = vld [vmem:[#allocation10 + $0x24] ss:$16 sps:$4 sm:$0xff]   ;;  %v3208_v42 = vld [vmem:[#allocation10 + $0x28] ss:$16 sps:$4 sm:$0xff]  }
  0x58   :  { %v3201_v40 = vld [vmem:[#allocation10 + $0x20] ss:$16 sps:$4 sm:$0xff]   ;;  %v3205_v41 = vld [vmem:[#allocation10 + $0x44] ss:$16 sps:$4 sm:$0xff]   ;;  %v3217_v46 = vld [vmem:[#allocation10 + $0x4c] ss:$16 sps:$4 sm:$0xff]  }
  0x59   :  { %373 = vmatpush1.bf16.msra.mxu0 %v2564_v15  ;;  %486 = vmatpush1.bf16.msra.mxu1 %v2565_v16  ;;  %v3212_v44 = vld [vmem:[#allocation10 + $0x40] ss:$16 sps:$4 sm:$0xff]   ;;  %v3214_v45 = vld [vmem:[#allocation10 + $0x64] ss:$16 sps:$4 sm:$0xff]   ;;  %v3220_v47 = vld [vmem:[#allocation10 + $0x48] ss:$16 sps:$4 sm:$0xff]  }
  0x5a   :  { %374 = vmatprep.subr.bf16.mxu0 %v2566_v17  ;;  %487 = vmatprep.subr.bf16.mxu1 %v2568_v18  ;;  %v3222_v48 = vld [vmem:[#allocation10 + $0x6c] ss:$16 sps:$4 sm:$0xff]   ;;  %v3227_v49 = vld [vmem:[#allocation10 + $0x60] ss:$16 sps:$4 sm:$0xff]   ;;  %v3230_v50 = vld [vmem:[#allocation10 + $0x84] ss:$16 sps:$4 sm:$0xff]  }
  0x5b   :  { %v3234_v51 = vld [vmem:[#allocation10 + $0x68] ss:$16 sps:$4 sm:$0xff]   ;;  %v2600_v52 = vld [vmem:[#allocation5 + $0x10] sm:$0xff]   ;;  %v3240_v54 = vld [vmem:[#allocation10 + $0x8c] ss:$16 sps:$4 sm:$0xff]   ;;  %v3333_v12 = vshrl.u32 %v138_v11, 7 }
  0x5c   :  { %v3237_v53 = vld [vmem:[#allocation10 + $0x80] ss:$16 sps:$4 sm:$0xff]   ;;  %v3243_v55 = vld [vmem:[#allocation10 + $0xa4] ss:$16 sps:$4 sm:$0xff]   ;;  %v3246_v56 = vld [vmem:[#allocation10 + $0x88] ss:$16 sps:$4 sm:$0xff]  }
  0x5d   :  { %375 = vmatpush1.bf16.msra.mxu0 %v2570_v19  ;;  %488 = vmatpush1.bf16.msra.mxu1 %v2571_v20  ;;  %v3248_v57 = vld [vmem:[#allocation10 + $0xac] ss:$16 sps:$4 sm:$0xff]   ;;  %v3250_v58 = vld [vmem:[#allocation10 + $0xa0] ss:$16 sps:$4 sm:$0xff]   ;;  %v3254_v59 = vld [vmem:[#allocation10 + $0xc4] ss:$16 sps:$4 sm:$0xff]  }
  0x5e   :  { %376 = vmatprep.subr.bf16.mxu0 %v2572_v21  ;;  %489 = vmatprep.subr.bf16.mxu1 %v2574_v22  ;;  %v3256_v60 = vld [vmem:[#allocation10 + $0xa8] ss:$16 sps:$4 sm:$0xff]   ;;  %v3264_v62 = vld [vmem:[#allocation10 + $0xc0] ss:$16 sps:$4 sm:$0xff]   ;;  %v3266_v63 = vld [vmem:[#allocation10 + $0xcc] ss:$16 sps:$4 sm:$0xff]  }
  0x5f   :  { %v2607_v61 = vld [vmem:[#allocation5 + $0x18] sm:$0xff]   ;;  %v3270_v1 = vld [vmem:[#allocation10 + $0xe4] ss:$16 sps:$4 sm:$0xff]   ;;  %v3280_v4 = vld [vmem:[#allocation10 + $0xe0] ss:$16 sps:$4 sm:$0xff]   ;;  %v140_v13 = vsub.s32 0, %v3333_v12 }
  0x60   :  { %v3272_v2 = vld [vmem:[#allocation10 + $0xc8] ss:$16 sps:$4 sm:$0xff]   ;;  %v3274_v3 = vld [vmem:[#allocation10 + $0xec] ss:$16 sps:$4 sm:$0xff]   ;;  %v2614_v6 = vld [vmem:[#allocation5 + $0x20] sm:$0xff]   ;;  %v144_v15 = vsub.s32 1, %v3333_v12 }
  0x61   :  { %377 = vmatpush1.bf16.msra.mxu0 %v2576_v23  ;;  %490 = vmatpush1.bf16.msra.mxu1 %v2577_v24  ;;  %v3284_v5 = vld [vmem:[#allocation10 + $0xe8] ss:$16 sps:$4 sm:$0xff]   ;;  %v2628_v8 = vld [vmem:[#allocation5 + $0x30] sm:$0xff]   ;;  %v136_v14 = vld [vmem:[%s3755_s3] sm:$0xf]  ;;  %v152_v20 = vsub.s32 3, %v3333_v12 }
  0x62   :  { %378 = vmatprep.subr.bf16.mxu0 %v2578_v25  ;;  %491 = vmatprep.subr.bf16.mxu1 %v2580_v26  ;;  %v2621_v7 = vld [vmem:[#allocation5 + $0x28] sm:$0xff]   ;;  %v2636_v9 = vld [vmem:[#allocation5 + $0x38] sm:$0xff]   ;;  %v3340_v16 = vrot.slane %v136_v14, %v140_v13  ;;  %v3342_v17 = vrot.slane %v136_v14, %v144_v15  ;;  %vm3077_vm0 = vmmov 0   ;;  %vm2192_vm1 = vcmp.lt.s32.totalorder %v3333_v12, 2 }
  0x65   :  { %379 = vmatpush1.bf16.msra.mxu0 %v2582_v27  ;;  %492 = vmatpush1.bf16.msra.mxu1 %v2583_v28  ;;  %v148_v28 = vsub.s32 2, %v3333_v12 }
  0x66   :  { %380 = vmatprep.subr.bf16.mxu0 %v2584_v29  ;;  %493 = vmatprep.subr.bf16.mxu1 %v2586_v30 }
  0x69   :  { %381 = vmatpush1.bf16.msra.mxu0 %v2588_v31  ;;  %494 = vmatpush1.bf16.msra.mxu1 %v2589_v32 }
  0x6a   :  { %861 = vmatprep.subr.bf16.mxu0 %v3185_v33  ;;  %904 = vmatprep.subr.bf16.mxu1 %v3187_v34 }
  0x6c   :  { %399 = vmatmul.mubr.bf16.vlgmr.msra.gmra.mrb[0].mxu0 %v2590_v35  ;;  %512 = vmatmul.mubr.bf16.vlgmr.msra.gmra.mrb[0].mxu1 %v2590_v35  ;;  %v3349_v35 = vrot.slane %v136_v14, %v152_v20 }
  0x6d   :  { %862 = vmatpush1.bf16.msra.mxu0 %v3189_v36  ;;  %408 = vmatprep.mubr.bf16.mxu0 %v3074_v0 }
  0x6e   :  { %521 = vmatprep.mubr.bf16.mxu1 %v3074_v0  ;;  %863 = vmatprep.subr.bf16.mxu0 %v3192_v37 }
  0x6f   :  { %905 = vmatpush1.bf16.msra.mxu1 %v3195_v38 }
  0x70   :  { %906 = vmatprep.subr.bf16.mxu1 %v3197_v39 }
  0x71   :  { %864 = vmatpush1.bf16.msra.mxu0 %v3201_v40 }
  0x72   :  { %865 = vmatprep.subr.bf16.mxu0 %v3205_v41 }
  0x73   :  { %907 = vmatpush1.bf16.msra.mxu1 %v3208_v42 }
  0x74   :  { %409 = vmatmul.mubr.bf16.gmra.mrb[4].mxu0 %v2594_v43  ;;  %522 = vmatmul.mubr.bf16.gmra.mrb[4].mxu1 %v2594_v43 }
  0x75   :  { %418 = vmatprep.mubr.bf16.mxu0 %v3074_v0  ;;  %531 = vmatprep.mubr.bf16.mxu1 %v3074_v0 }
  0x76   :  { %866 = vmatpush1.bf16.msra.mxu0 %v3212_v44  ;;  %908 = vmatprep.subr.bf16.mxu1 %v3217_v46 }
  0x77   :  { %867 = vmatprep.subr.bf16.mxu0 %v3214_v45  ;;  %909 = vmatpush1.bf16.msra.mxu1 %v3220_v47 }
  0x78   :  { %910 = vmatprep.subr.bf16.mxu1 %v3222_v48 }
  0x7a   :  { %868 = vmatpush1.bf16.msra.mxu0 %v3227_v49 }
  0x7b   :  { %869 = vmatprep.subr.bf16.mxu0 %v3230_v50  ;;  %911 = vmatpush1.bf16.msra.mxu1 %v3234_v51 }
  0x7c   :  { %419 = vmatmul.mubr.bf16.gmra.mrb[8].mxu0 %v2600_v52  ;;  %532 = vmatmul.mubr.bf16.gmra.mrb[8].mxu1 %v2600_v52 }
  0x7d   :  { %428 = vmatprep.mubr.bf16.mxu0 %v3074_v0  ;;  %541 = vmatprep.mubr.bf16.mxu1 %v3074_v0 }
  0x7e   :  { %870 = vmatpush1.bf16.msra.mxu0 %v3237_v53  ;;  %912 = vmatprep.subr.bf16.mxu1 %v3240_v54 }
  0x7f   :  { %871 = vmatprep.subr.bf16.mxu0 %v3243_v55  ;;  %913 = vmatpush1.bf16.msra.mxu1 %v3246_v56 }
  0x80   :  { %914 = vmatprep.subr.bf16.mxu1 %v3248_v57 }
  0x82   :  { %872 = vmatpush1.bf16.msra.mxu0 %v3250_v58 }
  0x83   :  { %873 = vmatprep.subr.bf16.mxu0 %v3254_v59  ;;  %915 = vmatpush1.bf16.msra.mxu1 %v3256_v60 }
  0x84   :  { %429 = vmatmul.mubr.bf16.gmra.mrb[12].mxu0 %v2607_v61  ;;  %542 = vmatmul.mubr.bf16.gmra.mrb[12].mxu1 %v2607_v61 }
  0x85   :  { %438 = vmatprep.mubr.bf16.mxu0 %v3074_v0  ;;  %551 = vmatprep.mubr.bf16.mxu1 %v3074_v0 }
  0x86   :  { %874 = vmatpush1.bf16.msra.mxu0 %v3264_v62  ;;  %916 = vmatprep.subr.bf16.mxu1 %v3266_v63 }
  0x87   :  { %875 = vmatprep.subr.bf16.mxu0 %v3270_v1  ;;  %917 = vmatpush1.bf16.msra.mxu1 %v3272_v2 }
  0x88   :  { %918 = vmatprep.subr.bf16.mxu1 %v3274_v3 }
  0x8a   :  { %876 = vmatpush1.bf16.msra.mxu0 %v3280_v4 }
  0x8b   :  { %919 = vmatpush1.bf16.msra.mxu1 %v3284_v5  ;;  %1013 = vmatprep.subr.bf16.mxu0 %v3185_v33 }
  0x8c   :  { %439 = vmatmul.mubr.bf16.gmra.mrb[16].mxu0 %v2614_v6  ;;  %552 = vmatmul.mubr.bf16.gmra.mrb[16].mxu1 %v2614_v6  ;;  %v3352_v6 = vrot.slane %v136_v14, %v148_v28 }
  0x8d   :  { %448 = vmatprep.mubr.bf16.mxu0 %v3074_v0  ;;  %561 = vmatprep.mubr.bf16.mxu1 %v3074_v0 }
  0x8e   :  { %1056 = vmatprep.subr.bf16.mxu1 %v3187_v34 }
  0x94   :  { %449 = vmatmul.mubr.bf16.gmra.mrb[20].mxu0 %v2621_v7  ;;  %562 = vmatmul.mubr.bf16.gmra.mrb[20].mxu1 %v2621_v7 }
  0x95   :  { %458 = vmatprep.mubr.bf16.mxu0 %v3074_v0  ;;  %571 = vmatprep.mubr.bf16.mxu1 %v3074_v0 }
  0x9c   :  { %459 = vmatmul.mubr.bf16.gmra.mrb[24].mxu0 %v2628_v8  ;;  %572 = vmatmul.mubr.bf16.gmra.mrb[24].mxu1 %v2628_v8 }
  0x9d   :  { %468 = vmatprep.mubr.bf16.mxu0 %v3074_v0  ;;  %581 = vmatprep.mubr.bf16.mxu1 %v3074_v0 }
  0xa4   :  { %469 = vmatmul.mubr.bf16.gmra.mrb[28].mxu0 %v2636_v9  ;;  %582 = vmatmul.mubr.bf16.gmra.mrb[28].mxu1 %v2636_v9 }
  0xa5   :  { %893 = vmatprep.mubr.bf16.mxu0 %v3074_v0  ;;  %936 = vmatprep.mubr.bf16.mxu1 %v3074_v0 }
  0xac   :  { %894 = vmatmul.mubr.bf16.vlgmr.msra.gmra.mrb[0].mxu0 %v3075_v10  ;;  %937 = vmatmul.mubr.bf16.vlgmr.msra.gmra.mrb[0].mxu1 %v3075_v10 }
  0xad   :  { %1014 = vmatpush1.bf16.msra.mxu0 %v3189_v36  ;;  %1057 = vmatpush1.bf16.msra.mxu1 %v3195_v38 }
  0xae   :  { %1015 = vmatprep.subr.bf16.mxu0 %v3192_v37  ;;  %1058 = vmatprep.subr.bf16.mxu1 %v3197_v39 }
  0xaf   :  { %1045 = vmatprep.mubr.bf16.mxu0 %v3074_v0  ;;  %1088 = vmatprep.mubr.bf16.mxu1 %v3074_v0 }
  0xb1   :  { %1016 = vmatpush1.bf16.msra.mxu0 %v3201_v40  ;;  %1059 = vmatpush1.bf16.msra.mxu1 %v3208_v42 }
  0xb2   :  { %1017 = vmatprep.subr.bf16.mxu0 %v3205_v41  ;;  %1060 = vmatprep.subr.bf16.mxu1 %v3217_v46 }
  0xb5   :  { %1018 = vmatpush1.bf16.msra.mxu0 %v3212_v44  ;;  %1061 = vmatpush1.bf16.msra.mxu1 %v3220_v47 }
  0xb6   :  { %1019 = vmatprep.subr.bf16.mxu0 %v3214_v45  ;;  %1062 = vmatprep.subr.bf16.mxu1 %v3222_v48 }
  0xb9   :  { %1020 = vmatpush1.bf16.msra.mxu0 %v3227_v49  ;;  %1063 = vmatpush1.bf16.msra.mxu1 %v3234_v51 }
  0xba   :  { %1021 = vmatprep.subr.bf16.mxu0 %v3230_v50  ;;  %1064 = vmatprep.subr.bf16.mxu1 %v3240_v54 }
  0xbd   :  { %1022 = vmatpush1.bf16.msra.mxu0 %v3237_v53  ;;  %1065 = vmatpush1.bf16.msra.mxu1 %v3246_v56 }
  0xbe   :  { %1023 = vmatprep.subr.bf16.mxu0 %v3243_v55  ;;  %1066 = vmatprep.subr.bf16.mxu1 %v3248_v57 }
  0xc1   :  { %1024 = vmatpush1.bf16.msra.mxu0 %v3250_v58  ;;  %1067 = vmatpush1.bf16.msra.mxu1 %v3256_v60 }
  0xc2   :  { %1025 = vmatprep.subr.bf16.mxu0 %v3254_v59  ;;  %1068 = vmatprep.subr.bf16.mxu1 %v3266_v63 }
  0xc5   :  { %1026 = vmatpush1.bf16.msra.mxu0 %v3264_v62  ;;  %1069 = vmatpush1.bf16.msra.mxu1 %v3272_v2 }
  0xc6   :  { %1027 = vmatprep.subr.bf16.mxu0 %v3270_v1  ;;  %1070 = vmatprep.subr.bf16.mxu1 %v3274_v3 }
  0xc9   :  { %1028 = vmatpush1.bf16.msra.mxu0 %v3280_v4  ;;  %1071 = vmatpush1.bf16.msra.mxu1 %v3284_v5 }
  0xca   :  { %1165 = vmatprep.subr.bf16.mxu0 %v3185_v33  ;;  %1208 = vmatprep.subr.bf16.mxu1 %v3187_v34 }
 0x17f   :  { %v895_v18 = vpop.f32.mrb[0].mxu0  ;;  %v938_v19 = vpop.f32.mrb[0].mxu1 }
 0x180   :  { %v2399_v21 = vadd.f32 %v895_v18, %v3340_v16  ;;  %v897_v22 = vpop.f32.mrb[1].mxu0  ;;  %v940_v23 = vpop.f32.mrb[1].mxu1  ;;  %v2431_v8 = vadd.f32 %v938_v19, %v3352_v6 }
 0x181   :  { %v2400_v24 = vadd.f32 %v897_v22, %v3342_v17  ;;  %v899_v25 = vpop.f32.mrb[2].mxu0  ;;  %v942_v26 = vpop.f32.mrb[2].mxu1  ;;  %v2432_v7 = vadd.f32 %v940_v23, %v3349_v35 }
 0x182   :  { %v2313_v27 = vmul.f32 -1.442695, %v2399_v21  ;;  %v2401_v29 = vadd.f32 %v899_v25, %v3340_v16  ;;  %v901_v30 = vpop.f32.mrb[3].mxu0  ;;  %v944_v31 = vpop.f32.mrb[3].mxu1  ;;  %v2433_v11 = vadd.f32 %v942_v26, %v3352_v6 }
 0x183   :  { %v2315_v32 = vmul.f32 -1.442695, %v2400_v24  ;;  %v2402_v43 = vadd.f32 %v901_v30, %v3342_v17  ;;  %v2317_v9 = vmul.f32 -1.442695, %v2432_v7  ;;  %v2434_v10 = vadd.f32 %v944_v31, %v3349_v35 }
 0x184   :  { %2654 = vpow2.f32 %v2313_v27  ;;  %v2314_v52 = vmul.f32 -1.442695, %v2401_v29 }
 0x185   :  { %2656 = vpow2.f32 %v2315_v32  ;;  %v2316_v61 = vmul.f32 -1.442695, %v2402_v43  ;;  %v2318_v20 = vmul.f32 -1.442695, %v2434_v10 }
 0x186   :  { %2658 = vpow2.f32 %v2314_v52 }
 0x187   :  { %2660 = vpow2.f32 %v2316_v61 }
 0x188   :  { %2662 = vtanh.f32 %v2431_v8 }
 0x189   :  { %2664 = vpow2.f32 %v2317_v9 }
 0x18a   :  { %2666 = vtanh.f32 %v2433_v11 }
 0x18e   :  { %v2655_v13 = vpop.eup %2654 }
 0x18f   :  { %v2657_v15 = vpop.eup %2656  ;;  %v961_v18 = vadd.f32 1.0, %v2655_v13 }
 0x190   :  { %v973_v21 = vadd.f32 1.0, %v2657_v15  ;;  %v2659_v14 = vpop.eup %2658 }
 0x191   :  { %2668 = vrcp.f32 %v961_v18  ;;  %v962_v22 = vadd.f32 1.0, %v2659_v14  ;;  %v2661_v23 = vpop.eup %2660 }
 0x192   :  { %2670 = vrcp.f32 %v973_v21  ;;  %v974_v19 = vadd.f32 1.0, %v2661_v23  ;;  %v2663_v24 = vpop.eup %2662 }
 0x193   :  { %2672 = vpow2.f32 %v2318_v20  ;;  %v2665_v25 = vpop.eup %2664 }
 0x194   :  { %2674 = vrcp.f32 %v962_v22  ;;  %v2667_v26 = vpop.eup %2666  ;;  %v987_v43 = vadd.f32 1.0, %v2665_v25 }
 0x195   :  { %2676 = vrcp.f32 %v974_v19 }
 0x196   :  { %2678 = vrcp.f32 %v987_v43 }
 0x19b   :  { %v2669_v27 = vpop.eup %2668 }
 0x19c   :  { %v2671_v28 = vpop.eup %2670  ;;  %v995_v29 = vmul.f32 %v2669_v27, %v2663_v24 }
 0x19d   :  { %v2673_v30 = vpop.eup %2672  ;;  %v993_v31 = vmul.f32 0.0, %v2671_v28 }
 0x19e   :  { %v2675_v32 = vpop.eup %2674  ;;  %v988_v8 = vadd.f32 1.0, %v2673_v30 }
 0x19f   :  { %v3358_v52 = vadd.f32 %v995_v29, %v993_v31  ;;  %v996_v61 = vmul.f32 %v2675_v32, %v2667_v26  ;;  %v2677_v7 = vpop.eup %2676 }
 0x1a0   :  { %v994_v9 = vmul.f32 0.0, %v2677_v7  ;;  %v2679_v11 = vpop.eup %2678 }
 0x1a1   :  { %2680 = vtanh.f32 %v3358_v52 }
 0x1a2   :  { %v3361_v10 = vadd.f32 %v996_v61, %v994_v9  ;;  %2682 = vrcp.f32 %v988_v8 }
 0x1a4   :  { %2684 = vtanh.f32 %v3361_v10 }
 0x1ab   :  { %v2681_v13 = vpop.eup %2680 }
 0x1ac   :  { %v2683_v15 = vpop.eup %2682  ;;  %v1001_v20 = vmul.f32 %v2681_v13, %v2679_v11 }
 0x1ae   :  { %v2685_v18 = vpop.eup %2684 }
 0x1af   :  { %v1002_v21 = vmul.f32 %v2685_v18, %v2683_v15 }
 0x1b1   :  { %v1012_v14 = vpack.c.bf16 %v1002_v21, %v1001_v20 }
 0x1b3   :  { %1046 = vmatmul.mubr.bf16.vlgmr.msra.gmra.mrb[4].mxu0 %v1012_v14  ;;  %1089 = vmatmul.mubr.bf16.vlgmr.msra.gmra.mrb[4].mxu1 %v1012_v14 }
 0x1b4   :  { %1166 = vmatpush1.bf16.msra.mxu0 %v3189_v36  ;;  %1209 = vmatpush1.bf16.msra.mxu1 %v3195_v38 }
 0x1b5   :  { %1167 = vmatprep.subr.bf16.mxu0 %v3192_v37  ;;  %1210 = vmatprep.subr.bf16.mxu1 %v3197_v39 }
 0x1b6   :  { %1197 = vmatprep.mubr.bf16.mxu0 %v3074_v0  ;;  %1240 = vmatprep.mubr.bf16.mxu1 %v3074_v0 }
 0x1b8   :  { %1168 = vmatpush1.bf16.msra.mxu0 %v3201_v40  ;;  %1211 = vmatpush1.bf16.msra.mxu1 %v3208_v42 }
 0x1b9   :  { %1169 = vmatprep.subr.bf16.mxu0 %v3205_v41  ;;  %1212 = vmatprep.subr.bf16.mxu1 %v3217_v46 }
 0x1bc   :  { %1170 = vmatpush1.bf16.msra.mxu0 %v3212_v44  ;;  %1213 = vmatpush1.bf16.msra.mxu1 %v3220_v47 }
 0x1bd   :  { %1171 = vmatprep.subr.bf16.mxu0 %v3214_v45  ;;  %1214 = vmatprep.subr.bf16.mxu1 %v3222_v48 }
 0x1c0   :  { %1172 = vmatpush1.bf16.msra.mxu0 %v3227_v49  ;;  %1215 = vmatpush1.bf16.msra.mxu1 %v3234_v51 }
 0x1c1   :  { %1173 = vmatprep.subr.bf16.mxu0 %v3230_v50  ;;  %1216 = vmatprep.subr.bf16.mxu1 %v3240_v54 }
 0x1c4   :  { %1174 = vmatpush1.bf16.msra.mxu0 %v3237_v53  ;;  %1217 = vmatpush1.bf16.msra.mxu1 %v3246_v56 }
 0x1c5   :  { %1175 = vmatprep.subr.bf16.mxu0 %v3243_v55  ;;  %1218 = vmatprep.subr.bf16.mxu1 %v3248_v57 }
 0x1c8   :  { %1176 = vmatpush1.bf16.msra.mxu0 %v3250_v58  ;;  %1219 = vmatpush1.bf16.msra.mxu1 %v3256_v60 }
 0x1c9   :  { %1177 = vmatprep.subr.bf16.mxu0 %v3254_v59  ;;  %1220 = vmatprep.subr.bf16.mxu1 %v3266_v63 }
 0x1cc   :  { %1178 = vmatpush1.bf16.msra.mxu0 %v3264_v62  ;;  %1221 = vmatpush1.bf16.msra.mxu1 %v3272_v2 }
 0x1cd   :  { %1179 = vmatprep.subr.bf16.mxu0 %v3270_v1  ;;  %1222 = vmatprep.subr.bf16.mxu1 %v3274_v3 }
 0x1d0   :  { %1180 = vmatpush1.bf16.msra.mxu0 %v3280_v4  ;;  %1223 = vmatpush1.bf16.msra.mxu1 %v3284_v5 }
 0x1d1   :  { %1317 = vmatprep.subr.bf16.mxu0 %v3185_v33  ;;  %1360 = vmatprep.subr.bf16.mxu1 %v3187_v34 }
 0x286   :  { %v1047_v22 = vpop.f32.mrb[4].mxu0  ;;  %v1090_v23 = vpop.f32.mrb[4].mxu1 }
 0x287   :  { %v2403_v19 = vadd.f32 %v1047_v22, %v3340_v16  ;;  %v1049_v24 = vpop.f32.mrb[5].mxu0  ;;  %v1092_v25 = vpop.f32.mrb[5].mxu1  ;;  %v2435_v11 = vadd.f32 %v1090_v23, %v3352_v6 }
 0x288   :  { %v2404_v26 = vadd.f32 %v1049_v24, %v3342_v17  ;;  %v1051_v27 = vpop.f32.mrb[6].mxu0  ;;  %v1094_v28 = vpop.f32.mrb[6].mxu1  ;;  %v2436_v9 = vadd.f32 %v1092_v25, %v3349_v35 }
 0x289   :  { %v2319_v29 = vmul.f32 -1.442695, %v2403_v19  ;;  %v2405_v30 = vadd.f32 %v1051_v27, %v3340_v16  ;;  %v1053_v31 = vpop.f32.mrb[7].mxu0  ;;  %v1096_v32 = vpop.f32.mrb[7].mxu1  ;;  %v2437_v18 = vadd.f32 %v1094_v28, %v3352_v6 }
 0x28a   :  { %v2321_v43 = vmul.f32 -1.442695, %v2404_v26  ;;  %v2406_v61 = vadd.f32 %v1053_v31, %v3342_v17  ;;  %v2323_v13 = vmul.f32 -1.442695, %v2436_v9  ;;  %v2438_v15 = vadd.f32 %v1096_v32, %v3349_v35 }
 0x28b   :  { %2686 = vpow2.f32 %v2319_v29  ;;  %v2320_v7 = vmul.f32 -1.442695, %v2405_v30 }
 0x28c   :  { %2688 = vpow2.f32 %v2321_v43  ;;  %v2322_v8 = vmul.f32 -1.442695, %v2406_v61  ;;  %v2324_v22 = vmul.f32 -1.442695, %v2438_v15 }
 0x28d   :  { %2690 = vpow2.f32 %v2320_v7 }
 0x28e   :  { %2692 = vpow2.f32 %v2322_v8 }
 0x28f   :  { %2694 = vtanh.f32 %v2435_v11 }
 0x290   :  { %2696 = vpow2.f32 %v2323_v13 }
 0x291   :  { %2698 = vtanh.f32 %v2437_v18 }
 0x295   :  { %v2687_v20 = vpop.eup %2686 }
 0x296   :  { %v2689_v21 = vpop.eup %2688  ;;  %v1113_v14 = vadd.f32 1.0, %v2687_v20 }
 0x297   :  { %v1125_v19 = vadd.f32 1.0, %v2689_v21  ;;  %v2691_v24 = vpop.eup %2690 }
 0x298   :  { %2700 = vrcp.f32 %v1113_v14  ;;  %v1114_v25 = vadd.f32 1.0, %v2691_v24  ;;  %v2693_v26 = vpop.eup %2692 }
 0x299   :  { %2702 = vrcp.f32 %v1125_v19  ;;  %v1126_v23 = vadd.f32 1.0, %v2693_v26  ;;  %v2695_v27 = vpop.eup %2694 }
 0x29a   :  { %2704 = vpow2.f32 %v2324_v22  ;;  %v2697_v29 = vpop.eup %2696 }
 0x29b   :  { %2706 = vrcp.f32 %v1114_v25  ;;  %v2699_v28 = vpop.eup %2698  ;;  %v1139_v8 = vadd.f32 1.0, %v2697_v29 }
 0x29c   :  { %2708 = vrcp.f32 %v1126_v23 }
 0x29d   :  { %2710 = vrcp.f32 %v1139_v8 }
 0x2a2   :  { %v2701_v30 = vpop.eup %2700 }
 0x2a3   :  { %v2703_v31 = vpop.eup %2702  ;;  %v1147_v32 = vmul.f32 %v2701_v30, %v2695_v27 }
 0x2a4   :  { %v2705_v43 = vpop.eup %2704  ;;  %v1145_v61 = vmul.f32 %v2703_v31, %v3358_v52 }
 0x2a5   :  { %v2707_v7 = vpop.eup %2706  ;;  %v1140_v15 = vadd.f32 1.0, %v2705_v43 }
 0x2a6   :  { %v3407_v9 = vadd.f32 %v1147_v32, %v1145_v61  ;;  %v1148_v11 = vmul.f32 %v2707_v7, %v2699_v28  ;;  %v2709_v13 = vpop.eup %2708 }
 0x2a7   :  { %v1146_v18 = vmul.f32 %v2709_v13, %v3361_v10  ;;  %v2711_v21 = vpop.eup %2710 }
 0x2a8   :  { %2712 = vtanh.f32 %v3407_v9 }
 0x2a9   :  { %v3411_v20 = vadd.f32 %v1148_v11, %v1146_v18  ;;  %2714 = vrcp.f32 %v1140_v15 }
 0x2ab   :  { %2716 = vtanh.f32 %v3411_v20 }
 0x2b2   :  { %v2713_v14 = vpop.eup %2712 }
 0x2b3   :  { %v2715_v52 = vpop.eup %2714  ;;  %v1153_v19 = vmul.f32 %v2713_v14, %v2711_v21 }
 0x2b5   :  { %v2717_v22 = vpop.eup %2716 }
 0x2b6   :  { %v1154_v24 = vmul.f32 %v2717_v22, %v2715_v52 }
 0x2b8   :  { %v1164_v25 = vpack.c.bf16 %v1154_v24, %v1153_v19 }
 0x2ba   :  { %1198 = vmatmul.mubr.bf16.vlgmr.msra.gmra.mrb[8].mxu0 %v1164_v25  ;;  %1241 = vmatmul.mubr.bf16.vlgmr.msra.gmra.mrb[8].mxu1 %v1164_v25 }
 0x2bb   :  { %1318 = vmatpush1.bf16.msra.mxu0 %v3189_v36  ;;  %1361 = vmatpush1.bf16.msra.mxu1 %v3195_v38 }
 0x2bc   :  { %1319 = vmatprep.subr.bf16.mxu0 %v3192_v37  ;;  %1362 = vmatprep.subr.bf16.mxu1 %v3197_v39 }
 0x2bd   :  { %1349 = vmatprep.mubr.bf16.mxu0 %v3074_v0  ;;  %1392 = vmatprep.mubr.bf16.mxu1 %v3074_v0 }
 0x2bf   :  { %1320 = vmatpush1.bf16.msra.mxu0 %v3201_v40  ;;  %1363 = vmatpush1.bf16.msra.mxu1 %v3208_v42 }
 0x2c0   :  { %1321 = vmatprep.subr.bf16.mxu0 %v3205_v41  ;;  %1364 = vmatprep.subr.bf16.mxu1 %v3217_v46 }
 0x2c3   :  { %1322 = vmatpush1.bf16.msra.mxu0 %v3212_v44  ;;  %1365 = vmatpush1.bf16.msra.mxu1 %v3220_v47 }
 0x2c4   :  { %1323 = vmatprep.subr.bf16.mxu0 %v3214_v45  ;;  %1366 = vmatprep.subr.bf16.mxu1 %v3222_v48 }
 0x2c7   :  { %1324 = vmatpush1.bf16.msra.mxu0 %v3227_v49  ;;  %1367 = vmatpush1.bf16.msra.mxu1 %v3234_v51 }
 0x2c8   :  { %1325 = vmatprep.subr.bf16.mxu0 %v3230_v50  ;;  %1368 = vmatprep.subr.bf16.mxu1 %v3240_v54 }
 0x2cb   :  { %1326 = vmatpush1.bf16.msra.mxu0 %v3237_v53  ;;  %1369 = vmatpush1.bf16.msra.mxu1 %v3246_v56 }
 0x2cc   :  { %1327 = vmatprep.subr.bf16.mxu0 %v3243_v55  ;;  %1370 = vmatprep.subr.bf16.mxu1 %v3248_v57 }
 0x2cf   :  { %1328 = vmatpush1.bf16.msra.mxu0 %v3250_v58  ;;  %1371 = vmatpush1.bf16.msra.mxu1 %v3256_v60 }
 0x2d0   :  { %1329 = vmatprep.subr.bf16.mxu0 %v3254_v59  ;;  %1372 = vmatprep.subr.bf16.mxu1 %v3266_v63 }
 0x2d3   :  { %1330 = vmatpush1.bf16.msra.mxu0 %v3264_v62  ;;  %1373 = vmatpush1.bf16.msra.mxu1 %v3272_v2 }
 0x2d4   :  { %1331 = vmatprep.subr.bf16.mxu0 %v3270_v1  ;;  %1374 = vmatprep.subr.bf16.mxu1 %v3274_v3 }
 0x2d7   :  { %1332 = vmatpush1.bf16.msra.mxu0 %v3280_v4  ;;  %1375 = vmatpush1.bf16.msra.mxu1 %v3284_v5 }
 0x2d8   :  { %1469 = vmatprep.subr.bf16.mxu0 %v3185_v33  ;;  %1512 = vmatprep.subr.bf16.mxu1 %v3187_v34 }
 0x38d   :  { %v1199_v10 = vpop.f32.mrb[8].mxu0  ;;  %v1242_v26 = vpop.f32.mrb[8].mxu1 }
 0x38e   :  { %v2407_v23 = vadd.f32 %v1199_v10, %v3340_v16  ;;  %v1201_v27 = vpop.f32.mrb[9].mxu0  ;;  %v1244_v29 = vpop.f32.mrb[9].mxu1  ;;  %v2439_v15 = vadd.f32 %v1242_v26, %v3352_v6 }
 0x38f   :  { %v2408_v28 = vadd.f32 %v1201_v27, %v3342_v17  ;;  %v1203_v30 = vpop.f32.mrb[10].mxu0  ;;  %v1246_v31 = vpop.f32.mrb[10].mxu1  ;;  %v2440_v13 = vadd.f32 %v1244_v29, %v3349_v35 }
 0x390   :  { %v2325_v32 = vmul.f32 -1.442695, %v2407_v23  ;;  %v2409_v43 = vadd.f32 %v1203_v30, %v3340_v16  ;;  %v1205_v61 = vpop.f32.mrb[11].mxu0  ;;  %v1248_v7 = vpop.f32.mrb[11].mxu1  ;;  %v2441_v14 = vadd.f32 %v1246_v31, %v3352_v6 }
 0x391   :  { %v2327_v8 = vmul.f32 -1.442695, %v2408_v28  ;;  %v2410_v33 = vadd.f32 %v1205_v61, %v3342_v17  ;;  %v2329_v18 = vmul.f32 -1.442695, %v2440_v13  ;;  %v2442_v21 = vadd.f32 %v1248_v7, %v3349_v35 }
 0x392   :  { %2718 = vpow2.f32 %v2325_v32  ;;  %v2326_v34 = vmul.f32 -1.442695, %v2409_v43 }
 0x393   :  { %2720 = vpow2.f32 %v2327_v8  ;;  %v2328_v11 = vmul.f32 -1.442695, %v2410_v33  ;;  %v2330_v24 = vmul.f32 -1.442695, %v2442_v21 }
 0x394   :  { %2722 = vpow2.f32 %v2326_v34 }
 0x395   :  { %2724 = vpow2.f32 %v2328_v11 }
 0x396   :  { %2726 = vtanh.f32 %v2439_v15 }
 0x397   :  { %2728 = vpow2.f32 %v2329_v18 }
 0x398   :  { %2730 = vtanh.f32 %v2441_v14 }
 0x39c   :  { %v2719_v52 = vpop.eup %2718 }
 0x39d   :  { %v2721_v22 = vpop.eup %2720  ;;  %v1265_v19 = vadd.f32 1.0, %v2719_v52 }
 0x39e   :  { %v1277_v25 = vadd.f32 1.0, %v2721_v22  ;;  %v2723_v10 = vpop.eup %2722 }
 0x39f   :  { %2732 = vrcp.f32 %v1265_v19  ;;  %v1266_v23 = vadd.f32 1.0, %v2723_v10  ;;  %v2725_v27 = vpop.eup %2724 }
 0x3a0   :  { %2734 = vrcp.f32 %v1277_v25  ;;  %v1278_v26 = vadd.f32 1.0, %v2725_v27  ;;  %v2727_v29 = vpop.eup %2726 }
 0x3a1   :  { %2736 = vpow2.f32 %v2330_v24  ;;  %v2729_v28 = vpop.eup %2728 }
 0x3a2   :  { %2738 = vrcp.f32 %v1266_v23  ;;  %v2731_v30 = vpop.eup %2730  ;;  %v1291_v33 = vadd.f32 1.0, %v2729_v28 }
 0x3a3   :  { %2740 = vrcp.f32 %v1278_v26 }
 0x3a4   :  { %2742 = vrcp.f32 %v1291_v33 }
 0x3a9   :  { %v2733_v31 = vpop.eup %2732 }
 0x3aa   :  { %v2735_v32 = vpop.eup %2734  ;;  %v1299_v43 = vmul.f32 %v2733_v31, %v2727_v29 }
 0x3ab   :  { %v2737_v61 = vpop.eup %2736  ;;  %v1297_v7 = vmul.f32 %v2735_v32, %v3407_v9 }
 0x3ac   :  { %v2739_v8 = vpop.eup %2738  ;;  %v1292_v15 = vadd.f32 1.0, %v2737_v61 }
 0x3ad   :  { %v3457_v34 = vadd.f32 %v1299_v43, %v1297_v7  ;;  %v1300_v11 = vmul.f32 %v2739_v8, %v2731_v30  ;;  %v2741_v13 = vpop.eup %2740 }
 0x3ae   :  { %v1298_v18 = vmul.f32 %v2741_v13, %v3411_v20  ;;  %v2743_v14 = vpop.eup %2742 }
 0x3af   :  { %2744 = vtanh.f32 %v3457_v34 }
 0x3b0   :  { %v3461_v21 = vadd.f32 %v1300_v11, %v1298_v18  ;;  %2746 = vrcp.f32 %v1292_v15 }
 0x3b2   :  { %2748 = vtanh.f32 %v3461_v21 }
 0x3b9   :  { %v2745_v52 = vpop.eup %2744 }
 0x3ba   :  { %v2747_v9 = vpop.eup %2746  ;;  %v1305_v19 = vmul.f32 %v2745_v52, %v2743_v14 }
 0x3bc   :  { %v2749_v22 = vpop.eup %2748 }
 0x3bd   :  { %v1306_v24 = vmul.f32 %v2749_v22, %v2747_v9 }
 0x3bf   :  { %v1316_v25 = vpack.c.bf16 %v1306_v24, %v1305_v19 }
 0x3c1   :  { %1350 = vmatmul.mubr.bf16.vlgmr.msra.gmra.mrb[12].mxu0 %v1316_v25  ;;  %1393 = vmatmul.mubr.bf16.vlgmr.msra.gmra.mrb[12].mxu1 %v1316_v25 }
 0x3c2   :  { %1470 = vmatpush1.bf16.msra.mxu0 %v3189_v36  ;;  %1513 = vmatpush1.bf16.msra.mxu1 %v3195_v38  ;;  %v3496_v36 = vld [vmem:[#allocation10 + $0x4] ss:$16 sps:$4 sm:$0xff]  }
 0x3c3   :  { %1471 = vmatprep.subr.bf16.mxu0 %v3192_v37  ;;  %1514 = vmatprep.subr.bf16.mxu1 %v3197_v39  ;;  %v3499_v37 = vld [vmem:[#allocation10 + $0xc] ss:$16 sps:$4 sm:$0xff]  }
 0x3c4   :  { %1501 = vmatprep.mubr.bf16.mxu0 %v3074_v0  ;;  %1544 = vmatprep.mubr.bf16.mxu1 %v3074_v0 }
 0x3c6   :  { %1472 = vmatpush1.bf16.msra.mxu0 %v3201_v40  ;;  %1515 = vmatpush1.bf16.msra.mxu1 %v3208_v42 }
 0x3c7   :  { %1473 = vmatprep.subr.bf16.mxu0 %v3205_v41  ;;  %1516 = vmatprep.subr.bf16.mxu1 %v3217_v46 }
 0x3ca   :  { %1474 = vmatpush1.bf16.msra.mxu0 %v3212_v44  ;;  %1517 = vmatpush1.bf16.msra.mxu1 %v3220_v47 }
 0x3cb   :  { %1475 = vmatprep.subr.bf16.mxu0 %v3214_v45  ;;  %1518 = vmatprep.subr.bf16.mxu1 %v3222_v48 }
 0x3ce   :  { %1476 = vmatpush1.bf16.msra.mxu0 %v3227_v49  ;;  %1519 = vmatpush1.bf16.msra.mxu1 %v3234_v51 }
 0x3cf   :  { %1477 = vmatprep.subr.bf16.mxu0 %v3230_v50  ;;  %1520 = vmatprep.subr.bf16.mxu1 %v3240_v54 }
 0x3d2   :  { %1478 = vmatpush1.bf16.msra.mxu0 %v3237_v53  ;;  %1521 = vmatpush1.bf16.msra.mxu1 %v3246_v56 }
 0x3d3   :  { %1479 = vmatprep.subr.bf16.mxu0 %v3243_v55  ;;  %1522 = vmatprep.subr.bf16.mxu1 %v3248_v57 }
 0x3d6   :  { %1480 = vmatpush1.bf16.msra.mxu0 %v3250_v58  ;;  %1523 = vmatpush1.bf16.msra.mxu1 %v3256_v60 }
 0x3d7   :  { %1481 = vmatprep.subr.bf16.mxu0 %v3254_v59  ;;  %1524 = vmatprep.subr.bf16.mxu1 %v3266_v63 }
 0x3da   :  { %1482 = vmatpush1.bf16.msra.mxu0 %v3264_v62  ;;  %1525 = vmatpush1.bf16.msra.mxu1 %v3272_v2 }
 0x3db   :  { %1483 = vmatprep.subr.bf16.mxu0 %v3270_v1  ;;  %1526 = vmatprep.subr.bf16.mxu1 %v3274_v3 }
 0x3de   :  { %1484 = vmatpush1.bf16.msra.mxu0 %v3280_v4  ;;  %1527 = vmatpush1.bf16.msra.mxu1 %v3284_v5 }
 0x3df   :  { %1621 = vmatprep.subr.bf16.mxu0 %v3496_v36  ;;  %1664 = vmatprep.subr.bf16.mxu1 %v3499_v37 }
 0x494   :  { %v1351_v38 = vpop.f32.mrb[12].mxu0  ;;  %v1394_v39 = vpop.f32.mrb[12].mxu1 }
 0x495   :  { %v2411_v40 = vadd.f32 %v1351_v38, %v3340_v16  ;;  %v1353_v41 = vpop.f32.mrb[13].mxu0  ;;  %v1396_v42 = vpop.f32.mrb[13].mxu1  ;;  %v2443_v57 = vadd.f32 %v1394_v39, %v3352_v6 }
 0x496   :  { %v2412_v44 = vadd.f32 %v1353_v41, %v3342_v17  ;;  %v1355_v45 = vpop.f32.mrb[14].mxu0  ;;  %v1398_v46 = vpop.f32.mrb[14].mxu1  ;;  %v2444_v56 = vadd.f32 %v1396_v42, %v3349_v35 }
 0x497   :  { %v2331_v47 = vmul.f32 -1.442695, %v2411_v40  ;;  %v2413_v48 = vadd.f32 %v1355_v45, %v3340_v16  ;;  %v1357_v49 = vpop.f32.mrb[15].mxu0  ;;  %v1400_v50 = vpop.f32.mrb[15].mxu1  ;;  %v2445_v60 = vadd.f32 %v1398_v46, %v3352_v6  ;;  %v3524_v45 = vld [vmem:[#allocation10 + $0x24] ss:$16 sps:$4 sm:$0xff]  }
 0x498   :  { %v2333_v51 = vmul.f32 -1.442695, %v2412_v44  ;;  %v2414_v53 = vadd.f32 %v1357_v49, %v3342_v17  ;;  %v2335_v58 = vmul.f32 -1.442695, %v2444_v56  ;;  %v2446_v59 = vadd.f32 %v1400_v50, %v3349_v35  ;;  %v3518_v44 = vld [vmem:[#allocation10] ss:$16 sps:$4 sm:$0xff]  }
 0x499   :  { %2750 = vpow2.f32 %v2331_v47  ;;  %v2332_v54 = vmul.f32 -1.442695, %v2413_v48  ;;  %v3527_v46 = vld [vmem:[#allocation10 + $0x2c] ss:$16 sps:$4 sm:$0xff]   ;;  %v3532_v47 = vld [vmem:[#allocation10 + $0x20] ss:$16 sps:$4 sm:$0xff]  }
 0x49a   :  { %2752 = vpow2.f32 %v2333_v51  ;;  %v2334_v55 = vmul.f32 -1.442695, %v2414_v53  ;;  %v2336_v27 = vmul.f32 -1.442695, %v2446_v59  ;;  %v3535_v48 = vld [vmem:[#allocation10 + $0x28] ss:$16 sps:$4 sm:$0xff]  }
 0x49b   :  { %2754 = vpow2.f32 %v2332_v54  ;;  %v3538_v49 = vld [vmem:[#allocation10 + $0x44] ss:$16 sps:$4 sm:$0xff]   ;;  %v3541_v50 = vld [vmem:[#allocation10 + $0x4c] ss:$16 sps:$4 sm:$0xff]   ;;  %v3544_v51 = vld [vmem:[#allocation10 + $0x40] ss:$16 sps:$4 sm:$0xff]  }
 0x49c   :  { %2756 = vpow2.f32 %v2334_v55  ;;  %v3547_v53 = vld [vmem:[#allocation10 + $0x48] ss:$16 sps:$4 sm:$0xff]   ;;  %v3550_v54 = vld [vmem:[#allocation10 + $0x64] ss:$16 sps:$4 sm:$0xff]   ;;  %v3553_v55 = vld [vmem:[#allocation10 + $0x6c] ss:$16 sps:$4 sm:$0xff]  }
 0x49d   :  { %2758 = vtanh.f32 %v2443_v57  ;;  %v3556_v56 = vld [vmem:[#allocation10 + $0x60] ss:$16 sps:$4 sm:$0xff]   ;;  %v3559_v57 = vld [vmem:[#allocation10 + $0x68] ss:$16 sps:$4 sm:$0xff]   ;;  %v3565_v59 = vld [vmem:[#allocation10 + $0x8c] ss:$16 sps:$4 sm:$0xff]  }
 0x49e   :  { %2760 = vpow2.f32 %v2335_v58  ;;  %v3562_v58 = vld [vmem:[#allocation10 + $0x84] ss:$16 sps:$4 sm:$0xff]  }
 0x49f   :  { %2762 = vtanh.f32 %v2445_v60  ;;  %v3568_v60 = vld [vmem:[#allocation10 + $0x80] ss:$16 sps:$4 sm:$0xff]  }
 0x4a3   :  { %v2751_v20 = vpop.eup %2750 }
 0x4a4   :  { %v2753_v10 = vpop.eup %2752  ;;  %v1417_v23 = vadd.f32 1.0, %v2751_v20  ;;  %v3571_v20 = vld [vmem:[#allocation10 + $0x88] ss:$16 sps:$4 sm:$0xff]  }
 0x4a5   :  { %v1429_v26 = vadd.f32 1.0, %v2753_v10  ;;  %v2755_v29 = vpop.eup %2754  ;;  %v3574_v10 = vld [vmem:[#allocation10 + $0xa4] ss:$16 sps:$4 sm:$0xff]  }
 0x4a6   :  { %2764 = vrcp.f32 %v1417_v23  ;;  %v1418_v28 = vadd.f32 1.0, %v2755_v29  ;;  %v2757_v30 = vpop.eup %2756  ;;  %v3577_v23 = vld [vmem:[#allocation10 + $0xac] ss:$16 sps:$4 sm:$0xff]   ;;  %v3586_v29 = vld [vmem:[#allocation10 + $0xc4] ss:$16 sps:$4 sm:$0xff]  }
 0x4a7   :  { %2766 = vrcp.f32 %v1429_v26  ;;  %v1430_v31 = vadd.f32 1.0, %v2757_v30  ;;  %v2759_v32 = vpop.eup %2758  ;;  %v3583_v26 = vld [vmem:[#allocation10 + $0xa8] ss:$16 sps:$4 sm:$0xff]  }
 0x4a8   :  { %2768 = vpow2.f32 %v2336_v27  ;;  %v2761_v43 = vpop.eup %2760  ;;  %v3580_v27 = vld [vmem:[#allocation10 + $0xa0] ss:$16 sps:$4 sm:$0xff]  }
 0x4a9   :  { %2770 = vrcp.f32 %v1418_v28  ;;  %v2763_v61 = vpop.eup %2762  ;;  %v1443_v18 = vadd.f32 1.0, %v2761_v43 }
 0x4aa   :  { %2772 = vrcp.f32 %v1430_v31 }
 0x4ab   :  { %2774 = vrcp.f32 %v1443_v18 }
 0x4b0   :  { %v2765_v7 = vpop.eup %2764 }
 0x4b1   :  { %v2767_v8 = vpop.eup %2766  ;;  %v1451_v33 = vmul.f32 %v2765_v7, %v2759_v32 }
 0x4b2   :  { %v2769_v11 = vpop.eup %2768  ;;  %v1449_v13 = vmul.f32 %v2767_v8, %v3457_v34 }
 0x4b3   :  { %v2771_v15 = vpop.eup %2770  ;;  %v1444_v22 = vadd.f32 1.0, %v2769_v11 }
 0x4b4   :  { %v3511_v14 = vadd.f32 %v1451_v33, %v1449_v13  ;;  %v1452_v52 = vmul.f32 %v2771_v15, %v2763_v61  ;;  %v2773_v9 = vpop.eup %2772 }
 0x4b5   :  { %v1450_v19 = vmul.f32 %v2773_v9, %v3461_v21  ;;  %v2775_v25 = vpop.eup %2774  ;;  %v3521_v21 = vld [vmem:[#allocation10 + $0x8] ss:$16 sps:$4 sm:$0xff]  }
 0x4b6   :  { %2776 = vtanh.f32 %v3511_v14 }
 0x4b7   :  { %v3515_v24 = vadd.f32 %v1452_v52, %v1450_v19  ;;  %2778 = vrcp.f32 %v1444_v22 }
 0x4b9   :  { %2780 = vtanh.f32 %v3515_v24 }
 0x4c0   :  { %v2777_v38 = vpop.eup %2776 }
 0x4c1   :  { %v2779_v34 = vpop.eup %2778  ;;  %v1457_v40 = vmul.f32 %v2777_v38, %v2775_v25 }
 0x4c3   :  { %v2781_v39 = vpop.eup %2780 }
 0x4c4   :  { %v1458_v41 = vmul.f32 %v2781_v39, %v2779_v34 }
 0x4c6   :  { %v1468_v42 = vpack.c.bf16 %v1458_v41, %v1457_v40 }
 0x4c8   :  { %1502 = vmatmul.mubr.bf16.vlgmr.msra.gmra.mrb[16].mxu0 %v1468_v42  ;;  %1545 = vmatmul.mubr.bf16.vlgmr.msra.gmra.mrb[16].mxu1 %v1468_v42 }
 0x4c9   :  { %1622 = vmatpush1.bf16.msra.mxu0 %v3518_v44  ;;  %1665 = vmatpush1.bf16.msra.mxu1 %v3521_v21 }
 0x4ca   :  { %1623 = vmatprep.subr.bf16.mxu0 %v3524_v45  ;;  %1666 = vmatprep.subr.bf16.mxu1 %v3527_v46 }
 0x4cb   :  { %1653 = vmatprep.mubr.bf16.mxu0 %v3074_v0  ;;  %1696 = vmatprep.mubr.bf16.mxu1 %v3074_v0 }
 0x4cd   :  { %1624 = vmatpush1.bf16.msra.mxu0 %v3532_v47  ;;  %1667 = vmatpush1.bf16.msra.mxu1 %v3535_v48 }
 0x4ce   :  { %1625 = vmatprep.subr.bf16.mxu0 %v3538_v49  ;;  %1668 = vmatprep.subr.bf16.mxu1 %v3541_v50 }
 0x4d1   :  { %1626 = vmatpush1.bf16.msra.mxu0 %v3544_v51  ;;  %1669 = vmatpush1.bf16.msra.mxu1 %v3547_v53 }
 0x4d2   :  { %1627 = vmatprep.subr.bf16.mxu0 %v3550_v54  ;;  %1670 = vmatprep.subr.bf16.mxu1 %v3553_v55 }
 0x4d5   :  { %1628 = vmatpush1.bf16.msra.mxu0 %v3556_v56  ;;  %1671 = vmatpush1.bf16.msra.mxu1 %v3559_v57 }
 0x4d6   :  { %1629 = vmatprep.subr.bf16.mxu0 %v3562_v58  ;;  %1672 = vmatprep.subr.bf16.mxu1 %v3565_v59 }
 0x4d9   :  { %1630 = vmatpush1.bf16.msra.mxu0 %v3568_v60  ;;  %1673 = vmatpush1.bf16.msra.mxu1 %v3571_v20 }
 0x4da   :  { %1631 = vmatprep.subr.bf16.mxu0 %v3574_v10  ;;  %1674 = vmatprep.subr.bf16.mxu1 %v3577_v23 }
 0x4dd   :  { %1632 = vmatpush1.bf16.msra.mxu0 %v3580_v27  ;;  %1675 = vmatpush1.bf16.msra.mxu1 %v3583_v26 }
 0x4de   :  { %1633 = vmatprep.subr.bf16.mxu0 %v3586_v29  ;;  %1676 = vmatprep.subr.bf16.mxu1 %v3266_v63 }
 0x4e1   :  { %1634 = vmatpush1.bf16.msra.mxu0 %v3264_v62  ;;  %1677 = vmatpush1.bf16.msra.mxu1 %v3272_v2 }
 0x4e2   :  { %1635 = vmatprep.subr.bf16.mxu0 %v3270_v1  ;;  %1678 = vmatprep.subr.bf16.mxu1 %v3274_v3 }
 0x4e5   :  { %1636 = vmatpush1.bf16.msra.mxu0 %v3280_v4  ;;  %1679 = vmatpush1.bf16.msra.mxu1 %v3284_v5 }
 0x4e6   :  { %1773 = vmatprep.subr.bf16.mxu0 %v3496_v36  ;;  %1816 = vmatprep.subr.bf16.mxu1 %v3499_v37 }
 0x59b   :  { %v1503_v28 = vpop.f32.mrb[16].mxu0  ;;  %v1546_v30 = vpop.f32.mrb[16].mxu1 }
 0x59c   :  { %v2415_v63 = vadd.f32 %v1503_v28, %v3340_v16  ;;  %v1505_v31 = vpop.f32.mrb[17].mxu0  ;;  %v1548_v62 = vpop.f32.mrb[17].mxu1  ;;  %v2447_v13 = vadd.f32 %v1546_v30, %v3352_v6 }
 0x59d   :  { %v2416_v2 = vadd.f32 %v1505_v31, %v3342_v17  ;;  %v1507_v32 = vpop.f32.mrb[18].mxu0  ;;  %v1550_v1 = vpop.f32.mrb[18].mxu1  ;;  %v2448_v11 = vadd.f32 %v1548_v62, %v3349_v35 }
 0x59e   :  { %v2337_v43 = vmul.f32 -1.442695, %v2415_v63  ;;  %v2417_v3 = vadd.f32 %v1507_v32, %v3340_v16  ;;  %v1509_v4 = vpop.f32.mrb[19].mxu0  ;;  %v1552_v61 = vpop.f32.mrb[19].mxu1  ;;  %v2449_v52 = vadd.f32 %v1550_v1, %v3352_v6 }
 0x59f   :  { %v2339_v5 = vmul.f32 -1.442695, %v2416_v2  ;;  %v2418_v7 = vadd.f32 %v1509_v4, %v3342_v17  ;;  %v2341_v15 = vmul.f32 -1.442695, %v2448_v11  ;;  %v2450_v18 = vadd.f32 %v1552_v61, %v3349_v35 }
 0x5a0   :  { %2782 = vpow2.f32 %v2337_v43  ;;  %v2338_v8 = vmul.f32 -1.442695, %v2417_v3 }
 0x5a1   :  { %2784 = vpow2.f32 %v2339_v5  ;;  %v2340_v33 = vmul.f32 -1.442695, %v2418_v7  ;;  %v2342_v25 = vmul.f32 -1.442695, %v2450_v18 }
 0x5a2   :  { %2786 = vpow2.f32 %v2338_v8 }
 0x5a3   :  { %2788 = vpow2.f32 %v2340_v33 }
 0x5a4   :  { %2790 = vtanh.f32 %v2447_v13 }
 0x5a5   :  { %2792 = vpow2.f32 %v2341_v15 }
 0x5a6   :  { %2794 = vtanh.f32 %v2449_v52 }
 0x5aa   :  { %v2783_v9 = vpop.eup %2782 }
 0x5ab   :  { %v2785_v22 = vpop.eup %2784  ;;  %v1569_v19 = vadd.f32 1.0, %v2783_v9  ;;  %v3642_v9 = vld [vmem:[#allocation10 + $0xc0] ss:$16 sps:$4 sm:$0xff]  }
 0x5ac   :  { %v1581_v38 = vadd.f32 1.0, %v2785_v22  ;;  %v2787_v34 = vpop.eup %2786  ;;  %v3645_v22 = vld [vmem:[#allocation10 + $0xc8] ss:$16 sps:$4 sm:$0xff]  }
 0x5ad   :  { %2796 = vrcp.f32 %v1569_v19  ;;  %v1570_v39 = vadd.f32 1.0, %v2787_v34  ;;  %v2789_v40 = vpop.eup %2788  ;;  %v3648_v19 = vld [vmem:[#allocation10 + $0xe4] ss:$16 sps:$4 sm:$0xff]   ;;  %v3657_v34 = vld [vmem:[#allocation10 + $0xe8] ss:$16 sps:$4 sm:$0xff]  }
 0x5ae   :  { %2798 = vrcp.f32 %v1581_v38  ;;  %v1582_v41 = vadd.f32 1.0, %v2789_v40  ;;  %v2791_v42 = vpop.eup %2790  ;;  %v3654_v38 = vld [vmem:[#allocation10 + $0xe0] ss:$16 sps:$4 sm:$0xff]  }
 0x5af   :  { %2800 = vpow2.f32 %v2342_v25  ;;  %v2793_v28 = vpop.eup %2792  ;;  %v3651_v25 = vld [vmem:[#allocation10 + $0xec] ss:$16 sps:$4 sm:$0xff]  }
 0x5b0   :  { %2802 = vrcp.f32 %v1570_v39  ;;  %v2795_v30 = vpop.eup %2794  ;;  %v1595_v43 = vadd.f32 1.0, %v2793_v28 }
 0x5b1   :  { %2804 = vrcp.f32 %v1582_v41 }
 0x5b2   :  { %2806 = vrcp.f32 %v1595_v43 }
 0x5b7   :  { %v2797_v63 = vpop.eup %2796 }
 0x5b8   :  { %v2799_v31 = vpop.eup %2798  ;;  %v1603_v62 = vmul.f32 %v2797_v63, %v2791_v42 }
 0x5b9   :  { %v2801_v2 = vpop.eup %2800  ;;  %v1601_v32 = vmul.f32 %v2799_v31, %v3511_v14 }
 0x5ba   :  { %v2803_v1 = vpop.eup %2802  ;;  %v1596_v5 = vadd.f32 1.0, %v2801_v2 }
 0x5bb   :  { %v3607_v3 = vadd.f32 %v1603_v62, %v1601_v32  ;;  %v1604_v4 = vmul.f32 %v2803_v1, %v2795_v30  ;;  %v2805_v61 = vpop.eup %2804 }
 0x5bc   :  { %v1602_v7 = vmul.f32 %v2805_v61, %v3515_v24  ;;  %v2807_v33 = vpop.eup %2806  ;;  %v3639_v24 = vld [vmem:[#allocation10 + $0xcc] ss:$16 sps:$4 sm:$0xff]  }
 0x5bd   :  { %2808 = vtanh.f32 %v3607_v3 }
 0x5be   :  { %v3611_v8 = vadd.f32 %v1604_v4, %v1602_v7  ;;  %2810 = vrcp.f32 %v1596_v5 }
 0x5c0   :  { %2812 = vtanh.f32 %v3611_v8 }
 0x5c7   :  { %v2809_v11 = vpop.eup %2808 }
 0x5c8   :  { %v2811_v14 = vpop.eup %2810  ;;  %v1609_v15 = vmul.f32 %v2809_v11, %v2807_v33 }
 0x5ca   :  { %v2813_v13 = vpop.eup %2812 }
 0x5cb   :  { %v1610_v18 = vmul.f32 %v2813_v13, %v2811_v14 }
 0x5cd   :  { %v1620_v52 = vpack.c.bf16 %v1610_v18, %v1609_v15 }
 0x5cf   :  { %1654 = vmatmul.mubr.bf16.vlgmr.msra.gmra.mrb[20].mxu0 %v1620_v52  ;;  %1697 = vmatmul.mubr.bf16.vlgmr.msra.gmra.mrb[20].mxu1 %v1620_v52 }
 0x5d0   :  { %1774 = vmatpush1.bf16.msra.mxu0 %v3518_v44  ;;  %1817 = vmatpush1.bf16.msra.mxu1 %v3521_v21 }
 0x5d1   :  { %1775 = vmatprep.subr.bf16.mxu0 %v3524_v45  ;;  %1818 = vmatprep.subr.bf16.mxu1 %v3527_v46 }
 0x5d2   :  { %1805 = vmatprep.mubr.bf16.mxu0 %v3074_v0  ;;  %1848 = vmatprep.mubr.bf16.mxu1 %v3074_v0 }
 0x5d4   :  { %1776 = vmatpush1.bf16.msra.mxu0 %v3532_v47  ;;  %1819 = vmatpush1.bf16.msra.mxu1 %v3535_v48 }
 0x5d5   :  { %1777 = vmatprep.subr.bf16.mxu0 %v3538_v49  ;;  %1820 = vmatprep.subr.bf16.mxu1 %v3541_v50 }
 0x5d8   :  { %1778 = vmatpush1.bf16.msra.mxu0 %v3544_v51  ;;  %1821 = vmatpush1.bf16.msra.mxu1 %v3547_v53 }
 0x5d9   :  { %1779 = vmatprep.subr.bf16.mxu0 %v3550_v54  ;;  %1822 = vmatprep.subr.bf16.mxu1 %v3553_v55 }
 0x5dc   :  { %1780 = vmatpush1.bf16.msra.mxu0 %v3556_v56  ;;  %1823 = vmatpush1.bf16.msra.mxu1 %v3559_v57 }
 0x5dd   :  { %1781 = vmatprep.subr.bf16.mxu0 %v3562_v58  ;;  %1824 = vmatprep.subr.bf16.mxu1 %v3565_v59 }
 0x5e0   :  { %1782 = vmatpush1.bf16.msra.mxu0 %v3568_v60  ;;  %1825 = vmatpush1.bf16.msra.mxu1 %v3571_v20 }
 0x5e1   :  { %1783 = vmatprep.subr.bf16.mxu0 %v3574_v10  ;;  %1826 = vmatprep.subr.bf16.mxu1 %v3577_v23 }
 0x5e4   :  { %1784 = vmatpush1.bf16.msra.mxu0 %v3580_v27  ;;  %1827 = vmatpush1.bf16.msra.mxu1 %v3583_v26 }
 0x5e5   :  { %1785 = vmatprep.subr.bf16.mxu0 %v3586_v29  ;;  %1828 = vmatprep.subr.bf16.mxu1 %v3639_v24 }
 0x5e8   :  { %1786 = vmatpush1.bf16.msra.mxu0 %v3642_v9  ;;  %1829 = vmatpush1.bf16.msra.mxu1 %v3645_v22 }
 0x5e9   :  { %1787 = vmatprep.subr.bf16.mxu0 %v3648_v19  ;;  %1830 = vmatprep.subr.bf16.mxu1 %v3651_v25 }
 0x5ec   :  { %1788 = vmatpush1.bf16.msra.mxu0 %v3654_v38  ;;  %1831 = vmatpush1.bf16.msra.mxu1 %v3657_v34 }
 0x5ed   :  { %1925 = vmatprep.subr.bf16.mxu0 %v3496_v36  ;;  %1968 = vmatprep.subr.bf16.mxu1 %v3499_v37 }
 0x6a2   :  { %v1655_v39 = vpop.f32.mrb[20].mxu0  ;;  %v1698_v40 = vpop.f32.mrb[20].mxu1 }
 0x6a3   :  { %v2419_v41 = vadd.f32 %v1655_v39, %v3340_v16  ;;  %v1657_v42 = vpop.f32.mrb[21].mxu0  ;;  %v1700_v28 = vpop.f32.mrb[21].mxu1  ;;  %v2451_v5 = vadd.f32 %v1698_v40, %v3352_v6 }
 0x6a4   :  { %v2420_v30 = vadd.f32 %v1657_v42, %v3342_v17  ;;  %v1659_v63 = vpop.f32.mrb[22].mxu0  ;;  %v1702_v31 = vpop.f32.mrb[22].mxu1  ;;  %v2452_v61 = vadd.f32 %v1700_v28, %v3349_v35 }
 0x6a5   :  { %v2343_v62 = vmul.f32 -1.442695, %v2419_v41  ;;  %v2421_v2 = vadd.f32 %v1659_v63, %v3340_v16  ;;  %v1661_v32 = vpop.f32.mrb[23].mxu0  ;;  %v1704_v1 = vpop.f32.mrb[23].mxu1  ;;  %v2453_v11 = vadd.f32 %v1702_v31, %v3352_v6 }
 0x6a6   :  { %v2345_v43 = vmul.f32 -1.442695, %v2420_v30  ;;  %v2422_v36 = vadd.f32 %v1661_v32, %v3342_v17  ;;  %v2347_v7 = vmul.f32 -1.442695, %v2452_v61  ;;  %v2454_v33 = vadd.f32 %v1704_v1, %v3349_v35 }
 0x6a7   :  { %2814 = vpow2.f32 %v2343_v62  ;;  %v2344_v37 = vmul.f32 -1.442695, %v2421_v2 }
 0x6a8   :  { %2816 = vpow2.f32 %v2345_v43  ;;  %v2346_v4 = vmul.f32 -1.442695, %v2422_v36  ;;  %v2348_v18 = vmul.f32 -1.442695, %v2454_v33 }
 0x6a9   :  { %2818 = vpow2.f32 %v2344_v37 }
 0x6aa   :  { %2820 = vpow2.f32 %v2346_v4 }
 0x6ab   :  { %2822 = vtanh.f32 %v2451_v5 }
 0x6ac   :  { %2824 = vpow2.f32 %v2347_v7 }
 0x6ad   :  { %2826 = vtanh.f32 %v2453_v11 }
 0x6b1   :  { %v2815_v14 = vpop.eup %2814 }
 0x6b2   :  { %v2817_v13 = vpop.eup %2816  ;;  %v1721_v15 = vadd.f32 1.0, %v2815_v14 }
 0x6b3   :  { %v1733_v52 = vadd.f32 1.0, %v2817_v13  ;;  %v2819_v39 = vpop.eup %2818 }
 0x6b4   :  { %2828 = vrcp.f32 %v1721_v15  ;;  %v1722_v41 = vadd.f32 1.0, %v2819_v39  ;;  %v2821_v42 = vpop.eup %2820 }
 0x6b5   :  { %2830 = vrcp.f32 %v1733_v52  ;;  %v1734_v40 = vadd.f32 1.0, %v2821_v42  ;;  %v2823_v28 = vpop.eup %2822 }
 0x6b6   :  { %2832 = vpow2.f32 %v2348_v18  ;;  %v2825_v30 = vpop.eup %2824 }
 0x6b7   :  { %2834 = vrcp.f32 %v1722_v41  ;;  %v2827_v63 = vpop.eup %2826  ;;  %v1747_v36 = vadd.f32 1.0, %v2825_v30 }
 0x6b8   :  { %2836 = vrcp.f32 %v1734_v40 }
 0x6b9   :  { %2838 = vrcp.f32 %v1747_v36 }
 0x6be   :  { %v2829_v31 = vpop.eup %2828 }
 0x6bf   :  { %v2831_v62 = vpop.eup %2830  ;;  %v1755_v2 = vmul.f32 %v2829_v31, %v2823_v28 }
 0x6c0   :  { %v2833_v32 = vpop.eup %2832  ;;  %v1753_v1 = vmul.f32 %v2831_v62, %v3607_v3 }
 0x6c1   :  { %v2835_v43 = vpop.eup %2834  ;;  %v1748_v5 = vadd.f32 1.0, %v2833_v32 }
 0x6c2   :  { %v3671_v37 = vadd.f32 %v1755_v2, %v1753_v1  ;;  %v1756_v4 = vmul.f32 %v2835_v43, %v2827_v63  ;;  %v2837_v61 = vpop.eup %2836 }
 0x6c3   :  { %v1754_v7 = vmul.f32 %v2837_v61, %v3611_v8  ;;  %v2839_v11 = vpop.eup %2838 }
 0x6c4   :  { %2840 = vtanh.f32 %v3671_v37 }
 0x6c5   :  { %v3675_v33 = vadd.f32 %v1756_v4, %v1754_v7  ;;  %2842 = vrcp.f32 %v1748_v5 }
 0x6c7   :  { %2844 = vtanh.f32 %v3675_v33 }
 0x6ce   :  { %v2841_v14 = vpop.eup %2840 }
 0x6cf   :  { %v2843_v3 = vpop.eup %2842  ;;  %v1761_v15 = vmul.f32 %v2841_v14, %v2839_v11 }
 0x6d1   :  { %v2845_v13 = vpop.eup %2844 }
 0x6d2   :  { %v1762_v18 = vmul.f32 %v2845_v13, %v2843_v3  ;;  %v2646_v3 = vld [vmem:[#allocation11] sm:$0xff]   ;;  %v3076_v13 = vmov 0.0  }
 0x6d4   :  { %v1772_v52 = vpack.c.bf16 %v1762_v18, %v1761_v15  ;;  %v2648_v15 = vld [vmem:[#allocation11 + $0x10] sm:$0xff]   ;;  %v2649_v18 = vld [vmem:[#allocation11 + $0x18] sm:$0xff]  }
 0x6d6   :  { %1806 = vmatmul.mubr.bf16.vlgmr.msra.gmra.mrb[24].mxu0 %v1772_v52  ;;  %1849 = vmatmul.mubr.bf16.vlgmr.msra.gmra.mrb[24].mxu1 %v1772_v52  ;;  %v2650_v52 = vld [vmem:[#allocation11 + $0x20] sm:$0xff]  }
 0x6d7   :  { %1926 = vmatpush1.bf16.msra.mxu0 %v3518_v44  ;;  %1969 = vmatpush1.bf16.msra.mxu1 %v3521_v21 }
 0x6d8   :  { %1927 = vmatprep.subr.bf16.mxu0 %v3524_v45  ;;  %1970 = vmatprep.subr.bf16.mxu1 %v3527_v46 }
 0x6d9   :  { %1957 = vmatprep.mubr.bf16.mxu0 %v3074_v0  ;;  %2000 = vmatprep.mubr.bf16.mxu1 %v3074_v0 }
 0x6db   :  { %1928 = vmatpush1.bf16.msra.mxu0 %v3532_v47  ;;  %1971 = vmatpush1.bf16.msra.mxu1 %v3535_v48 }
 0x6dc   :  { %1929 = vmatprep.subr.bf16.mxu0 %v3538_v49  ;;  %1972 = vmatprep.subr.bf16.mxu1 %v3541_v50 }
 0x6df   :  { %1930 = vmatpush1.bf16.msra.mxu0 %v3544_v51  ;;  %1973 = vmatpush1.bf16.msra.mxu1 %v3547_v53 }
 0x6e0   :  { %1931 = vmatprep.subr.bf16.mxu0 %v3550_v54  ;;  %1974 = vmatprep.subr.bf16.mxu1 %v3553_v55 }
 0x6e3   :  { %1932 = vmatpush1.bf16.msra.mxu0 %v3556_v56  ;;  %1975 = vmatpush1.bf16.msra.mxu1 %v3559_v57 }
 0x6e4   :  { %1933 = vmatprep.subr.bf16.mxu0 %v3562_v58  ;;  %1976 = vmatprep.subr.bf16.mxu1 %v3565_v59 }
 0x6e7   :  { %1934 = vmatpush1.bf16.msra.mxu0 %v3568_v60  ;;  %1977 = vmatpush1.bf16.msra.mxu1 %v3571_v20 }
 0x6e8   :  { %1935 = vmatprep.subr.bf16.mxu0 %v3574_v10  ;;  %1978 = vmatprep.subr.bf16.mxu1 %v3577_v23 }
 0x6eb   :  { %1936 = vmatpush1.bf16.msra.mxu0 %v3580_v27  ;;  %1979 = vmatpush1.bf16.msra.mxu1 %v3583_v26 }
 0x6ec   :  { %1937 = vmatprep.subr.bf16.mxu0 %v3586_v29  ;;  %1980 = vmatprep.subr.bf16.mxu1 %v3639_v24 }
 0x6ef   :  { %1938 = vmatpush1.bf16.msra.mxu0 %v3642_v9  ;;  %1981 = vmatpush1.bf16.msra.mxu1 %v3645_v22 }
 0x6f0   :  { %1939 = vmatprep.subr.bf16.mxu0 %v3648_v19  ;;  %1982 = vmatprep.subr.bf16.mxu1 %v3651_v25 }
 0x6f3   :  { %1940 = vmatpush1.bf16.msra.mxu0 %v3654_v38  ;;  %1983 = vmatpush1.bf16.msra.mxu1 %v3657_v34 }
 0x6f4   :  { %2379 = vmatprep.subr.bf16.mxu0 %v3076_v13 }
 0x7a9   :  { %v1807_v0 = vpop.f32.mrb[24].mxu0  ;;  %v1850_v44 = vpop.f32.mrb[24].mxu1 }
 0x7aa   :  { %v2423_v21 = vadd.f32 %v1807_v0, %v3340_v16  ;;  %v1809_v45 = vpop.f32.mrb[25].mxu0  ;;  %v1852_v46 = vpop.f32.mrb[25].mxu1  ;;  %v2455_v60 = vadd.f32 %v1850_v44, %v3352_v6  ;;  %v2651_v0 = vld [vmem:[#allocation11 + $0x28] sm:$0xff]   ;;  %v2652_v44 = vld [vmem:[#allocation11 + $0x30] sm:$0xff]  }
 0x7ab   :  { %v2424_v47 = vadd.f32 %v1809_v45, %v3342_v17  ;;  %v1811_v48 = vpop.f32.mrb[26].mxu0  ;;  %v1854_v49 = vpop.f32.mrb[26].mxu1  ;;  %v2456_v59 = vadd.f32 %v1852_v46, %v3349_v35 }
 0x7ac   :  { %v2349_v50 = vmul.f32 -1.442695, %v2423_v21  ;;  %v2425_v51 = vadd.f32 %v1811_v48, %v3340_v16  ;;  %v1813_v53 = vpop.f32.mrb[27].mxu0  ;;  %v1856_v54 = vpop.f32.mrb[27].mxu1  ;;  %v2457_v23 = vadd.f32 %v1854_v49, %v3352_v6  ;;  %v2653_v21 = vld [vmem:[#allocation11 + $0x38] sm:$0xff]  }
 0x7ad   :  { %v2351_v55 = vmul.f32 -1.442695, %v2424_v47  ;;  %v2426_v56 = vadd.f32 %v1813_v53, %v3342_v17  ;;  %v2353_v20 = vmul.f32 -1.442695, %v2456_v59  ;;  %v2458_v10 = vadd.f32 %v1856_v54, %v3349_v35 }
 0x7ae   :  { %2846 = vpow2.f32 %v2349_v50  ;;  %v2350_v57 = vmul.f32 -1.442695, %v2425_v51 }
 0x7af   :  { %2848 = vpow2.f32 %v2351_v55  ;;  %v2352_v58 = vmul.f32 -1.442695, %v2426_v56  ;;  %v2354_v8 = vmul.f32 -1.442695, %v2458_v10 }
 0x7b0   :  { %2850 = vpow2.f32 %v2350_v57 }
 0x7b1   :  { %2852 = vpow2.f32 %v2352_v58 }
 0x7b2   :  { %2854 = vtanh.f32 %v2455_v60 }
 0x7b3   :  { %2856 = vpow2.f32 %v2353_v20 }
 0x7b4   :  { %2858 = vtanh.f32 %v2457_v23 }
 0x7b8   :  { %v2847_v27 = vpop.eup %2846 }
 0x7b9   :  { %v2849_v26 = vpop.eup %2848  ;;  %v1873_v29 = vadd.f32 1.0, %v2847_v27 }
 0x7ba   :  { %v1885_v24 = vadd.f32 1.0, %v2849_v26  ;;  %v2851_v9 = vpop.eup %2850 }
 0x7bb   :  { %2860 = vrcp.f32 %v1873_v29  ;;  %v1874_v22 = vadd.f32 1.0, %v2851_v9  ;;  %v2853_v19 = vpop.eup %2852 }
 0x7bc   :  { %2862 = vrcp.f32 %v1885_v24  ;;  %v1886_v25 = vadd.f32 1.0, %v2853_v19  ;;  %v2855_v38 = vpop.eup %2854 }
 0x7bd   :  { %2864 = vpow2.f32 %v2354_v8  ;;  %v2857_v34 = vpop.eup %2856 }
 0x7be   :  { %2866 = vrcp.f32 %v1874_v22  ;;  %v2859_v39 = vpop.eup %2858  ;;  %v1899_v31 = vadd.f32 1.0, %v2857_v34 }
 0x7bf   :  { %2868 = vrcp.f32 %v1886_v25 }
 0x7c0   :  { %2870 = vrcp.f32 %v1899_v31 }
 0x7c5   :  { %v2861_v41 = vpop.eup %2860 }
 0x7c6   :  { %v2863_v42 = vpop.eup %2862  ;;  %v1907_v40 = vmul.f32 %v2861_v41, %v2855_v38 }
 0x7c7   :  { %v2865_v28 = vpop.eup %2864  ;;  %v1905_v30 = vmul.f32 %v2863_v42, %v3671_v37 }
 0x7c8   :  { %v2867_v63 = vpop.eup %2866  ;;  %v1900_v1 = vadd.f32 1.0, %v2865_v28 }
 0x7c9   :  { %v3719_v62 = vadd.f32 %v1907_v40, %v1905_v30  ;;  %v1908_v2 = vmul.f32 %v2867_v63, %v2859_v39  ;;  %v2869_v32 = vpop.eup %2868 }
 0x7ca   :  { %v1906_v43 = vmul.f32 %v2869_v32, %v3675_v33  ;;  %v2871_v4 = vpop.eup %2870  ;;  %v2647_v33 = vld [vmem:[#allocation11 + $0x8] sm:$0xff]  }
 0x7cb   :  { %2872 = vtanh.f32 %v3719_v62 }
 0x7cc   :  { %v3723_v36 = vadd.f32 %v1908_v2, %v1906_v43  ;;  %2874 = vrcp.f32 %v1900_v1 }
 0x7ce   :  { %2876 = vtanh.f32 %v3723_v36 }
 0x7d5   :  { %v2873_v61 = vpop.eup %2872 }
 0x7d6   :  { %v2875_v37 = vpop.eup %2874  ;;  %v1913_v7 = vmul.f32 %v2873_v61, %v2871_v4 }
 0x7d8   :  { %v2877_v5 = vpop.eup %2876 }
 0x7d9   :  { %v1914_v11 = vmul.f32 %v2877_v5, %v2875_v37 }
 0x7db   :  { %v1924_v14 = vpack.c.bf16 %v1914_v11, %v1913_v7 }
 0x7dd   :  { %1958 = vmatmul.mubr.bf16.vlgmr.msra.gmra.mrb[28].mxu0 %v1924_v14  ;;  %2001 = vmatmul.mubr.bf16.vlgmr.msra.gmra.mrb[28].mxu1 %v1924_v14 }
 0x7de   :  { %2380 = vmatpush3.bf16.msra.mxu0 %v2646_v3  ;;  %2395 = vmatprep.mubr.msk.bf16.mxu0 %vm3077_vm0, %v3076_v13 }
 0x7df   :  { %2381 = vmatprep.subr.bf16.mxu0 %v3076_v13 }
 0x7e2   :  { %2382 = vmatpush3.bf16.msra.mxu0 %v2647_v33 }
 0x7e3   :  { %2383 = vmatprep.subr.bf16.mxu0 %v3076_v13 }
 0x7e6   :  { %2384 = vmatpush3.bf16.msra.mxu0 %v2648_v15 }
 0x7e7   :  { %2385 = vmatprep.subr.bf16.mxu0 %v3076_v13 }
 0x7ea   :  { %2386 = vmatpush3.bf16.msra.mxu0 %v2649_v18 }
 0x7eb   :  { %2387 = vmatprep.subr.bf16.mxu0 %v3076_v13 }
 0x7ee   :  { %2388 = vmatpush3.bf16.msra.mxu0 %v2650_v52 }
 0x7ef   :  { %2389 = vmatprep.subr.bf16.mxu0 %v3076_v13 }
 0x7f2   :  { %2390 = vmatpush3.bf16.msra.mxu0 %v2651_v0 }
 0x7f3   :  { %2391 = vmatprep.subr.bf16.mxu0 %v3076_v13 }
 0x7f6   :  { %2392 = vmatpush3.bf16.msra.mxu0 %v2652_v44 }
 0x7f7   :  { %2393 = vmatprep.subr.bf16.mxu0 %v3076_v13 }
 0x7fa   :  { %2394 = vmatpush3.bf16.msra.mxu0 %v2653_v21 }
 0x8b0   :  { %v1959_v45 = vpop.f32.mrb[28].mxu0  ;;  %v2002_v46 = vpop.f32.mrb[28].mxu1 }
 0x8b1   :  { %v2427_v47 = vadd.f32 %v1959_v45, %v3340_v16  ;;  %v1961_v48 = vpop.f32.mrb[29].mxu0  ;;  %v2004_v49 = vpop.f32.mrb[29].mxu1  ;;  %v2459_v23 = vadd.f32 %v2002_v46, %v3352_v6 }
 0x8b2   :  { %v2428_v50 = vadd.f32 %v1961_v48, %v3342_v17  ;;  %v1963_v51 = vpop.f32.mrb[30].mxu0  ;;  %v2006_v53 = vpop.f32.mrb[30].mxu1  ;;  %v2460_v10 = vadd.f32 %v2004_v49, %v3349_v35 }
 0x8b3   :  { %v2355_v54 = vmul.f32 -1.442695, %v2427_v47  ;;  %v2429_v55 = vadd.f32 %v1963_v51, %v3340_v16  ;;  %v1965_v56 = vpop.f32.mrb[31].mxu0  ;;  %v2008_v57 = vpop.f32.mrb[31].mxu1  ;;  %v2461_v16 = vadd.f32 %v2006_v53, %v3352_v6 }
 0x8b4   :  { %v2357_v58 = vmul.f32 -1.442695, %v2428_v50  ;;  %v2430_v59 = vadd.f32 %v1965_v56, %v3342_v17  ;;  %v2359_v27 = vmul.f32 -1.442695, %v2460_v10  ;;  %v2462_v26 = vadd.f32 %v2008_v57, %v3349_v35 }
 0x8b5   :  { %2878 = vpow2.f32 %v2355_v54  ;;  %v2356_v60 = vmul.f32 -1.442695, %v2429_v55 }
 0x8b6   :  { %2880 = vpow2.f32 %v2357_v58  ;;  %v2358_v20 = vmul.f32 -1.442695, %v2430_v59  ;;  %v2360_v17 = vmul.f32 -1.442695, %v2462_v26 }
 0x8b7   :  { %2882 = vpow2.f32 %v2356_v60 }
 0x8b8   :  { %2884 = vpow2.f32 %v2358_v20 }
 0x8b9   :  { %2886 = vtanh.f32 %v2459_v23 }
 0x8ba   :  { %2888 = vpow2.f32 %v2359_v27 }
 0x8bb   :  { %2890 = vtanh.f32 %v2461_v16 }
 0x8bf   :  { %v2879_v29 = vpop.eup %2878 }
 0x8c0   :  { %v2881_v8 = vpop.eup %2880  ;;  %v2025_v24 = vadd.f32 1.0, %v2879_v29 }
 0x8c1   :  { %v2037_v9 = vadd.f32 1.0, %v2881_v8  ;;  %v2883_v22 = vpop.eup %2882 }
 0x8c2   :  { %2892 = vrcp.f32 %v2025_v24  ;;  %v2026_v19 = vadd.f32 1.0, %v2883_v22  ;;  %v2885_v25 = vpop.eup %2884 }
 0x8c3   :  { %2894 = vrcp.f32 %v2037_v9  ;;  %v2038_v38 = vadd.f32 1.0, %v2885_v25  ;;  %v2887_v35 = vpop.eup %2886 }
 0x8c4   :  { %2896 = vpow2.f32 %v2360_v17  ;;  %v2889_v34 = vpop.eup %2888 }
 0x8c5   :  { %2898 = vrcp.f32 %v2026_v19  ;;  %v2891_v6 = vpop.eup %2890  ;;  %v2051_v40 = vadd.f32 1.0, %v2889_v34 }
 0x8c6   :  { %2900 = vrcp.f32 %v2038_v38 }
 0x8c7   :  { %2902 = vrcp.f32 %v2051_v40 }
 0x8cc   :  { %v2893_v39 = vpop.eup %2892 }
 0x8cd   :  { %v2895_v41 = vpop.eup %2894  ;;  %v2059_v42 = vmul.f32 %v2893_v39, %v2887_v35 }
 0x8ce   :  { %v2897_v28 = vpop.eup %2896  ;;  %v2057_v30 = vmul.f32 %v2895_v41, %v3719_v62  ;;  %v2361_v62 = vld [vmem:[%s3757_s5] ss:$0 sm:$0xff]  ;;  %s3078_s5 = smov [#allocation13]  }
 0x8cf   :  { %v2899_v63 = vpop.eup %2898  ;;  %v2052_v1 = vadd.f32 1.0, %v2897_v28  ;;  %s2227_s21 = sshll.u32 %s3078_s5, 4  ;;  %s2228_s21 = int_to_ptr.vmem [resolvable:$true] %s2227_s21 }
 0x8d0   :  { %v2061_v31 = vadd.f32 %v2059_v42, %v2057_v30  ;;  %v2060_v2 = vmul.f32 %v2899_v63, %v2891_v6  ;;  %v2901_v32 = vpop.eup %2900  ;;  %s3036_s24 = scalar_lea.vmem %s2228_s21, 256  ;;  %p3041_p5 = scmp.lt.s32.totalorder %s2228_s21, %s2228_s21 }
 0x8d1   :  { %v2058_v43 = vmul.f32 %v2901_v32, %v3723_v36  ;;  %v2903_v61 = vpop.eup %2902  ;;  %p3037_p4 = scmp.ne.s32.totalorder %s2228_s21, %s3036_s24  ;;  %p3042_p6 = scmp.lt.s32.totalorder %s3036_s24, %s3036_s24 }
 0x8d2   :  { %2904 = vtanh.f32 %v2061_v31 }
 0x8d3   :  { %v2062_v4 = vadd.f32 %v2060_v2, %v2058_v43  ;;  %2906 = vrcp.f32 %v2052_v1  ;;  %p3043_p7 = por %p3042_p6, %p3041_p5 }
 0x8d5   :  { %2908 = vtanh.f32 %v2062_v4  ;;  %p3044_p8 = pnand %p3043_p7, %p3037_p4 }
 0x8dc   :  { %v2905_v37 = vpop.eup %2904 }
 0x8dd   :  { %v2065_v5 = vmul.f32 %v2905_v37, %v2903_v61  ;;  %v2907_v7 = vpop.eup %2906 }
 0x8df   :  { %v2909_v11 = vpop.eup %2908 }
 0x8e0   :  { %v2066_v14 = vmul.f32 %v2909_v11, %v2907_v7 }
 0x8e2   :  { %v2076_v3 = vpack.c.bf16 %v2066_v14, %v2065_v5 }
 0x8e4   :  { %2396 = vmatmul.mubr.bf16.vlgmr.msra.gmra.mrb[32].mxu0 %v2076_v3 }
 0x9b7   :  { %v2182_v13 = vpop.f32.mrb[32].mxu0 }
 0x9b8   :  { %v2183_v33 = vadd.f32 %v2361_v62, %v2182_v13  ;;  %v2397_v36 = vpop.f32.mrb[33].mxu0 }
 0x9b9   :  { %v2185_v15 = vpop.f32.mrb[34].mxu0 }
 0x9ba   :  { %v2194_v18 = vsel %vm2192_vm1, %v2183_v33, -1e+30  ;;  %v2398_v52 = vpop.f32.mrb[35].mxu0 }
 0x9bb   :  { %v2196_v0 = vmax.f32 %v2194_v18, -1e+30 }
 0x9bd   :  { %v2197_v44 = vrot.slane %v2196_v0, 4 }
 0x9bf   :  { %v2198_v21 = vmax.f32 %v2196_v0, %v2197_v44 }
 0x9c1   :  { %v2199_v45 = vrot.slane %v2198_v21, 2 }
 0x9c3   :  { %v2200_v46 = vmax.f32 %v2198_v21, %v2199_v45 }
 0x9c5   :  { %v2201_v47 = vrot.slane %v2200_v46, 1 }
 0x9c7   :  { %v2202_v48 = vmax.f32 %v2200_v46, %v2201_v47 }
 0x9c9   :  { %v2203_v49 = vsub.f32 %v2194_v18, %v2202_v48  ;;  %v2204_v50 = vsub.f32 -1e+30, %v2202_v48 }
 0x9cb   :  { %v2205_v51 = vmul.f32 1.442695, %v2203_v49  ;;  %v2207_v53 = vmul.f32 1.442695, %v2204_v50 }
 0x9cd   :  { %2910 = vpow2.f32 %v2205_v51 }
 0x9ce   :  { %2912 = vpow2.f32 %v2207_v53 }
 0x9d7   :  { %v2911_v54 = vpop.eup %2910 }
 0x9d8   :  { %v2913_v12 = vpop.eup %2912 }
 0x9d9   :  { %v2209_v55 = vadd.f32 %v2913_v12, %v2911_v54 }
 0x9db   :  { %v2210_v56 = vrot.slane %v2209_v55, 4 }
 0x9dd   :  { %v2211_v57 = vadd.f32 %v2210_v56, %v2209_v55 }
 0x9df   :  { %v2212_v58 = vrot.slane %v2211_v57, 2 }
 0x9e1   :  { %v2213_v59 = vadd.f32 %v2212_v58, %v2211_v57 }
 0x9e3   :  { %v2214_v60 = vrot.slane %v2213_v59, 1 }
 0x9e5   :  { %v2215_v20 = vadd.f32 %v2214_v60, %v2213_v59 }
 0x9e7   :  { %2914 = vlog2.f32 %v2215_v20 }
 0x9f1   :  { %v2915_v10 = vpop.eup %2914 }
 0x9f2   :  { %v2217_v23 = vmul.f32 0.6931472, %v2915_v10 }
 0x9f4   :  { %v2218_v27 = vsub.f32 %v2203_v49, %v2217_v23  ;;  %v2219_v26 = vsub.f32 %v2204_v50, %v2217_v23 }
 0x9f6   :  { %2220 = vst [vmem:[#allocation13] sm:$0xff] %v2218_v27  ;;  %2221 = vst [vmem:[#allocation13 + $0x8] sm:$0xff] %v2219_v26 }
 0x9f7   :  { %3047 = shalt.err (!%p3044_p8)
}
 0x9f8   :  { %s3048_s27 = scalar_lea.hbm %s3758_s6, 256 }
 0x9f9   :  { %p3049_p9 = scmp.ne.s32.totalorder %s3758_s6, %s3048_s27  ;;  %p3052_p10 = scmp.lt.u32.totalorder %s3048_s27, %s3758_s6 }
 0x9fb   :  { %p3054_p11 = pnand %p3052_p10, %p3049_p9 }
 0x9fd   :  { %3057 = shalt.err (!%p3054_p11)
}
 0x9fe   :  { %s3079_s10 = smov 128   ;;  %s3080_s11 = smov 8  }
 0x9ff   :  { %2233 = dma.vmem_to_hbm [thread:$0]  %s2228_s21, 256, %s3758_s6, [#allocation7], %s3079_s10, %s3079_s10, %s3080_s11  }
 0xa00   :  { %3064 = dma.done.wait [#allocation7], 256  }
 0xa01   :  { %3065 = vsyncadd [#allocation7], 4294967040 }
 0xa02   :  { %2237 = vsyncpa [#allocation6], 1 }
 0xa03   :  { %2238 = vsyncpa [#allocation9], 1 }
 0xa04   :  { %2239 = vsyncpa [#allocation12], 1 }
 0xa05   :  { %2240 = vsyncpa [#allocation7], 1 }

// kernel: tpu_custom_call.1
= control target key start
LH: loop header
LB: loop body
LE: loop exit
PB: predicated region body
PF: predicated region fallthrough
CT: control target
= control target key end

     0   :  { %11 = vsyncpa [#allocation6], 0  ;;  %s3752_s0 = inlined_call_operand.hbm [shape: bf16[8,16,128], index: 0, kind: input, shape index: {}]   ;;  %s3753_s1 = inlined_call_operand.hbm [shape: bf16[128,512], index: 1, kind: input, shape index: {}]   ;;  %s3754_s2 = inlined_call_operand.hbm [shape: bf16[128,512], index: 2, kind: input, shape index: {}]   ;;  %s3755_s3 = inlined_call_operand.vmem [shape: f32[1,512], index: 3, kind: input, shape index: {}]   ;;  %s3756_s4 = inlined_call_operand.hbm [shape: bf16[128,128], index: 4, kind: input, shape index: {}]   ;;  %s3757_s5 = inlined_call_operand.vmem [shape: f32[1,128], index: 5, kind: input, shape index: {}]   ;;  %s3758_s6 = inlined_call_operand.hbm [shape: f32[16,128], index: 6, kind: output, shape index: {}]  }
   0x1   :  { %12 = vsyncpa [#allocation9], 0 }
   0x2   :  { %13 = vsyncpa [#allocation12], 0 }
   0x3   :  { %14 = vsyncpa [#allocation7], 0  ;;  %s3066_s21 = smov [#allocation8]   ;;  %s2948_s25 = scalar_lea.hbm %s3753_s1, 4096 }
   0x4   :  { %s32_s22 = sshll.u32 %s3066_s21, 4  ;;  %p2949_p0 = scmp.ne.s32.totalorder %s3753_s1, %s2948_s25  ;;  %s33_s22 = int_to_ptr.vmem [resolvable:$true] %s32_s22 }
   0x5   :  { %p2952_p1 = scmp.lt.u32.totalorder %s2948_s25, %s3753_s1 }
   0x7   :  { %p2954_p2 = pnand %p2952_p1, %p2949_p0 }
   0x9   :  { %2957 = shalt.err (!%p2954_p2)
}
   0xa   :  { %s2958_s30 = scalar_lea.vmem %s33_s22, 4096  ;;  %p2963_p4 = scmp.lt.s32.totalorder %s33_s22, %s33_s22 }
   0xb   :  { %p2959_p3 = scmp.ne.s32.totalorder %s33_s22, %s2958_s30  ;;  %p2964_p5 = scmp.lt.s32.totalorder %s2958_s30, %s2958_s30 }
   0xd   :  { %p2965_p6 = por %p2964_p5, %p2963_p4 }
   0xf   :  { %p2966_p7 = pnand %p2965_p6, %p2959_p3 }
  0x11   :  { %2969 = shalt.err (!%p2966_p7)
}
  0x12   :  { %s3067_s7 = smov 256   ;;  %s3068_s8 = smov 16  }
  0x13   :  { %38 = dma.hbm_to_vmem [thread:$0]  %s3753_s1, 4096, %s33_s22, [#allocation9], %s3067_s7, %s3067_s7, %s3068_s8  }
  0x14   :  { %s3069_s11 = smov [#allocation5]   ;;  %s2970_s15 = scalar_lea.hbm %s3752_s0, 1024 }
  0x15   :  { %s20_s12 = sshll.u32 %s3069_s11, 4  ;;  %p2971_p8 = scmp.ne.s32.totalorder %s3752_s0, %s2970_s15  ;;  %s21_s12 = int_to_ptr.vmem [resolvable:$true] %s20_s12 }
  0x16   :  { %p2974_p9 = scmp.lt.u32.totalorder %s2970_s15, %s3752_s0 }
  0x18   :  { %p2976_p10 = pnand %p2974_p9, %p2971_p8 }
  0x1a   :  { %2979 = shalt.err (!%p2976_p10)
}
  0x1b   :  { %s2980_s20 = scalar_lea.vmem %s21_s12, 1024  ;;  %p2985_p12 = scmp.lt.s32.totalorder %s21_s12, %s21_s12 }
  0x1c   :  { %p2981_p11 = scmp.ne.s32.totalorder %s21_s12, %s2980_s20  ;;  %p2986_p13 = scmp.lt.s32.totalorder %s2980_s20, %s2980_s20 }
  0x1e   :  { %p2987_p0 = por %p2986_p13, %p2985_p12 }
  0x20   :  { %p2988_p1 = pnand %p2987_p0, %p2981_p11 }
  0x22   :  { %2991 = shalt.err (!%p2988_p1)
}
  0x23   :  { %s3070_s1 = smov 64   ;;  %s3071_s21 = smov 4  }
  0x24   :  { %26 = dma.hbm_to_vmem [thread:$0]  %s3752_s0, 1024, %s21_s12, [#allocation6], %s3070_s1, %s3070_s1, %s3071_s21  }
  0x25   :  { %s3072_s24 = smov [#allocation10]   ;;  %s3073_s26 = smov [#allocation11]  }
  0x26   :  { %s44_s25 = sshll.u32 %s3072_s24, 4  ;;  %s58_s27 = sshll.u32 %s3073_s26, 4  ;;  %s45_s25 = int_to_ptr.vmem [resolvable:$true] %s44_s25  ;;  %s3146_s27 = int_to_ptr.vmem [resolvable:$true] %s58_s27 }
  0x27   :  { %s2992_s30 = scalar_lea.hbm %s3754_s2, 4096 }
  0x28   :  { %p2993_p2 = scmp.ne.s32.totalorder %s3754_s2, %s2992_s30  ;;  %p2996_p3 = scmp.lt.u32.totalorder %s2992_s30, %s3754_s2 }
  0x2a   :  { %p2998_p4 = pnand %p2996_p3, %p2993_p2 }
  0x2c   :  { %3001 = shalt.err (!%p2998_p4)
}
  0x2d   :  { %s3002_s0 = scalar_lea.vmem %s45_s25, 4096  ;;  %p3007_p6 = scmp.lt.s32.totalorder %s45_s25, %s45_s25 }
  0x2e   :  { %p3003_p5 = scmp.ne.s32.totalorder %s45_s25, %s3002_s0  ;;  %p3008_p7 = scmp.lt.s32.totalorder %s3002_s0, %s3002_s0 }
  0x30   :  { %p3009_p8 = por %p3008_p7, %p3007_p6 }
  0x32   :  { %p3010_p9 = pnand %p3009_p8, %p3003_p5 }
  0x34   :  { %3013 = shalt.err (!%p3010_p9)
}
  0x35   :  { %50 = dma.hbm_to_vmem [thread:$0]  %s3754_s2, 4096, %s45_s25, [#allocation9], %s3067_s7, %s3067_s7, %s3068_s8  }
  0x36   :  { %s3014_s17 = scalar_lea.hbm %s3756_s4, 1024 }
  0x37   :  { %p3015_p10 = scmp.ne.s32.totalorder %s3756_s4, %s3014_s17  ;;  %p3018_p11 = scmp.lt.u32.totalorder %s3014_s17, %s3756_s4 }
  0x39   :  { %p3020_p12 = pnand %p3018_p11, %p3015_p10 }
  0x3b   :  { %3023 = shalt.err (!%p3020_p12)
}
  0x3c   :  { %s3024_s23 = scalar_lea.vmem %s3146_s27, 1024  ;;  %p3029_p0 = scmp.lt.s32.totalorder %s3146_s27, %s3146_s27 }
  0x3d   :  { %p3025_p13 = scmp.ne.s32.totalorder %s3146_s27, %s3024_s23  ;;  %p3030_p1 = scmp.lt.s32.totalorder %s3024_s23, %s3024_s23 }
  0x3f   :  { %p3031_p2 = por %p3030_p1, %p3029_p0 }
  0x41   :  { %p3032_p3 = pnand %p3031_p2, %p3025_p13 }
  0x43   :  { %3035 = shalt.err (!%p3032_p3)
}
  0x44   :  { %64 = dma.hbm_to_vmem [thread:$0]  %s3756_s4, 1024, %s3146_s27, [#allocation12], %s3070_s1, %s3070_s1, %s3071_s21  }
  0x45   :  { %3058 = dma.done.wait [#allocation6], 1024  }
  0x46   :  { %3059 = vsyncadd [#allocation6], 4294966272 }
  0x47   :  { %3060 = dma.done.wait [#allocation9], 8192  }
  0x48   :  { %3061 = vsyncadd [#allocation9], 4294959104 }
  0x49   :  { %3062 = dma.done.wait [#allocation12], 1024  }
  0x4a   :  { %3063 = vsyncadd [#allocation12], 4294966272  ;;  %v3074_v0 = vmov 0   ;;  %v2542_v1 = vld [vmem:[#allocation8 + $0x4] ss:$16 sps:$4 sm:$0xff]   ;;  %v2594_v43 = vld [vmem:[#allocation5 + $0x8] sm:$0xff]  }
  0x4b   :  { %398 = vmatprep.mubr.bf16.mxu0 %v3074_v0  ;;  %511 = vmatprep.mubr.bf16.mxu1 %v3074_v0  ;;  %v2544_v2 = vld [vmem:[#allocation8 + $0xc] ss:$16 sps:$4 sm:$0xff]   ;;  %v2546_v3 = vld [vmem:[#allocation8] ss:$16 sps:$4 sm:$0xff]   ;;  %v2547_v4 = vld [vmem:[#allocation8 + $0x8] ss:$16 sps:$4 sm:$0xff]  }
  0x4c   :  { %366 = vmatprep.subr.bf16.mxu0 %v2542_v1  ;;  %479 = vmatprep.subr.bf16.mxu1 %v2544_v2  ;;  %v2548_v5 = vld [vmem:[#allocation8 + $0x24] ss:$16 sps:$4 sm:$0xff]   ;;  %v2550_v6 = vld [vmem:[#allocation8 + $0x2c] ss:$16 sps:$4 sm:$0xff]   ;;  %v2552_v7 = vld [vmem:[#allocation8 + $0x20] ss:$16 sps:$4 sm:$0xff]  }
  0x4d   :  { %367 = vmatpush1.bf16.msra.mxu0 %v2546_v3  ;;  %480 = vmatpush1.bf16.msra.mxu1 %v2547_v4  ;;  %v2553_v8 = vld [vmem:[#allocation8 + $0x28] ss:$16 sps:$4 sm:$0xff]   ;;  %v2554_v9 = vld [vmem:[#allocation8 + $0x44] ss:$16 sps:$4 sm:$0xff]   ;;  %v2556_v10 = vld [vmem:[#allocation8 + $0x4c] ss:$16 sps:$4 sm:$0xff]  }
  0x4e   :  { %368 = vmatprep.subr.bf16.mxu0 %v2548_v5  ;;  %481 = vmatprep.subr.bf16.mxu1 %v2550_v6  ;;  %v2558_v11 = vld [vmem:[#allocation8 + $0x40] ss:$16 sps:$4 sm:$0xff]   ;;  %v2559_v12 = vld [vmem:[#allocation8 + $0x48] ss:$16 sps:$4 sm:$0xff]   ;;  %v2560_v13 = vld [vmem:[#allocation8 + $0x64] ss:$16 sps:$4 sm:$0xff]  }
  0x4f   :  { %v2562_v14 = vld [vmem:[#allocation8 + $0x6c] ss:$16 sps:$4 sm:$0xff]   ;;  %v2564_v15 = vld [vmem:[#allocation8 + $0x60] ss:$16 sps:$4 sm:$0xff]   ;;  %v2565_v16 = vld [vmem:[#allocation8 + $0x68] ss:$16 sps:$4 sm:$0xff]  }
  0x50   :  { %v2566_v17 = vld [vmem:[#allocation8 + $0x84] ss:$16 sps:$4 sm:$0xff]   ;;  %v2568_v18 = vld [vmem:[#allocation8 + $0x8c] ss:$16 sps:$4 sm:$0xff]   ;;  %v2570_v19 = vld [vmem:[#allocation8 + $0x80] ss:$16 sps:$4 sm:$0xff]  }
  0x51   :  { %369 = vmatpush1.bf16.msra.mxu0 %v2552_v7  ;;  %482 = vmatpush1.bf16.msra.mxu1 %v2553_v8  ;;  %v2571_v20 = vld [vmem:[#allocation8 + $0x88] ss:$16 sps:$4 sm:$0xff]   ;;  %v2572_v21 = vld [vmem:[#allocation8 + $0xa4] ss:$16 sps:$4 sm:$0xff]   ;;  %v2574_v22 = vld [vmem:[#allocation8 + $0xac] ss:$16 sps:$4 sm:$0xff]  }
  0x52   :  { %370 = vmatprep.subr.bf16.mxu0 %v2554_v9  ;;  %483 = vmatprep.subr.bf16.mxu1 %v2556_v10  ;;  %v2576_v23 = vld [vmem:[#allocation8 + $0xa0] ss:$16 sps:$4 sm:$0xff]   ;;  %v2577_v24 = vld [vmem:[#allocation8 + $0xa8] ss:$16 sps:$4 sm:$0xff]   ;;  %v2578_v25 = vld [vmem:[#allocation8 + $0xc4] ss:$16 sps:$4 sm:$0xff]  }
  0x53   :  { %v2580_v26 = vld [vmem:[#allocation8 + $0xcc] ss:$16 sps:$4 sm:$0xff]   ;;  %v2582_v27 = vld [vmem:[#allocation8 + $0xc0] ss:$16 sps:$4 sm:$0xff]   ;;  %v2583_v28 = vld [vmem:[#allocation8 + $0xc8] ss:$16 sps:$4 sm:$0xff]  }
  0x54   :  { %v2584_v29 = vld [vmem:[#allocation8 + $0xe4] ss:$16 sps:$4 sm:$0xff]   ;;  %v2586_v30 = vld [vmem:[#allocation8 + $0xec] ss:$16 sps:$4 sm:$0xff]   ;;  %v2588_v31 = vld [vmem:[#allocation8 + $0xe0] ss:$16 sps:$4 sm:$0xff]  }
  0x55   :  { %371 = vmatpush1.bf16.msra.mxu0 %v2558_v11  ;;  %484 = vmatpush1.bf16.msra.mxu1 %v2559_v12  ;;  %v2589_v32 = vld [vmem:[#allocation8 + $0xe8] ss:$16 sps:$4 sm:$0xff]   ;;  %v3185_v33 = vld [vmem:[#allocation10 + $0x4] ss:$16 sps:$4 sm:$0xff]   ;;  %v3187_v34 = vld [vmem:[#allocation10 + $0xc] ss:$16 sps:$4 sm:$0xff]   ;;  %v138_v11 = vlaneseq }
  0x56   :  { %372 = vmatprep.subr.bf16.mxu0 %v2560_v13  ;;  %485 = vmatprep.subr.bf16.mxu1 %v2562_v14  ;;  %v2590_v35 = vld [vmem:[#allocation5] sm:$0xff]   ;;  %v3195_v38 = vld [vmem:[#allocation10 + $0x8] ss:$16 sps:$4 sm:$0xff]   ;;  %v3197_v39 = vld [vmem:[#allocation10 + $0x2c] ss:$16 sps:$4 sm:$0xff]   ;;  %v3075_v10 = vmov 0.0|0.0  }
  0x57   :  { %v3189_v36 = vld [vmem:[#allocation10] ss:$16 sps:$4 sm:$0xff]   ;;  %v3192_v37 = vld [vmem:[#allocation10 + $0x24] ss:$16 sps:$4 sm:$0xff]   ;;  %v3208_v42 = vld [vmem:[#allocation10 + $0x28] ss:$16 sps:$4 sm:$0xff]  }
  0x58   :  { %v3201_v40 = vld [vmem:[#allocation10 + $0x20] ss:$16 sps:$4 sm:$0xff]   ;;  %v3205_v41 = vld [vmem:[#allocation10 + $0x44] ss:$16 sps:$4 sm:$0xff]   ;;  %v3217_v46 = vld [vmem:[#allocation10 + $0x4c] ss:$16 sps:$4 sm:$0xff]  }
  0x59   :  { %373 = vmatpush1.bf16.msra.mxu0 %v2564_v15  ;;  %486 = vmatpush1.bf16.msra.mxu1 %v2565_v16  ;;  %v3212_v44 = vld [vmem:[#allocation10 + $0x40] ss:$16 sps:$4 sm:$0xff]   ;;  %v3214_v45 = vld [vmem:[#allocation10 + $0x64] ss:$16 sps:$4 sm:$0xff]   ;;  %v3220_v47 = vld [vmem:[#allocation10 + $0x48] ss:$16 sps:$4 sm:$0xff]  }
  0x5a   :  { %374 = vmatprep.subr.bf16.mxu0 %v2566_v17  ;;  %487 = vmatprep.subr.bf16.mxu1 %v2568_v18  ;;  %v3222_v48 = vld [vmem:[#allocation10 + $0x6c] ss:$16 sps:$4 sm:$0xff]   ;;  %v3227_v49 = vld [vmem:[#allocation10 + $0x60] ss:$16 sps:$4 sm:$0xff]   ;;  %v3230_v50 = vld [vmem:[#allocation10 + $0x84] ss:$16 sps:$4 sm:$0xff]  }
  0x5b   :  { %v3234_v51 = vld [vmem:[#allocation10 + $0x68] ss:$16 sps:$4 sm:$0xff]   ;;  %v2600_v52 = vld [vmem:[#allocation5 + $0x10] sm:$0xff]   ;;  %v3240_v54 = vld [vmem:[#allocation10 + $0x8c] ss:$16 sps:$4 sm:$0xff]   ;;  %v3333_v12 = vshrl.u32 %v138_v11, 7 }
  0x5c   :  { %v3237_v53 = vld [vmem:[#allocation10 + $0x80] ss:$16 sps:$4 sm:$0xff]   ;;  %v3243_v55 = vld [vmem:[#allocation10 + $0xa4] ss:$16 sps:$4 sm:$0xff]   ;;  %v3246_v56 = vld [vmem:[#allocation10 + $0x88] ss:$16 sps:$4 sm:$0xff]  }
  0x5d   :  { %375 = vmatpush1.bf16.msra.mxu0 %v2570_v19  ;;  %488 = vmatpush1.bf16.msra.mxu1 %v2571_v20  ;;  %v3248_v57 = vld [vmem:[#allocation10 + $0xac] ss:$16 sps:$4 sm:$0xff]   ;;  %v3250_v58 = vld [vmem:[#allocation10 + $0xa0] ss:$16 sps:$4 sm:$0xff]   ;;  %v3254_v59 = vld [vmem:[#allocation10 + $0xc4] ss:$16 sps:$4 sm:$0xff]  }
  0x5e   :  { %376 = vmatprep.subr.bf16.mxu0 %v2572_v21  ;;  %489 = vmatprep.subr.bf16.mxu1 %v2574_v22  ;;  %v3256_v60 = vld [vmem:[#allocation10 + $0xa8] ss:$16 sps:$4 sm:$0xff]   ;;  %v3264_v62 = vld [vmem:[#allocation10 + $0xc0] ss:$16 sps:$4 sm:$0xff]   ;;  %v3266_v63 = vld [vmem:[#allocation10 + $0xcc] ss:$16 sps:$4 sm:$0xff]  }
  0x5f   :  { %v2607_v61 = vld [vmem:[#allocation5 + $0x18] sm:$0xff]   ;;  %v3270_v1 = vld [vmem:[#allocation10 + $0xe4] ss:$16 sps:$4 sm:$0xff]   ;;  %v3280_v4 = vld [vmem:[#allocation10 + $0xe0] ss:$16 sps:$4 sm:$0xff]   ;;  %v140_v13 = vsub.s32 0, %v3333_v12 }
  0x60   :  { %v3272_v2 = vld [vmem:[#allocation10 + $0xc8] ss:$16 sps:$4 sm:$0xff]   ;;  %v3274_v3 = vld [vmem:[#allocation10 + $0xec] ss:$16 sps:$4 sm:$0xff]   ;;  %v2614_v6 = vld [vmem:[#allocation5 + $0x20] sm:$0xff]   ;;  %v144_v15 = vsub.s32 1, %v3333_v12 }
  0x61   :  { %377 = vmatpush1.bf16.msra.mxu0 %v2576_v23  ;;  %490 = vmatpush1.bf16.msra.mxu1 %v2577_v24  ;;  %v3284_v5 = vld [vmem:[#allocation10 + $0xe8] ss:$16 sps:$4 sm:$0xff]   ;;  %v2628_v8 = vld [vmem:[#allocation5 + $0x30] sm:$0xff]   ;;  %v136_v14 = vld [vmem:[%s3755_s3] sm:$0xf]  ;;  %v152_v20 = vsub.s32 3, %v3333_v12 }
  0x62   :  { %378 = vmatprep.subr.bf16.mxu0 %v2578_v25  ;;  %491 = vmatprep.subr.bf16.mxu1 %v2580_v26  ;;  %v2621_v7 = vld [vmem:[#allocation5 + $0x28] sm:$0xff]   ;;  %v2636_v9 = vld [vmem:[#allocation5 + $0x38] sm:$0xff]   ;;  %v3340_v16 = vrot.slane %v136_v14, %v140_v13  ;;  %v3342_v17 = vrot.slane %v136_v14, %v144_v15  ;;  %vm3077_vm0 = vmmov 0   ;;  %vm2192_vm1 = vcmp.lt.s32.totalorder %v3333_v12, 2 }
  0x65   :  { %379 = vmatpush1.bf16.msra.mxu0 %v2582_v27  ;;  %492 = vmatpush1.bf16.msra.mxu1 %v2583_v28  ;;  %v148_v28 = vsub.s32 2, %v3333_v12 }
  0x66   :  { %380 = vmatprep.subr.bf16.mxu0 %v2584_v29  ;;  %493 = vmatprep.subr.bf16.mxu1 %v2586_v30 }
  0x69   :  { %381 = vmatpush1.bf16.msra.mxu0 %v2588_v31  ;;  %494 = vmatpush1.bf16.msra.mxu1 %v2589_v32 }
  0x6a   :  { %861 = vmatprep.subr.bf16.mxu0 %v3185_v33  ;;  %904 = vmatprep.subr.bf16.mxu1 %v3187_v34 }
  0x6c   :  { %399 = vmatmul.mubr.bf16.vlgmr.msra.gmra.mrb[0].mxu0 %v2590_v35  ;;  %512 = vmatmul.mubr.bf16.vlgmr.msra.gmra.mrb[0].mxu1 %v2590_v35  ;;  %v3349_v35 = vrot.slane %v136_v14, %v152_v20 }
  0x6d   :  { %862 = vmatpush1.bf16.msra.mxu0 %v3189_v36  ;;  %408 = vmatprep.mubr.bf16.mxu0 %v3074_v0 }
  0x6e   :  { %521 = vmatprep.mubr.bf16.mxu1 %v3074_v0  ;;  %863 = vmatprep.subr.bf16.mxu0 %v3192_v37 }
  0x6f   :  { %905 = vmatpush1.bf16.msra.mxu1 %v3195_v38 }
  0x70   :  { %906 = vmatprep.subr.bf16.mxu1 %v3197_v39 }
  0x71   :  { %864 = vmatpush1.bf16.msra.mxu0 %v3201_v40 }
  0x72   :  { %865 = vmatprep.subr.bf16.mxu0 %v3205_v41 }
  0x73   :  { %907 = vmatpush1.bf16.msra.mxu1 %v3208_v42 }
  0x74   :  { %409 = vmatmul.mubr.bf16.gmra.mrb[4].mxu0 %v2594_v43  ;;  %522 = vmatmul.mubr.bf16.gmra.mrb[4].mxu1 %v2594_v43 }
  0x75   :  { %418 = vmatprep.mubr.bf16.mxu0 %v3074_v0  ;;  %531 = vmatprep.mubr.bf16.mxu1 %v3074_v0 }
  0x76   :  { %866 = vmatpush1.bf16.msra.mxu0 %v3212_v44  ;;  %908 = vmatprep.subr.bf16.mxu1 %v3217_v46 }
  0x77   :  { %867 = vmatprep.subr.bf16.mxu0 %v3214_v45  ;;  %909 = vmatpush1.bf16.msra.mxu1 %v3220_v47 }
  0x78   :  { %910 = vmatprep.subr.bf16.mxu1 %v3222_v48 }
  0x7a   :  { %868 = vmatpush1.bf16.msra.mxu0 %v3227_v49 }
  0x7b   :  { %869 = vmatprep.subr.bf16.mxu0 %v3230_v50  ;;  %911 = vmatpush1.bf16.msra.mxu1 %v3234_v51 }
  0x7c   :  { %419 = vmatmul.mubr.bf16.gmra.mrb[8].mxu0 %v2600_v52  ;;  %532 = vmatmul.mubr.bf16.gmra.mrb[8].mxu1 %v2600_v52 }
  0x7d   :  { %428 = vmatprep.mubr.bf16.mxu0 %v3074_v0  ;;  %541 = vmatprep.mubr.bf16.mxu1 %v3074_v0 }
  0x7e   :  { %870 = vmatpush1.bf16.msra.mxu0 %v3237_v53  ;;  %912 = vmatprep.subr.bf16.mxu1 %v3240_v54 }
  0x7f   :  { %871 = vmatprep.subr.bf16.mxu0 %v3243_v55  ;;  %913 = vmatpush1.bf16.msra.mxu1 %v3246_v56 }
  0x80   :  { %914 = vmatprep.subr.bf16.mxu1 %v3248_v57 }
  0x82   :  { %872 = vmatpush1.bf16.msra.mxu0 %v3250_v58 }
  0x83   :  { %873 = vmatprep.subr.bf16.mxu0 %v3254_v59  ;;  %915 = vmatpush1.bf16.msra.mxu1 %v3256_v60 }
  0x84   :  { %429 = vmatmul.mubr.bf16.gmra.mrb[12].mxu0 %v2607_v61  ;;  %542 = vmatmul.mubr.bf16.gmra.mrb[12].mxu1 %v2607_v61 }
  0x85   :  { %438 = vmatprep.mubr.bf16.mxu0 %v3074_v0  ;;  %551 = vmatprep.mubr.bf16.mxu1 %v3074_v0 }
  0x86   :  { %874 = vmatpush1.bf16.msra.mxu0 %v3264_v62  ;;  %916 = vmatprep.subr.bf16.mxu1 %v3266_v63 }
  0x87   :  { %875 = vmatprep.subr.bf16.mxu0 %v3270_v1  ;;  %917 = vmatpush1.bf16.msra.mxu1 %v3272_v2 }
  0x88   :  { %918 = vmatprep.subr.bf16.mxu1 %v3274_v3 }
  0x8a   :  { %876 = vmatpush1.bf16.msra.mxu0 %v3280_v4 }
  0x8b   :  { %919 = vmatpush1.bf16.msra.mxu1 %v3284_v5  ;;  %1013 = vmatprep.subr.bf16.mxu0 %v3185_v33 }
  0x8c   :  { %439 = vmatmul.mubr.bf16.gmra.mrb[16].mxu0 %v2614_v6  ;;  %552 = vmatmul.mubr.bf16.gmra.mrb[16].mxu1 %v2614_v6  ;;  %v3352_v6 = vrot.slane %v136_v14, %v148_v28 }
  0x8d   :  { %448 = vmatprep.mubr.bf16.mxu0 %v3074_v0  ;;  %561 = vmatprep.mubr.bf16.mxu1 %v3074_v0 }
  0x8e   :  { %1056 = vmatprep.subr.bf16.mxu1 %v3187_v34 }
  0x94   :  { %449 = vmatmul.mubr.bf16.gmra.mrb[20].mxu0 %v2621_v7  ;;  %562 = vmatmul.mubr.bf16.gmra.mrb[20].mxu1 %v2621_v7 }
  0x95   :  { %458 = vmatprep.mubr.bf16.mxu0 %v3074_v0  ;;  %571 = vmatprep.mubr.bf16.mxu1 %v3074_v0 }
  0x9c   :  { %459 = vmatmul.mubr.bf16.gmra.mrb[24].mxu0 %v2628_v8  ;;  %572 = vmatmul.mubr.bf16.gmra.mrb[24].mxu1 %v2628_v8 }
  0x9d   :  { %468 = vmatprep.mubr.bf16.mxu0 %v3074_v0  ;;  %581 = vmatprep.mubr.bf16.mxu1 %v3074_v0 }
  0xa4   :  { %469 = vmatmul.mubr.bf16.gmra.mrb[28].mxu0 %v2636_v9  ;;  %582 = vmatmul.mubr.bf16.gmra.mrb[28].mxu1 %v2636_v9 }
  0xa5   :  { %893 = vmatprep.mubr.bf16.mxu0 %v3074_v0  ;;  %936 = vmatprep.mubr.bf16.mxu1 %v3074_v0 }
  0xac   :  { %894 = vmatmul.mubr.bf16.vlgmr.msra.gmra.mrb[0].mxu0 %v3075_v10  ;;  %937 = vmatmul.mubr.bf16.vlgmr.msra.gmra.mrb[0].mxu1 %v3075_v10 }
  0xad   :  { %1014 = vmatpush1.bf16.msra.mxu0 %v3189_v36  ;;  %1057 = vmatpush1.bf16.msra.mxu1 %v3195_v38 }
  0xae   :  { %1015 = vmatprep.subr.bf16.mxu0 %v3192_v37  ;;  %1058 = vmatprep.subr.bf16.mxu1 %v3197_v39 }
  0xaf   :  { %1045 = vmatprep.mubr.bf16.mxu0 %v3074_v0  ;;  %1088 = vmatprep.mubr.bf16.mxu1 %v3074_v0 }
  0xb1   :  { %1016 = vmatpush1.bf16.msra.mxu0 %v3201_v40  ;;  %1059 = vmatpush1.bf16.msra.mxu1 %v3208_v42 }
  0xb2   :  { %1017 = vmatprep.subr.bf16.mxu0 %v3205_v41  ;;  %1060 = vmatprep.subr.bf16.mxu1 %v3217_v46 }
  0xb5   :  { %1018 = vmatpush1.bf16.msra.mxu0 %v3212_v44  ;;  %1061 = vmatpush1.bf16.msra.mxu1 %v3220_v47 }
  0xb6   :  { %1019 = vmatprep.subr.bf16.mxu0 %v3214_v45  ;;  %1062 = vmatprep.subr.bf16.mxu1 %v3222_v48 }
  0xb9   :  { %1020 = vmatpush1.bf16.msra.mxu0 %v3227_v49  ;;  %1063 = vmatpush1.bf16.msra.mxu1 %v3234_v51 }
  0xba   :  { %1021 = vmatprep.subr.bf16.mxu0 %v3230_v50  ;;  %1064 = vmatprep.subr.bf16.mxu1 %v3240_v54 }
  0xbd   :  { %1022 = vmatpush1.bf16.msra.mxu0 %v3237_v53  ;;  %1065 = vmatpush1.bf16.msra.mxu1 %v3246_v56 }
  0xbe   :  { %1023 = vmatprep.subr.bf16.mxu0 %v3243_v55  ;;  %1066 = vmatprep.subr.bf16.mxu1 %v3248_v57 }
  0xc1   :  { %1024 = vmatpush1.bf16.msra.mxu0 %v3250_v58  ;;  %1067 = vmatpush1.bf16.msra.mxu1 %v3256_v60 }
  0xc2   :  { %1025 = vmatprep.subr.bf16.mxu0 %v3254_v59  ;;  %1068 = vmatprep.subr.bf16.mxu1 %v3266_v63 }
  0xc5   :  { %1026 = vmatpush1.bf16.msra.mxu0 %v3264_v62  ;;  %1069 = vmatpush1.bf16.msra.mxu1 %v3272_v2 }
  0xc6   :  { %1027 = vmatprep.subr.bf16.mxu0 %v3270_v1  ;;  %1070 = vmatprep.subr.bf16.mxu1 %v3274_v3 }
  0xc9   :  { %1028 = vmatpush1.bf16.msra.mxu0 %v3280_v4  ;;  %1071 = vmatpush1.bf16.msra.mxu1 %v3284_v5 }
  0xca   :  { %1165 = vmatprep.subr.bf16.mxu0 %v3185_v33  ;;  %1208 = vmatprep.subr.bf16.mxu1 %v3187_v34 }
 0x17f   :  { %v895_v18 = vpop.f32.mrb[0].mxu0  ;;  %v938_v19 = vpop.f32.mrb[0].mxu1 }
 0x180   :  { %v2399_v21 = vadd.f32 %v895_v18, %v3340_v16  ;;  %v897_v22 = vpop.f32.mrb[1].mxu0  ;;  %v940_v23 = vpop.f32.mrb[1].mxu1  ;;  %v2431_v8 = vadd.f32 %v938_v19, %v3352_v6 }
 0x181   :  { %v2400_v24 = vadd.f32 %v897_v22, %v3342_v17  ;;  %v899_v25 = vpop.f32.mrb[2].mxu0  ;;  %v942_v26 = vpop.f32.mrb[2].mxu1  ;;  %v2432_v7 = vadd.f32 %v940_v23, %v3349_v35 }
 0x182   :  { %v2313_v27 = vmul.f32 -1.442695, %v2399_v21  ;;  %v2401_v29 = vadd.f32 %v899_v25, %v3340_v16  ;;  %v901_v30 = vpop.f32.mrb[3].mxu0  ;;  %v944_v31 = vpop.f32.mrb[3].mxu1  ;;  %v2433_v11 = vadd.f32 %v942_v26, %v3352_v6 }
 0x183   :  { %v2315_v32 = vmul.f32 -1.442695, %v2400_v24  ;;  %v2402_v43 = vadd.f32 %v901_v30, %v3342_v17  ;;  %v2317_v9 = vmul.f32 -1.442695, %v2432_v7  ;;  %v2434_v10 = vadd.f32 %v944_v31, %v3349_v35 }
 0x184   :  { %2654 = vpow2.f32 %v2313_v27  ;;  %v2314_v52 = vmul.f32 -1.442695, %v2401_v29 }
 0x185   :  { %2656 = vpow2.f32 %v2315_v32  ;;  %v2316_v61 = vmul.f32 -1.442695, %v2402_v43  ;;  %v2318_v20 = vmul.f32 -1.442695, %v2434_v10 }
 0x186   :  { %2658 = vpow2.f32 %v2314_v52 }
 0x187   :  { %2660 = vpow2.f32 %v2316_v61 }
 0x188   :  { %2662 = vtanh.f32 %v2431_v8 }
 0x189   :  { %2664 = vpow2.f32 %v2317_v9 }
 0x18a   :  { %2666 = vtanh.f32 %v2433_v11 }
 0x18e   :  { %v2655_v13 = vpop.eup %2654 }
 0x18f   :  { %v2657_v15 = vpop.eup %2656  ;;  %v961_v18 = vadd.f32 1.0, %v2655_v13 }
 0x190   :  { %v973_v21 = vadd.f32 1.0, %v2657_v15  ;;  %v2659_v14 = vpop.eup %2658 }
 0x191   :  { %2668 = vrcp.f32 %v961_v18  ;;  %v962_v22 = vadd.f32 1.0, %v2659_v14  ;;  %v2661_v23 = vpop.eup %2660 }
 0x192   :  { %2670 = vrcp.f32 %v973_v21  ;;  %v974_v19 = vadd.f32 1.0, %v2661_v23  ;;  %v2663_v24 = vpop.eup %2662 }
 0x193   :  { %2672 = vpow2.f32 %v2318_v20  ;;  %v2665_v25 = vpop.eup %2664 }
 0x194   :  { %2674 = vrcp.f32 %v962_v22  ;;  %v2667_v26 = vpop.eup %2666  ;;  %v987_v43 = vadd.f32 1.0, %v2665_v25 }
 0x195   :  { %2676 = vrcp.f32 %v974_v19 }
 0x196   :  { %2678 = vrcp.f32 %v987_v43 }
 0x19b   :  { %v2669_v27 = vpop.eup %2668 }
 0x19c   :  { %v2671_v28 = vpop.eup %2670  ;;  %v995_v29 = vmul.f32 %v2669_v27, %v2663_v24 }
 0x19d   :  { %v2673_v30 = vpop.eup %2672  ;;  %v993_v31 = vmul.f32 0.0, %v2671_v28 }
 0x19e   :  { %v2675_v32 = vpop.eup %2674  ;;  %v988_v8 = vadd.f32 1.0, %v2673_v30 }
 0x19f   :  { %v3358_v52 = vadd.f32 %v995_v29, %v993_v31  ;;  %v996_v61 = vmul.f32 %v2675_v32, %v2667_v26  ;;  %v2677_v7 = vpop.eup %2676 }
 0x1a0   :  { %v994_v9 = vmul.f32 0.0, %v2677_v7  ;;  %v2679_v11 = vpop.eup %2678 }
 0x1a1   :  { %2680 = vtanh.f32 %v3358_v52 }
 0x1a2   :  { %v3361_v10 = vadd.f32 %v996_v61, %v994_v9  ;;  %2682 = vrcp.f32 %v988_v8 }
 0x1a4   :  { %2684 = vtanh.f32 %v3361_v10 }
 0x1ab   :  { %v2681_v13 = vpop.eup %2680 }
 0x1ac   :  { %v2683_v15 = vpop.eup %2682  ;;  %v1001_v20 = vmul.f32 %v2681_v13, %v2679_v11 }
 0x1ae   :  { %v2685_v18 = vpop.eup %2684 }
 0x1af   :  { %v1002_v21 = vmul.f32 %v2685_v18, %v2683_v15 }
 0x1b1   :  { %v1012_v14 = vpack.c.bf16 %v1002_v21, %v1001_v20 }
 0x1b3   :  { %1046 = vmatmul.mubr.bf16.vlgmr.msra.gmra.mrb[4].mxu0 %v1012_v14  ;;  %1089 = vmatmul.mubr.bf16.vlgmr.msra.gmra.mrb[4].mxu1 %v1012_v14 }
 0x1b4   :  { %1166 = vmatpush1.bf16.msra.mxu0 %v3189_v36  ;;  %1209 = vmatpush1.bf16.msra.mxu1 %v3195_v38 }
 0x1b5   :  { %1167 = vmatprep.subr.bf16.mxu0 %v3192_v37  ;;  %1210 = vmatprep.subr.bf16.mxu1 %v3197_v39 }
 0x1b6   :  { %1197 = vmatprep.mubr.bf16.mxu0 %v3074_v0  ;;  %1240 = vmatprep.mubr.bf16.mxu1 %v3074_v0 }
 0x1b8   :  { %1168 = vmatpush1.bf16.msra.mxu0 %v3201_v40  ;;  %1211 = vmatpush1.bf16.msra.mxu1 %v3208_v42 }
 0x1b9   :  { %1169 = vmatprep.subr.bf16.mxu0 %v3205_v41  ;;  %1212 = vmatprep.subr.bf16.mxu1 %v3217_v46 }
 0x1bc   :  { %1170 = vmatpush1.bf16.msra.mxu0 %v3212_v44  ;;  %1213 = vmatpush1.bf16.msra.mxu1 %v3220_v47 }
 0x1bd   :  { %1171 = vmatprep.subr.bf16.mxu0 %v3214_v45  ;;  %1214 = vmatprep.subr.bf16.mxu1 %v3222_v48 }
 0x1c0   :  { %1172 = vmatpush1.bf16.msra.mxu0 %v3227_v49  ;;  %1215 = vmatpush1.bf16.msra.mxu1 %v3234_v51 }
 0x1c1   :  { %1173 = vmatprep.subr.bf16.mxu0 %v3230_v50  ;;  %1216 = vmatprep.subr.bf16.mxu1 %v3240_v54 }
 0x1c4   :  { %1174 = vmatpush1.bf16.msra.mxu0 %v3237_v53  ;;  %1217 = vmatpush1.bf16.msra.mxu1 %v3246_v56 }
 0x1c5   :  { %1175 = vmatprep.subr.bf16.mxu0 %v3243_v55  ;;  %1218 = vmatprep.subr.bf16.mxu1 %v3248_v57 }
 0x1c8   :  { %1176 = vmatpush1.bf16.msra.mxu0 %v3250_v58  ;;  %1219 = vmatpush1.bf16.msra.mxu1 %v3256_v60 }
 0x1c9   :  { %1177 = vmatprep.subr.bf16.mxu0 %v3254_v59  ;;  %1220 = vmatprep.subr.bf16.mxu1 %v3266_v63 }
 0x1cc   :  { %1178 = vmatpush1.bf16.msra.mxu0 %v3264_v62  ;;  %1221 = vmatpush1.bf16.msra.mxu1 %v3272_v2 }
 0x1cd   :  { %1179 = vmatprep.subr.bf16.mxu0 %v3270_v1  ;;  %1222 = vmatprep.subr.bf16.mxu1 %v3274_v3 }
 0x1d0   :  { %1180 = vmatpush1.bf16.msra.mxu0 %v3280_v4  ;;  %1223 = vmatpush1.bf16.msra.mxu1 %v3284_v5 }
 0x1d1   :  { %1317 = vmatprep.subr.bf16.mxu0 %v3185_v33  ;;  %1360 = vmatprep.subr.bf16.mxu1 %v3187_v34 }
 0x286   :  { %v1047_v22 = vpop.f32.mrb[4].mxu0  ;;  %v1090_v23 = vpop.f32.mrb[4].mxu1 }
 0x287   :  { %v2403_v19 = vadd.f32 %v1047_v22, %v3340_v16  ;;  %v1049_v24 = vpop.f32.mrb[5].mxu0  ;;  %v1092_v25 = vpop.f32.mrb[5].mxu1  ;;  %v2435_v11 = vadd.f32 %v1090_v23, %v3352_v6 }
 0x288   :  { %v2404_v26 = vadd.f32 %v1049_v24, %v3342_v17  ;;  %v1051_v27 = vpop.f32.mrb[6].mxu0  ;;  %v1094_v28 = vpop.f32.mrb[6].mxu1  ;;  %v2436_v9 = vadd.f32 %v1092_v25, %v3349_v35 }
 0x289   :  { %v2319_v29 = vmul.f32 -1.442695, %v2403_v19  ;;  %v2405_v30 = vadd.f32 %v1051_v27, %v3340_v16  ;;  %v1053_v31 = vpop.f32.mrb[7].mxu0  ;;  %v1096_v32 = vpop.f32.mrb[7].mxu1  ;;  %v2437_v18 = vadd.f32 %v1094_v28, %v3352_v6 }
 0x28a   :  { %v2321_v43 = vmul.f32 -1.442695, %v2404_v26  ;;  %v2406_v61 = vadd.f32 %v1053_v31, %v3342_v17  ;;  %v2323_v13 = vmul.f32 -1.442695, %v2436_v9  ;;  %v2438_v15 = vadd.f32 %v1096_v32, %v3349_v35 }
 0x28b   :  { %2686 = vpow2.f32 %v2319_v29  ;;  %v2320_v7 = vmul.f32 -1.442695, %v2405_v30 }
 0x28c   :  { %2688 = vpow2.f32 %v2321_v43  ;;  %v2322_v8 = vmul.f32 -1.442695, %v2406_v61  ;;  %v2324_v22 = vmul.f32 -1.442695, %v2438_v15 }
 0x28d   :  { %2690 = vpow2.f32 %v2320_v7 }
 0x28e   :  { %2692 = vpow2.f32 %v2322_v8 }
 0x28f   :  { %2694 = vtanh.f32 %v2435_v11 }
 0x290   :  { %2696 = vpow2.f32 %v2323_v13 }
 0x291   :  { %2698 = vtanh.f32 %v2437_v18 }
 0x295   :  { %v2687_v20 = vpop.eup %2686 }
 0x296   :  { %v2689_v21 = vpop.eup %2688  ;;  %v1113_v14 = vadd.f32 1.0, %v2687_v20 }
 0x297   :  { %v1125_v19 = vadd.f32 1.0, %v2689_v21  ;;  %v2691_v24 = vpop.eup %2690 }
 0x298   :  { %2700 = vrcp.f32 %v1113_v14  ;;  %v1114_v25 = vadd.f32 1.0, %v2691_v24  ;;  %v2693_v26 = vpop.eup %2692 }
 0x299   :  { %2702 = vrcp.f32 %v1125_v19  ;;  %v1126_v23 = vadd.f32 1.0, %v2693_v26  ;;  %v2695_v27 = vpop.eup %2694 }
 0x29a   :  { %2704 = vpow2.f32 %v2324_v22  ;;  %v2697_v29 = vpop.eup %2696 }
 0x29b   :  { %2706 = vrcp.f32 %v1114_v25  ;;  %v2699_v28 = vpop.eup %2698  ;;  %v1139_v8 = vadd.f32 1.0, %v2697_v29 }
 0x29c   :  { %2708 = vrcp.f32 %v1126_v23 }
 0x29d   :  { %2710 = vrcp.f32 %v1139_v8 }
 0x2a2   :  { %v2701_v30 = vpop.eup %2700 }
 0x2a3   :  { %v2703_v31 = vpop.eup %2702  ;;  %v1147_v32 = vmul.f32 %v2701_v30, %v2695_v27 }
 0x2a4   :  { %v2705_v43 = vpop.eup %2704  ;;  %v1145_v61 = vmul.f32 %v2703_v31, %v3358_v52 }
 0x2a5   :  { %v2707_v7 = vpop.eup %2706  ;;  %v1140_v15 = vadd.f32 1.0, %v2705_v43 }
 0x2a6   :  { %v3407_v9 = vadd.f32 %v1147_v32, %v1145_v61  ;;  %v1148_v11 = vmul.f32 %v2707_v7, %v2699_v28  ;;  %v2709_v13 = vpop.eup %2708 }
 0x2a7   :  { %v1146_v18 = vmul.f32 %v2709_v13, %v3361_v10  ;;  %v2711_v21 = vpop.eup %2710 }
 0x2a8   :  { %2712 = vtanh.f32 %v3407_v9 }
 0x2a9   :  { %v3411_v20 = vadd.f32 %v1148_v11, %v1146_v18  ;;  %2714 = vrcp.f32 %v1140_v15 }
 0x2ab   :  { %2716 = vtanh.f32 %v3411_v20 }
 0x2b2   :  { %v2713_v14 = vpop.eup %2712 }
 0x2b3   :  { %v2715_v52 = vpop.eup %2714  ;;  %v1153_v19 = vmul.f32 %v2713_v14, %v2711_v21 }
 0x2b5   :  { %v2717_v22 = vpop.eup %2716 }
 0x2b6   :  { %v1154_v24 = vmul.f32 %v2717_v22, %v2715_v52 }
 0x2b8   :  { %v1164_v25 = vpack.c.bf16 %v1154_v24, %v1153_v19 }
 0x2ba   :  { %1198 = vmatmul.mubr.bf16.vlgmr.msra.gmra.mrb[8].mxu0 %v1164_v25  ;;  %1241 = vmatmul.mubr.bf16.vlgmr.msra.gmra.mrb[8].mxu1 %v1164_v25 }
 0x2bb   :  { %1318 = vmatpush1.bf16.msra.mxu0 %v3189_v36  ;;  %1361 = vmatpush1.bf16.msra.mxu1 %v3195_v38 }
 0x2bc   :  { %1319 = vmatprep.subr.bf16.mxu0 %v3192_v37  ;;  %1362 = vmatprep.subr.bf16.mxu1 %v3197_v39 }
 0x2bd   :  { %1349 = vmatprep.mubr.bf16.mxu0 %v3074_v0  ;;  %1392 = vmatprep.mubr.bf16.mxu1 %v3074_v0 }
 0x2bf   :  { %1320 = vmatpush1.bf16.msra.mxu0 %v3201_v40  ;;  %1363 = vmatpush1.bf16.msra.mxu1 %v3208_v42 }
 0x2c0   :  { %1321 = vmatprep.subr.bf16.mxu0 %v3205_v41  ;;  %1364 = vmatprep.subr.bf16.mxu1 %v3217_v46 }
 0x2c3   :  { %1322 = vmatpush1.bf16.msra.mxu0 %v3212_v44  ;;  %1365 = vmatpush1.bf16.msra.mxu1 %v3220_v47 }
 0x2c4   :  { %1323 = vmatprep.subr.bf16.mxu0 %v3214_v45  ;;  %1366 = vmatprep.subr.bf16.mxu1 %v3222_v48 }
 0x2c7   :  { %1324 = vmatpush1.bf16.msra.mxu0 %v3227_v49  ;;  %1367 = vmatpush1.bf16.msra.mxu1 %v3234_v51 }
 0x2c8   :  { %1325 = vmatprep.subr.bf16.mxu0 %v3230_v50  ;;  %1368 = vmatprep.subr.bf16.mxu1 %v3240_v54 }
 0x2cb   :  { %1326 = vmatpush1.bf16.msra.mxu0 %v3237_v53  ;;  %1369 = vmatpush1.bf16.msra.mxu1 %v3246_v56 }
 0x2cc   :  { %1327 = vmatprep.subr.bf16.mxu0 %v3243_v55  ;;  %1370 = vmatprep.subr.bf16.mxu1 %v3248_v57 }
 0x2cf   :  { %1328 = vmatpush1.bf16.msra.mxu0 %v3250_v58  ;;  %1371 = vmatpush1.bf16.msra.mxu1 %v3256_v60 }
 0x2d0   :  { %1329 = vmatprep.subr.bf16.mxu0 %v3254_v59  ;;  %1372 = vmatprep.subr.bf16.mxu1 %v3266_v63 }
 0x2d3   :  { %1330 = vmatpush1.bf16.msra.mxu0 %v3264_v62  ;;  %1373 = vmatpush1.bf16.msra.mxu1 %v3272_v2 }
 0x2d4   :  { %1331 = vmatprep.subr.bf16.mxu0 %v3270_v1  ;;  %1374 = vmatprep.subr.bf16.mxu1 %v3274_v3 }
 0x2d7   :  { %1332 = vmatpush1.bf16.msra.mxu0 %v3280_v4  ;;  %1375 = vmatpush1.bf16.msra.mxu1 %v3284_v5 }
 0x2d8   :  { %1469 = vmatprep.subr.bf16.mxu0 %v3185_v33  ;;  %1512 = vmatprep.subr.bf16.mxu1 %v3187_v34 }
 0x38d   :  { %v1199_v10 = vpop.f32.mrb[8].mxu0  ;;  %v1242_v26 = vpop.f32.mrb[8].mxu1 }
 0x38e   :  { %v2407_v23 = vadd.f32 %v1199_v10, %v3340_v16  ;;  %v1201_v27 = vpop.f32.mrb[9].mxu0  ;;  %v1244_v29 = vpop.f32.mrb[9].mxu1  ;;  %v2439_v15 = vadd.f32 %v1242_v26, %v3352_v6 }
 0x38f   :  { %v2408_v28 = vadd.f32 %v1201_v27, %v3342_v17  ;;  %v1203_v30 = vpop.f32.mrb[10].mxu0  ;;  %v1246_v31 = vpop.f32.mrb[10].mxu1  ;;  %v2440_v13 = vadd.f32 %v1244_v29, %v3349_v35 }
 0x390   :  { %v2325_v32 = vmul.f32 -1.442695, %v2407_v23  ;;  %v2409_v43 = vadd.f32 %v1203_v30, %v3340_v16  ;;  %v1205_v61 = vpop.f32.mrb[11].mxu0  ;;  %v1248_v7 = vpop.f32.mrb[11].mxu1  ;;  %v2441_v14 = vadd.f32 %v1246_v31, %v3352_v6 }
 0x391   :  { %v2327_v8 = vmul.f32 -1.442695, %v2408_v28  ;;  %v2410_v33 = vadd.f32 %v1205_v61, %v3342_v17  ;;  %v2329_v18 = vmul.f32 -1.442695, %v2440_v13  ;;  %v2442_v21 = vadd.f32 %v1248_v7, %v3349_v35 }
 0x392   :  { %2718 = vpow2.f32 %v2325_v32  ;;  %v2326_v34 = vmul.f32 -1.442695, %v2409_v43 }
 0x393   :  { %2720 = vpow2.f32 %v2327_v8  ;;  %v2328_v11 = vmul.f32 -1.442695, %v2410_v33  ;;  %v2330_v24 = vmul.f32 -1.442695, %v2442_v21 }
 0x394   :  { %2722 = vpow2.f32 %v2326_v34 }
 0x395   :  { %2724 = vpow2.f32 %v2328_v11 }
 0x396   :  { %2726 = vtanh.f32 %v2439_v15 }
 0x397   :  { %2728 = vpow2.f32 %v2329_v18 }
 0x398   :  { %2730 = vtanh.f32 %v2441_v14 }
 0x39c   :  { %v2719_v52 = vpop.eup %2718 }
 0x39d   :  { %v2721_v22 = vpop.eup %2720  ;;  %v1265_v19 = vadd.f32 1.0, %v2719_v52 }
 0x39e   :  { %v1277_v25 = vadd.f32 1.0, %v2721_v22  ;;  %v2723_v10 = vpop.eup %2722 }
 0x39f   :  { %2732 = vrcp.f32 %v1265_v19  ;;  %v1266_v23 = vadd.f32 1.0, %v2723_v10  ;;  %v2725_v27 = vpop.eup %2724 }
 0x3a0   :  { %2734 = vrcp.f32 %v1277_v25  ;;  %v1278_v26 = vadd.f32 1.0, %v2725_v27  ;;  %v2727_v29 = vpop.eup %2726 }
 0x3a1   :  { %2736 = vpow2.f32 %v2330_v24  ;;  %v2729_v28 = vpop.eup %2728 }
 0x3a2   :  { %2738 = vrcp.f32 %v1266_v23  ;;  %v2731_v30 = vpop.eup %2730  ;;  %v1291_v33 = vadd.f32 1.0, %v2729_v28 }
 0x3a3   :  { %2740 = vrcp.f32 %v1278_v26 }
 0x3a4   :  { %2742 = vrcp.f32 %v1291_v33 }
 0x3a9   :  { %v2733_v31 = vpop.eup %2732 }
 0x3aa   :  { %v2735_v32 = vpop.eup %2734  ;;  %v1299_v43 = vmul.f32 %v2733_v31, %v2727_v29 }
 0x3ab   :  { %v2737_v61 = vpop.eup %2736  ;;  %v1297_v7 = vmul.f32 %v2735_v32, %v3407_v9 }
 0x3ac   :  { %v2739_v8 = vpop.eup %2738  ;;  %v1292_v15 = vadd.f32 1.0, %v2737_v61 }
 0x3ad   :  { %v3457_v34 = vadd.f32 %v1299_v43, %v1297_v7  ;;  %v1300_v11 = vmul.f32 %v2739_v8, %v2731_v30  ;;  %v2741_v13 = vpop.eup %2740 }
 0x3ae   :  { %v1298_v18 = vmul.f32 %v2741_v13, %v3411_v20  ;;  %v2743_v14 = vpop.eup %2742 }
 0x3af   :  { %2744 = vtanh.f32 %v3457_v34 }
 0x3b0   :  { %v3461_v21 = vadd.f32 %v1300_v11, %v1298_v18  ;;  %2746 = vrcp.f32 %v1292_v15 }
 0x3b2   :  { %2748 = vtanh.f32 %v3461_v21 }
 0x3b9   :  { %v2745_v52 = vpop.eup %2744 }
 0x3ba   :  { %v2747_v9 = vpop.eup %2746  ;;  %v1305_v19 = vmul.f32 %v2745_v52, %v2743_v14 }
 0x3bc   :  { %v2749_v22 = vpop.eup %2748 }
 0x3bd   :  { %v1306_v24 = vmul.f32 %v2749_v22, %v2747_v9 }
 0x3bf   :  { %v1316_v25 = vpack.c.bf16 %v1306_v24, %v1305_v19 }
 0x3c1   :  { %1350 = vmatmul.mubr.bf16.vlgmr.msra.gmra.mrb[12].mxu0 %v1316_v25  ;;  %1393 = vmatmul.mubr.bf16.vlgmr.msra.gmra.mrb[12].mxu1 %v1316_v25 }
 0x3c2   :  { %1470 = vmatpush1.bf16.msra.mxu0 %v3189_v36  ;;  %1513 = vmatpush1.bf16.msra.mxu1 %v3195_v38  ;;  %v3496_v36 = vld [vmem:[#allocation10 + $0x4] ss:$16 sps:$4 sm:$0xff]  }
 0x3c3   :  { %1471 = vmatprep.subr.bf16.mxu0 %v3192_v37  ;;  %1514 = vmatprep.subr.bf16.mxu1 %v3197_v39  ;;  %v3499_v37 = vld [vmem:[#allocation10 + $0xc] ss:$16 sps:$4 sm:$0xff]  }
 0x3c4   :  { %1501 = vmatprep.mubr.bf16.mxu0 %v3074_v0  ;;  %1544 = vmatprep.mubr.bf16.mxu1 %v3074_v0 }
 0x3c6   :  { %1472 = vmatpush1.bf16.msra.mxu0 %v3201_v40  ;;  %1515 = vmatpush1.bf16.msra.mxu1 %v3208_v42 }
 0x3c7   :  { %1473 = vmatprep.subr.bf16.mxu0 %v3205_v41  ;;  %1516 = vmatprep.subr.bf16.mxu1 %v3217_v46 }
 0x3ca   :  { %1474 = vmatpush1.bf16.msra.mxu0 %v3212_v44  ;;  %1517 = vmatpush1.bf16.msra.mxu1 %v3220_v47 }
 0x3cb   :  { %1475 = vmatprep.subr.bf16.mxu0 %v3214_v45  ;;  %1518 = vmatprep.subr.bf16.mxu1 %v3222_v48 }
 0x3ce   :  { %1476 = vmatpush1.bf16.msra.mxu0 %v3227_v49  ;;  %1519 = vmatpush1.bf16.msra.mxu1 %v3234_v51 }
 0x3cf   :  { %1477 = vmatprep.subr.bf16.mxu0 %v3230_v50  ;;  %1520 = vmatprep.subr.bf16.mxu1 %v3240_v54 }
 0x3d2   :  { %1478 = vmatpush1.bf16.msra.mxu0 %v3237_v53  ;;  %1521 = vmatpush1.bf16.msra.mxu1 %v3246_v56 }
 0x3d3   :  { %1479 = vmatprep.subr.bf16.mxu0 %v3243_v55  ;;  %1522 = vmatprep.subr.bf16.mxu1 %v3248_v57 }
 0x3d6   :  { %1480 = vmatpush1.bf16.msra.mxu0 %v3250_v58  ;;  %1523 = vmatpush1.bf16.msra.mxu1 %v3256_v60 }
 0x3d7   :  { %1481 = vmatprep.subr.bf16.mxu0 %v3254_v59  ;;  %1524 = vmatprep.subr.bf16.mxu1 %v3266_v63 }
 0x3da   :  { %1482 = vmatpush1.bf16.msra.mxu0 %v3264_v62  ;;  %1525 = vmatpush1.bf16.msra.mxu1 %v3272_v2 }
 0x3db   :  { %1483 = vmatprep.subr.bf16.mxu0 %v3270_v1  ;;  %1526 = vmatprep.subr.bf16.mxu1 %v3274_v3 }
 0x3de   :  { %1484 = vmatpush1.bf16.msra.mxu0 %v3280_v4  ;;  %1527 = vmatpush1.bf16.msra.mxu1 %v3284_v5 }
 0x3df   :  { %1621 = vmatprep.subr.bf16.mxu0 %v3496_v36  ;;  %1664 = vmatprep.subr.bf16.mxu1 %v3499_v37 }
 0x494   :  { %v1351_v38 = vpop.f32.mrb[12].mxu0  ;;  %v1394_v39 = vpop.f32.mrb[12].mxu1 }
 0x495   :  { %v2411_v40 = vadd.f32 %v1351_v38, %v3340_v16  ;;  %v1353_v41 = vpop.f32.mrb[13].mxu0  ;;  %v1396_v42 = vpop.f32.mrb[13].mxu1  ;;  %v2443_v57 = vadd.f32 %v1394_v39, %v3352_v6 }
 0x496   :  { %v2412_v44 = vadd.f32 %v1353_v41, %v3342_v17  ;;  %v1355_v45 = vpop.f32.mrb[14].mxu0  ;;  %v1398_v46 = vpop.f32.mrb[14].mxu1  ;;  %v2444_v56 = vadd.f32 %v1396_v42, %v3349_v35 }
 0x497   :  { %v2331_v47 = vmul.f32 -1.442695, %v2411_v40  ;;  %v2413_v48 = vadd.f32 %v1355_v45, %v3340_v16  ;;  %v1357_v49 = vpop.f32.mrb[15].mxu0  ;;  %v1400_v50 = vpop.f32.mrb[15].mxu1  ;;  %v2445_v60 = vadd.f32 %v1398_v46, %v3352_v6  ;;  %v3524_v45 = vld [vmem:[#allocation10 + $0x24] ss:$16 sps:$4 sm:$0xff]  }
 0x498   :  { %v2333_v51 = vmul.f32 -1.442695, %v2412_v44  ;;  %v2414_v53 = vadd.f32 %v1357_v49, %v3342_v17  ;;  %v2335_v58 = vmul.f32 -1.442695, %v2444_v56  ;;  %v2446_v59 = vadd.f32 %v1400_v50, %v3349_v35  ;;  %v3518_v44 = vld [vmem:[#allocation10] ss:$16 sps:$4 sm:$0xff]  }
 0x499   :  { %2750 = vpow2.f32 %v2331_v47  ;;  %v2332_v54 = vmul.f32 -1.442695, %v2413_v48  ;;  %v3527_v46 = vld [vmem:[#allocation10 + $0x2c] ss:$16 sps:$4 sm:$0xff]   ;;  %v3532_v47 = vld [vmem:[#allocation10 + $0x20] ss:$16 sps:$4 sm:$0xff]  }
 0x49a   :  { %2752 = vpow2.f32 %v2333_v51  ;;  %v2334_v55 = vmul.f32 -1.442695, %v2414_v53  ;;  %v2336_v27 = vmul.f32 -1.442695, %v2446_v59  ;;  %v3535_v48 = vld [vmem:[#allocation10 + $0x28] ss:$16 sps:$4 sm:$0xff]  }
 0x49b   :  { %2754 = vpow2.f32 %v2332_v54  ;;  %v3538_v49 = vld [vmem:[#allocation10 + $0x44] ss:$16 sps:$4 sm:$0xff]   ;;  %v3541_v50 = vld [vmem:[#allocation10 + $0x4c] ss:$16 sps:$4 sm:$0xff]   ;;  %v3544_v51 = vld [vmem:[#allocation10 + $0x40] ss:$16 sps:$4 sm:$0xff]  }
 0x49c   :  { %2756 = vpow2.f32 %v2334_v55  ;;  %v3547_v53 = vld [vmem:[#allocation10 + $0x48] ss:$16 sps:$4 sm:$0xff]   ;;  %v3550_v54 = vld [vmem:[#allocation10 + $0x64] ss:$16 sps:$4 sm:$0xff]   ;;  %v3553_v55 = vld [vmem:[#allocation10 + $0x6c] ss:$16 sps:$4 sm:$0xff]  }
 0x49d   :  { %2758 = vtanh.f32 %v2443_v57  ;;  %v3556_v56 = vld [vmem:[#allocation10 + $0x60] ss:$16 sps:$4 sm:$0xff]   ;;  %v3559_v57 = vld [vmem:[#allocation10 + $0x68] ss:$16 sps:$4 sm:$0xff]   ;;  %v3565_v59 = vld [vmem:[#allocation10 + $0x8c] ss:$16 sps:$4 sm:$0xff]  }
 0x49e   :  { %2760 = vpow2.f32 %v2335_v58  ;;  %v3562_v58 = vld [vmem:[#allocation10 + $0x84] ss:$16 sps:$4 sm:$0xff]  }
 0x49f   :  { %2762 = vtanh.f32 %v2445_v60  ;;  %v3568_v60 = vld [vmem:[#allocation10 + $0x80] ss:$16 sps:$4 sm:$0xff]  }
 0x4a3   :  { %v2751_v20 = vpop.eup %2750 }
 0x4a4   :  { %v2753_v10 = vpop.eup %2752  ;;  %v1417_v23 = vadd.f32 1.0, %v2751_v20  ;;  %v3571_v20 = vld [vmem:[#allocation10 + $0x88] ss:$16 sps:$4 sm:$0xff]  }
 0x4a5   :  { %v1429_v26 = vadd.f32 1.0, %v2753_v10  ;;  %v2755_v29 = vpop.eup %2754  ;;  %v3574_v10 = vld [vmem:[#allocation10 + $0xa4] ss:$16 sps:$4 sm:$0xff]  }
 0x4a6   :  { %2764 = vrcp.f32 %v1417_v23  ;;  %v1418_v28 = vadd.f32 1.0, %v2755_v29  ;;  %v2757_v30 = vpop.eup %2756  ;;  %v3577_v23 = vld [vmem:[#allocation10 + $0xac] ss:$16 sps:$4 sm:$0xff]   ;;  %v3586_v29 = vld [vmem:[#allocation10 + $0xc4] ss:$16 sps:$4 sm:$0xff]  }
 0x4a7   :  { %2766 = vrcp.f32 %v1429_v26  ;;  %v1430_v31 = vadd.f32 1.0, %v2757_v30  ;;  %v2759_v32 = vpop.eup %2758  ;;  %v3583_v26 = vld [vmem:[#allocation10 + $0xa8] ss:$16 sps:$4 sm:$0xff]  }
 0x4a8   :  { %2768 = vpow2.f32 %v2336_v27  ;;  %v2761_v43 = vpop.eup %2760  ;;  %v3580_v27 = vld [vmem:[#allocation10 + $0xa0] ss:$16 sps:$4 sm:$0xff]  }
 0x4a9   :  { %2770 = vrcp.f32 %v1418_v28  ;;  %v2763_v61 = vpop.eup %2762  ;;  %v1443_v18 = vadd.f32 1.0, %v2761_v43 }
 0x4aa   :  { %2772 = vrcp.f32 %v1430_v31 }
 0x4ab   :  { %2774 = vrcp.f32 %v1443_v18 }
 0x4b0   :  { %v2765_v7 = vpop.eup %2764 }
 0x4b1   :  { %v2767_v8 = vpop.eup %2766  ;;  %v1451_v33 = vmul.f32 %v2765_v7, %v2759_v32 }
 0x4b2   :  { %v2769_v11 = vpop.eup %2768  ;;  %v1449_v13 = vmul.f32 %v2767_v8, %v3457_v34 }
 0x4b3   :  { %v2771_v15 = vpop.eup %2770  ;;  %v1444_v22 = vadd.f32 1.0, %v2769_v11 }
 0x4b4   :  { %v3511_v14 = vadd.f32 %v1451_v33, %v1449_v13  ;;  %v1452_v52 = vmul.f32 %v2771_v15, %v2763_v61  ;;  %v2773_v9 = vpop.eup %2772 }
 0x4b5   :  { %v1450_v19 = vmul.f32 %v2773_v9, %v3461_v21  ;;  %v2775_v25 = vpop.eup %2774  ;;  %v3521_v21 = vld [vmem:[#allocation10 + $0x8] ss:$16 sps:$4 sm:$0xff]  }
 0x4b6   :  { %2776 = vtanh.f32 %v3511_v14 }
 0x4b7   :  { %v3515_v24 = vadd.f32 %v1452_v52, %v1450_v19  ;;  %2778 = vrcp.f32 %v1444_v22 }
 0x4b9   :  { %2780 = vtanh.f32 %v3515_v24 }
 0x4c0   :  { %v2777_v38 = vpop.eup %2776 }
 0x4c1   :  { %v2779_v34 = vpop.eup %2778  ;;  %v1457_v40 = vmul.f32 %v2777_v38, %v2775_v25 }
 0x4c3   :  { %v2781_v39 = vpop.eup %2780 }
 0x4c4   :  { %v1458_v41 = vmul.f32 %v2781_v39, %v2779_v34 }
 0x4c6   :  { %v1468_v42 = vpack.c.bf16 %v1458_v41, %v1457_v40 }
 0x4c8   :  { %1502 = vmatmul.mubr.bf16.vlgmr.msra.gmra.mrb[16].mxu0 %v1468_v42  ;;  %1545 = vmatmul.mubr.bf16.vlgmr.msra.gmra.mrb[16].mxu1 %v1468_v42 }
 0x4c9   :  { %1622 = vmatpush1.bf16.msra.mxu0 %v3518_v44  ;;  %1665 = vmatpush1.bf16.msra.mxu1 %v3521_v21 }
 0x4ca   :  { %1623 = vmatprep.subr.bf16.mxu0 %v3524_v45  ;;  %1666 = vmatprep.subr.bf16.mxu1 %v3527_v46 }
 0x4cb   :  { %1653 = vmatprep.mubr.bf16.mxu0 %v3074_v0  ;;  %1696 = vmatprep.mubr.bf16.mxu1 %v3074_v0 }
 0x4cd   :  { %1624 = vmatpush1.bf16.msra.mxu0 %v3532_v47  ;;  %1667 = vmatpush1.bf16.msra.mxu1 %v3535_v48 }
 0x4ce   :  { %1625 = vmatprep.subr.bf16.mxu0 %v3538_v49  ;;  %1668 = vmatprep.subr.bf16.mxu1 %v3541_v50 }
 0x4d1   :  { %1626 = vmatpush1.bf16.msra.mxu0 %v3544_v51  ;;  %1669 = vmatpush1.bf16.msra.mxu1 %v3547_v53 }
 0x4d2   :  { %1627 = vmatprep.subr.bf16.mxu0 %v3550_v54  ;;  %1670 = vmatprep.subr.bf16.mxu1 %v3553_v55 }
 0x4d5   :  { %1628 = vmatpush1.bf16.msra.mxu0 %v3556_v56  ;;  %1671 = vmatpush1.bf16.msra.mxu1 %v3559_v57 }
 0x4d6   :  { %1629 = vmatprep.subr.bf16.mxu0 %v3562_v58  ;;  %1672 = vmatprep.subr.bf16.mxu1 %v3565_v59 }
 0x4d9   :  { %1630 = vmatpush1.bf16.msra.mxu0 %v3568_v60  ;;  %1673 = vmatpush1.bf16.msra.mxu1 %v3571_v20 }
 0x4da   :  { %1631 = vmatprep.subr.bf16.mxu0 %v3574_v10  ;;  %1674 = vmatprep.subr.bf16.mxu1 %v3577_v23 }
 0x4dd   :  { %1632 = vmatpush1.bf16.msra.mxu0 %v3580_v27  ;;  %1675 = vmatpush1.bf16.msra.mxu1 %v3583_v26 }
 0x4de   :  { %1633 = vmatprep.subr.bf16.mxu0 %v3586_v29  ;;  %1676 = vmatprep.subr.bf16.mxu1 %v3266_v63 }
 0x4e1   :  { %1634 = vmatpush1.bf16.msra.mxu0 %v3264_v62  ;;  %1677 = vmatpush1.bf16.msra.mxu1 %v3272_v2 }
 0x4e2   :  { %1635 = vmatprep.subr.bf16.mxu0 %v3270_v1  ;;  %1678 = vmatprep.subr.bf16.mxu1 %v3274_v3 }
 0x4e5   :  { %1636 = vmatpush1.bf16.msra.mxu0 %v3280_v4  ;;  %1679 = vmatpush1.bf16.msra.mxu1 %v3284_v5 }
 0x4e6   :  { %1773 = vmatprep.subr.bf16.mxu0 %v3496_v36  ;;  %1816 = vmatprep.subr.bf16.mxu1 %v3499_v37 }
 0x59b   :  { %v1503_v28 = vpop.f32.mrb[16].mxu0  ;;  %v1546_v30 = vpop.f32.mrb[16].mxu1 }
 0x59c   :  { %v2415_v63 = vadd.f32 %v1503_v28, %v3340_v16  ;;  %v1505_v31 = vpop.f32.mrb[17].mxu0  ;;  %v1548_v62 = vpop.f32.mrb[17].mxu1  ;;  %v2447_v13 = vadd.f32 %v1546_v30, %v3352_v6 }
 0x59d   :  { %v2416_v2 = vadd.f32 %v1505_v31, %v3342_v17  ;;  %v1507_v32 = vpop.f32.mrb[18].mxu0  ;;  %v1550_v1 = vpop.f32.mrb[18].mxu1  ;;  %v2448_v11 = vadd.f32 %v1548_v62, %v3349_v35 }
 0x59e   :  { %v2337_v43 = vmul.f32 -1.442695, %v2415_v63  ;;  %v2417_v3 = vadd.f32 %v1507_v32, %v3340_v16  ;;  %v1509_v4 = vpop.f32.mrb[19].mxu0  ;;  %v1552_v61 = vpop.f32.mrb[19].mxu1  ;;  %v2449_v52 = vadd.f32 %v1550_v1, %v3352_v6 }
 0x59f   :  { %v2339_v5 = vmul.f32 -1.442695, %v2416_v2  ;;  %v2418_v7 = vadd.f32 %v1509_v4, %v3342_v17  ;;  %v2341_v15 = vmul.f32 -1.442695, %v2448_v11  ;;  %v2450_v18 = vadd.f32 %v1552_v61, %v3349_v35 }
 0x5a0   :  { %2782 = vpow2.f32 %v2337_v43  ;;  %v2338_v8 = vmul.f32 -1.442695, %v2417_v3 }
 0x5a1   :  { %2784 = vpow2.f32 %v2339_v5  ;;  %v2340_v33 = vmul.f32 -1.442695, %v2418_v7  ;;  %v2342_v25 = vmul.f32 -1.442695, %v2450_v18 }
 0x5a2   :  { %2786 = vpow2.f32 %v2338_v8 }
 0x5a3   :  { %2788 = vpow2.f32 %v2340_v33 }
 0x5a4   :  { %2790 = vtanh.f32 %v2447_v13 }
 0x5a5   :  { %2792 = vpow2.f32 %v2341_v15 }
 0x5a6   :  { %2794 = vtanh.f32 %v2449_v52 }
 0x5aa   :  { %v2783_v9 = vpop.eup %2782 }
 0x5ab   :  { %v2785_v22 = vpop.eup %2784  ;;  %v1569_v19 = vadd.f32 1.0, %v2783_v9  ;;  %v3642_v9 = vld [vmem:[#allocation10 + $0xc0] ss:$16 sps:$4 sm:$0xff]  }
 0x5ac   :  { %v1581_v38 = vadd.f32 1.0, %v2785_v22  ;;  %v2787_v34 = vpop.eup %2786  ;;  %v3645_v22 = vld [vmem:[#allocation10 + $0xc8] ss:$16 sps:$4 sm:$0xff]  }
 0x5ad   :  { %2796 = vrcp.f32 %v1569_v19  ;;  %v1570_v39 = vadd.f32 1.0, %v2787_v34  ;;  %v2789_v40 = vpop.eup %2788  ;;  %v3648_v19 = vld [vmem:[#allocation10 + $0xe4] ss:$16 sps:$4 sm:$0xff]   ;;  %v3657_v34 = vld [vmem:[#allocation10 + $0xe8] ss:$16 sps:$4 sm:$0xff]  }
 0x5ae   :  { %2798 = vrcp.f32 %v1581_v38  ;;  %v1582_v41 = vadd.f32 1.0, %v2789_v40  ;;  %v2791_v42 = vpop.eup %2790  ;;  %v3654_v38 = vld [vmem:[#allocation10 + $0xe0] ss:$16 sps:$4 sm:$0xff]  }
 0x5af   :  { %2800 = vpow2.f32 %v2342_v25  ;;  %v2793_v28 = vpop.eup %2792  ;;  %v3651_v25 = vld [vmem:[#allocation10 + $0xec] ss:$16 sps:$4 sm:$0xff]  }
 0x5b0   :  { %2802 = vrcp.f32 %v1570_v39  ;;  %v2795_v30 = vpop.eup %2794  ;;  %v1595_v43 = vadd.f32 1.0, %v2793_v28 }
 0x5b1   :  { %2804 = vrcp.f32 %v1582_v41 }
 0x5b2   :  { %2806 = vrcp.f32 %v1595_v43 }
 0x5b7   :  { %v2797_v63 = vpop.eup %2796 }
 0x5b8   :  { %v2799_v31 = vpop.eup %2798  ;;  %v1603_v62 = vmul.f32 %v2797_v63, %v2791_v42 }
 0x5b9   :  { %v2801_v2 = vpop.eup %2800  ;;  %v1601_v32 = vmul.f32 %v2799_v31, %v3511_v14 }
 0x5ba   :  { %v2803_v1 = vpop.eup %2802  ;;  %v1596_v5 = vadd.f32 1.0, %v2801_v2 }
 0x5bb   :  { %v3607_v3 = vadd.f32 %v1603_v62, %v1601_v32  ;;  %v1604_v4 = vmul.f32 %v2803_v1, %v2795_v30  ;;  %v2805_v61 = vpop.eup %2804 }
 0x5bc   :  { %v1602_v7 = vmul.f32 %v2805_v61, %v3515_v24  ;;  %v2807_v33 = vpop.eup %2806  ;;  %v3639_v24 = vld [vmem:[#allocation10 + $0xcc] ss:$16 sps:$4 sm:$0xff]  }
 0x5bd   :  { %2808 = vtanh.f32 %v3607_v3 }
 0x5be   :  { %v3611_v8 = vadd.f32 %v1604_v4, %v1602_v7  ;;  %2810 = vrcp.f32 %v1596_v5 }
 0x5c0   :  { %2812 = vtanh.f32 %v3611_v8 }
 0x5c7   :  { %v2809_v11 = vpop.eup %2808 }
 0x5c8   :  { %v2811_v14 = vpop.eup %2810  ;;  %v1609_v15 = vmul.f32 %v2809_v11, %v2807_v33 }
 0x5ca   :  { %v2813_v13 = vpop.eup %2812 }
 0x5cb   :  { %v1610_v18 = vmul.f32 %v2813_v13, %v2811_v14 }
 0x5cd   :  { %v1620_v52 = vpack.c.bf16 %v1610_v18, %v1609_v15 }
 0x5cf   :  { %1654 = vmatmul.mubr.bf16.vlgmr.msra.gmra.mrb[20].mxu0 %v1620_v52  ;;  %1697 = vmatmul.mubr.bf16.vlgmr.msra.gmra.mrb[20].mxu1 %v1620_v52 }
 0x5d0   :  { %1774 = vmatpush1.bf16.msra.mxu0 %v3518_v44  ;;  %1817 = vmatpush1.bf16.msra.mxu1 %v3521_v21 }
 0x5d1   :  { %1775 = vmatprep.subr.bf16.mxu0 %v3524_v45  ;;  %1818 = vmatprep.subr.bf16.mxu1 %v3527_v46 }
 0x5d2   :  { %1805 = vmatprep.mubr.bf16.mxu0 %v3074_v0  ;;  %1848 = vmatprep.mubr.bf16.mxu1 %v3074_v0 }
 0x5d4   :  { %1776 = vmatpush1.bf16.msra.mxu0 %v3532_v47  ;;  %1819 = vmatpush1.bf16.msra.mxu1 %v3535_v48 }
 0x5d5   :  { %1777 = vmatprep.subr.bf16.mxu0 %v3538_v49  ;;  %1820 = vmatprep.subr.bf16.mxu1 %v3541_v50 }
 0x5d8   :  { %1778 = vmatpush1.bf16.msra.mxu0 %v3544_v51  ;;  %1821 = vmatpush1.bf16.msra.mxu1 %v3547_v53 }
 0x5d9   :  { %1779 = vmatprep.subr.bf16.mxu0 %v3550_v54  ;;  %1822 = vmatprep.subr.bf16.mxu1 %v3553_v55 }
 0x5dc   :  { %1780 = vmatpush1.bf16.msra.mxu0 %v3556_v56  ;;  %1823 = vmatpush1.bf16.msra.mxu1 %v3559_v57 }
 0x5dd   :  { %1781 = vmatprep.subr.bf16.mxu0 %v3562_v58  ;;  %1824 = vmatprep.subr.bf16.mxu1 %v3565_v59 }
 0x5e0   :  { %1782 = vmatpush1.bf16.msra.mxu0 %v3568_v60  ;;  %1825 = vmatpush1.bf16.msra.mxu1 %v3571_v20 }
 0x5e1   :  { %1783 = vmatprep.subr.bf16.mxu0 %v3574_v10  ;;  %1826 = vmatprep.subr.bf16.mxu1 %v3577_v23 }
 0x5e4   :  { %1784 = vmatpush1.bf16.msra.mxu0 %v3580_v27  ;;  %1827 = vmatpush1.bf16.msra.mxu1 %v3583_v26 }
 0x5e5   :  { %1785 = vmatprep.subr.bf16.mxu0 %v3586_v29  ;;  %1828 = vmatprep.subr.bf16.mxu1 %v3639_v24 }
 0x5e8   :  { %1786 = vmatpush1.bf16.msra.mxu0 %v3642_v9  ;;  %1829 = vmatpush1.bf16.msra.mxu1 %v3645_v22 }
 0x5e9   :  { %1787 = vmatprep.subr.bf16.mxu0 %v3648_v19  ;;  %1830 = vmatprep.subr.bf16.mxu1 %v3651_v25 }
 0x5ec   :  { %1788 = vmatpush1.bf16.msra.mxu0 %v3654_v38  ;;  %1831 = vmatpush1.bf16.msra.mxu1 %v3657_v34 }
 0x5ed   :  { %1925 = vmatprep.subr.bf16.mxu0 %v3496_v36  ;;  %1968 = vmatprep.subr.bf16.mxu1 %v3499_v37 }
 0x6a2   :  { %v1655_v39 = vpop.f32.mrb[20].mxu0  ;;  %v1698_v40 = vpop.f32.mrb[20].mxu1 }
 0x6a3   :  { %v2419_v41 = vadd.f32 %v1655_v39, %v3340_v16  ;;  %v1657_v42 = vpop.f32.mrb[21].mxu0  ;;  %v1700_v28 = vpop.f32.mrb[21].mxu1  ;;  %v2451_v5 = vadd.f32 %v1698_v40, %v3352_v6 }
 0x6a4   :  { %v2420_v30 = vadd.f32 %v1657_v42, %v3342_v17  ;;  %v1659_v63 = vpop.f32.mrb[22].mxu0  ;;  %v1702_v31 = vpop.f32.mrb[22].mxu1  ;;  %v2452_v61 = vadd.f32 %v1700_v28, %v3349_v35 }
 0x6a5   :  { %v2343_v62 = vmul.f32 -1.442695, %v2419_v41  ;;  %v2421_v2 = vadd.f32 %v1659_v63, %v3340_v16  ;;  %v1661_v32 = vpop.f32.mrb[23].mxu0  ;;  %v1704_v1 = vpop.f32.mrb[23].mxu1  ;;  %v2453_v11 = vadd.f32 %v1702_v31, %v3352_v6 }
 0x6a6   :  { %v2345_v43 = vmul.f32 -1.442695, %v2420_v30  ;;  %v2422_v36 = vadd.f32 %v1661_v32, %v3342_v17  ;;  %v2347_v7 = vmul.f32 -1.442695, %v2452_v61  ;;  %v2454_v33 = vadd.f32 %v1704_v1, %v3349_v35 }
 0x6a7   :  { %2814 = vpow2.f32 %v2343_v62  ;;  %v2344_v37 = vmul.f32 -1.442695, %v2421_v2 }
 0x6a8   :  { %2816 = vpow2.f32 %v2345_v43  ;;  %v2346_v4 = vmul.f32 -1.442695, %v2422_v36  ;;  %v2348_v18 = vmul.f32 -1.442695, %v2454_v33 }
 0x6a9   :  { %2818 = vpow2.f32 %v2344_v37 }
 0x6aa   :  { %2820 = vpow2.f32 %v2346_v4 }
 0x6ab   :  { %2822 = vtanh.f32 %v2451_v5 }
 0x6ac   :  { %2824 = vpow2.f32 %v2347_v7 }
 0x6ad   :  { %2826 = vtanh.f32 %v2453_v11 }
 0x6b1   :  { %v2815_v14 = vpop.eup %2814 }
 0x6b2   :  { %v2817_v13 = vpop.eup %2816  ;;  %v1721_v15 = vadd.f32 1.0, %v2815_v14 }
 0x6b3   :  { %v1733_v52 = vadd.f32 1.0, %v2817_v13  ;;  %v2819_v39 = vpop.eup %2818 }
 0x6b4   :  { %2828 = vrcp.f32 %v1721_v15  ;;  %v1722_v41 = vadd.f32 1.0, %v2819_v39  ;;  %v2821_v42 = vpop.eup %2820 }
 0x6b5   :  { %2830 = vrcp.f32 %v1733_v52  ;;  %v1734_v40 = vadd.f32 1.0, %v2821_v42  ;;  %v2823_v28 = vpop.eup %2822 }
 0x6b6   :  { %2832 = vpow2.f32 %v2348_v18  ;;  %v2825_v30 = vpop.eup %2824 }
 0x6b7   :  { %2834 = vrcp.f32 %v1722_v41  ;;  %v2827_v63 = vpop.eup %2826  ;;  %v1747_v36 = vadd.f32 1.0, %v2825_v30 }
 0x6b8   :  { %2836 = vrcp.f32 %v1734_v40 }
 0x6b9   :  { %2838 = vrcp.f32 %v1747_v36 }
 0x6be   :  { %v2829_v31 = vpop.eup %2828 }
 0x6bf   :  { %v2831_v62 = vpop.eup %2830  ;;  %v1755_v2 = vmul.f32 %v2829_v31, %v2823_v28 }
 0x6c0   :  { %v2833_v32 = vpop.eup %2832  ;;  %v1753_v1 = vmul.f32 %v2831_v62, %v3607_v3 }
 0x6c1   :  { %v2835_v43 = vpop.eup %2834  ;;  %v1748_v5 = vadd.f32 1.0, %v2833_v32 }
 0x6c2   :  { %v3671_v37 = vadd.f32 %v1755_v2, %v1753_v1  ;;  %v1756_v4 = vmul.f32 %v2835_v43, %v2827_v63  ;;  %v2837_v61 = vpop.eup %2836 }
 0x6c3   :  { %v1754_v7 = vmul.f32 %v2837_v61, %v3611_v8  ;;  %v2839_v11 = vpop.eup %2838 }
 0x6c4   :  { %2840 = vtanh.f32 %v3671_v37 }
 0x6c5   :  { %v3675_v33 = vadd.f32 %v1756_v4, %v1754_v7  ;;  %2842 = vrcp.f32 %v1748_v5 }
 0x6c7   :  { %2844 = vtanh.f32 %v3675_v33 }
 0x6ce   :  { %v2841_v14 = vpop.eup %2840 }
 0x6cf   :  { %v2843_v3 = vpop.eup %2842  ;;  %v1761_v15 = vmul.f32 %v2841_v14, %v2839_v11 }
 0x6d1   :  { %v2845_v13 = vpop.eup %2844 }
 0x6d2   :  { %v1762_v18 = vmul.f32 %v2845_v13, %v2843_v3  ;;  %v2646_v3 = vld [vmem:[#allocation11] sm:$0xff]   ;;  %v3076_v13 = vmov 0.0  }
 0x6d4   :  { %v1772_v52 = vpack.c.bf16 %v1762_v18, %v1761_v15  ;;  %v2648_v15 = vld [vmem:[#allocation11 + $0x10] sm:$0xff]   ;;  %v2649_v18 = vld [vmem:[#allocation11 + $0x18] sm:$0xff]  }
 0x6d6   :  { %1806 = vmatmul.mubr.bf16.vlgmr.msra.gmra.mrb[24].mxu0 %v1772_v52  ;;  %1849 = vmatmul.mubr.bf16.vlgmr.msra.gmra.mrb[24].mxu1 %v1772_v52  ;;  %v2650_v52 = vld [vmem:[#allocation11 + $0x20] sm:$0xff]  }
 0x6d7   :  { %1926 = vmatpush1.bf16.msra.mxu0 %v3518_v44  ;;  %1969 = vmatpush1.bf16.msra.mxu1 %v3521_v21 }
 0x6d8   :  { %1927 = vmatprep.subr.bf16.mxu0 %v3524_v45  ;;  %1970 = vmatprep.subr.bf16.mxu1 %v3527_v46 }
 0x6d9   :  { %1957 = vmatprep.mubr.bf16.mxu0 %v3074_v0  ;;  %2000 = vmatprep.mubr.bf16.mxu1 %v3074_v0 }
 0x6db   :  { %1928 = vmatpush1.bf16.msra.mxu0 %v3532_v47  ;;  %1971 = vmatpush1.bf16.msra.mxu1 %v3535_v48 }
 0x6dc   :  { %1929 = vmatprep.subr.bf16.mxu0 %v3538_v49  ;;  %1972 = vmatprep.subr.bf16.mxu1 %v3541_v50 }
 0x6df   :  { %1930 = vmatpush1.bf16.msra.mxu0 %v3544_v51  ;;  %1973 = vmatpush1.bf16.msra.mxu1 %v3547_v53 }
 0x6e0   :  { %1931 = vmatprep.subr.bf16.mxu0 %v3550_v54  ;;  %1974 = vmatprep.subr.bf16.mxu1 %v3553_v55 }
 0x6e3   :  { %1932 = vmatpush1.bf16.msra.mxu0 %v3556_v56  ;;  %1975 = vmatpush1.bf16.msra.mxu1 %v3559_v57 }
 0x6e4   :  { %1933 = vmatprep.subr.bf16.mxu0 %v3562_v58  ;;  %1976 = vmatprep.subr.bf16.mxu1 %v3565_v59 }
 0x6e7   :  { %1934 = vmatpush1.bf16.msra.mxu0 %v3568_v60  ;;  %1977 = vmatpush1.bf16.msra.mxu1 %v3571_v20 }
 0x6e8   :  { %1935 = vmatprep.subr.bf16.mxu0 %v3574_v10  ;;  %1978 = vmatprep.subr.bf16.mxu1 %v3577_v23 }
 0x6eb   :  { %1936 = vmatpush1.bf16.msra.mxu0 %v3580_v27  ;;  %1979 = vmatpush1.bf16.msra.mxu1 %v3583_v26 }
 0x6ec   :  { %1937 = vmatprep.subr.bf16.mxu0 %v3586_v29  ;;  %1980 = vmatprep.subr.bf16.mxu1 %v3639_v24 }
 0x6ef   :  { %1938 = vmatpush1.bf16.msra.mxu0 %v3642_v9  ;;  %1981 = vmatpush1.bf16.msra.mxu1 %v3645_v22 }
 0x6f0   :  { %1939 = vmatprep.subr.bf16.mxu0 %v3648_v19  ;;  %1982 = vmatprep.subr.bf16.mxu1 %v3651_v25 }
 0x6f3   :  { %1940 = vmatpush1.bf16.msra.mxu0 %v3654_v38  ;;  %1983 = vmatpush1.bf16.msra.mxu1 %v3657_v34 }
 0x6f4   :  { %2379 = vmatprep.subr.bf16.mxu0 %v3076_v13 }
 0x7a9   :  { %v1807_v0 = vpop.f32.mrb[24].mxu0  ;;  %v1850_v44 = vpop.f32.mrb[24].mxu1 }
 0x7aa   :  { %v2423_v21 = vadd.f32 %v1807_v0, %v3340_v16  ;;  %v1809_v45 = vpop.f32.mrb[25].mxu0  ;;  %v1852_v46 = vpop.f32.mrb[25].mxu1  ;;  %v2455_v60 = vadd.f32 %v1850_v44, %v3352_v6  ;;  %v2651_v0 = vld [vmem:[#allocation11 + $0x28] sm:$0xff]   ;;  %v2652_v44 = vld [vmem:[#allocation11 + $0x30] sm:$0xff]  }
 0x7ab   :  { %v2424_v47 = vadd.f32 %v1809_v45, %v3342_v17  ;;  %v1811_v48 = vpop.f32.mrb[26].mxu0  ;;  %v1854_v49 = vpop.f32.mrb[26].mxu1  ;;  %v2456_v59 = vadd.f32 %v1852_v46, %v3349_v35 }
 0x7ac   :  { %v2349_v50 = vmul.f32 -1.442695, %v2423_v21  ;;  %v2425_v51 = vadd.f32 %v1811_v48, %v3340_v16  ;;  %v1813_v53 = vpop.f32.mrb[27].mxu0  ;;  %v1856_v54 = vpop.f32.mrb[27].mxu1  ;;  %v2457_v23 = vadd.f32 %v1854_v49, %v3352_v6  ;;  %v2653_v21 = vld [vmem:[#allocation11 + $0x38] sm:$0xff]  }
 0x7ad   :  { %v2351_v55 = vmul.f32 -1.442695, %v2424_v47  ;;  %v2426_v56 = vadd.f32 %v1813_v53, %v3342_v17  ;;  %v2353_v20 = vmul.f32 -1.442695, %v2456_v59  ;;  %v2458_v10 = vadd.f32 %v1856_v54, %v3349_v35 }
 0x7ae   :  { %2846 = vpow2.f32 %v2349_v50  ;;  %v2350_v57 = vmul.f32 -1.442695, %v2425_v51 }
 0x7af   :  { %2848 = vpow2.f32 %v2351_v55  ;;  %v2352_v58 = vmul.f32 -1.442695, %v2426_v56  ;;  %v2354_v8 = vmul.f32 -1.442695, %v2458_v10 }
 0x7b0   :  { %2850 = vpow2.f32 %v2350_v57 }
 0x7b1   :  { %2852 = vpow2.f32 %v2352_v58 }
 0x7b2   :  { %2854 = vtanh.f32 %v2455_v60 }
 0x7b3   :  { %2856 = vpow2.f32 %v2353_v20 }
 0x7b4   :  { %2858 = vtanh.f32 %v2457_v23 }
 0x7b8   :  { %v2847_v27 = vpop.eup %2846 }
 0x7b9   :  { %v2849_v26 = vpop.eup %2848  ;;  %v1873_v29 = vadd.f32 1.0, %v2847_v27 }
 0x7ba   :  { %v1885_v24 = vadd.f32 1.0, %v2849_v26  ;;  %v2851_v9 = vpop.eup %2850 }
 0x7bb   :  { %2860 = vrcp.f32 %v1873_v29  ;;  %v1874_v22 = vadd.f32 1.0, %v2851_v9  ;;  %v2853_v19 = vpop.eup %2852 }
 0x7bc   :  { %2862 = vrcp.f32 %v1885_v24  ;;  %v1886_v25 = vadd.f32 1.0, %v2853_v19  ;;  %v2855_v38 = vpop.eup %2854 }
 0x7bd   :  { %2864 = vpow2.f32 %v2354_v8  ;;  %v2857_v34 = vpop.eup %2856 }
 0x7be   :  { %2866 = vrcp.f32 %v1874_v22  ;;  %v2859_v39 = vpop.eup %2858  ;;  %v1899_v31 = vadd.f32 1.0, %v2857_v34 }
 0x7bf   :  { %2868 = vrcp.f32 %v1886_v25 }
 0x7c0   :  { %2870 = vrcp.f32 %v1899_v31 }
 0x7c5   :  { %v2861_v41 = vpop.eup %2860 }
 0x7c6   :  { %v2863_v42 = vpop.eup %2862  ;;  %v1907_v40 = vmul.f32 %v2861_v41, %v2855_v38 }
 0x7c7   :  { %v2865_v28 = vpop.eup %2864  ;;  %v1905_v30 = vmul.f32 %v2863_v42, %v3671_v37 }
 0x7c8   :  { %v2867_v63 = vpop.eup %2866  ;;  %v1900_v1 = vadd.f32 1.0, %v2865_v28 }
 0x7c9   :  { %v3719_v62 = vadd.f32 %v1907_v40, %v1905_v30  ;;  %v1908_v2 = vmul.f32 %v2867_v63, %v2859_v39  ;;  %v2869_v32 = vpop.eup %2868 }
 0x7ca   :  { %v1906_v43 = vmul.f32 %v2869_v32, %v3675_v33  ;;  %v2871_v4 = vpop.eup %2870  ;;  %v2647_v33 = vld [vmem:[#allocation11 + $0x8] sm:$0xff]  }
 0x7cb   :  { %2872 = vtanh.f32 %v3719_v62 }
 0x7cc   :  { %v3723_v36 = vadd.f32 %v1908_v2, %v1906_v43  ;;  %2874 = vrcp.f32 %v1900_v1 }
 0x7ce   :  { %2876 = vtanh.f32 %v3723_v36 }
 0x7d5   :  { %v2873_v61 = vpop.eup %2872 }
 0x7d6   :  { %v2875_v37 = vpop.eup %2874  ;;  %v1913_v7 = vmul.f32 %v2873_v61, %v2871_v4 }
 0x7d8   :  { %v2877_v5 = vpop.eup %2876 }
 0x7d9   :  { %v1914_v11 = vmul.f32 %v2877_v5, %v2875_v37 }
 0x7db   :  { %v1924_v14 = vpack.c.bf16 %v1914_v11, %v1913_v7 }
 0x7dd   :  { %1958 = vmatmul.mubr.bf16.vlgmr.msra.gmra.mrb[28].mxu0 %v1924_v14  ;;  %2001 = vmatmul.mubr.bf16.vlgmr.msra.gmra.mrb[28].mxu1 %v1924_v14 }
 0x7de   :  { %2380 = vmatpush3.bf16.msra.mxu0 %v2646_v3  ;;  %2395 = vmatprep.mubr.msk.bf16.mxu0 %vm3077_vm0, %v3076_v13 }
 0x7df   :  { %2381 = vmatprep.subr.bf16.mxu0 %v3076_v13 }
 0x7e2   :  { %2382 = vmatpush3.bf16.msra.mxu0 %v2647_v33 }
 0x7e3   :  { %2383 = vmatprep.subr.bf16.mxu0 %v3076_v13 }
 0x7e6   :  { %2384 = vmatpush3.bf16.msra.mxu0 %v2648_v15 }
 0x7e7   :  { %2385 = vmatprep.subr.bf16.mxu0 %v3076_v13 }
 0x7ea   :  { %2386 = vmatpush3.bf16.msra.mxu0 %v2649_v18 }
 0x7eb   :  { %2387 = vmatprep.subr.bf16.mxu0 %v3076_v13 }
 0x7ee   :  { %2388 = vmatpush3.bf16.msra.mxu0 %v2650_v52 }
 0x7ef   :  { %2389 = vmatprep.subr.bf16.mxu0 %v3076_v13 }
 0x7f2   :  { %2390 = vmatpush3.bf16.msra.mxu0 %v2651_v0 }
 0x7f3   :  { %2391 = vmatprep.subr.bf16.mxu0 %v3076_v13 }
 0x7f6   :  { %2392 = vmatpush3.bf16.msra.mxu0 %v2652_v44 }
 0x7f7   :  { %2393 = vmatprep.subr.bf16.mxu0 %v3076_v13 }
 0x7fa   :  { %2394 = vmatpush3.bf16.msra.mxu0 %v2653_v21 }
 0x8b0   :  { %v1959_v45 = vpop.f32.mrb[28].mxu0  ;;  %v2002_v46 = vpop.f32.mrb[28].mxu1 }
 0x8b1   :  { %v2427_v47 = vadd.f32 %v1959_v45, %v3340_v16  ;;  %v1961_v48 = vpop.f32.mrb[29].mxu0  ;;  %v2004_v49 = vpop.f32.mrb[29].mxu1  ;;  %v2459_v23 = vadd.f32 %v2002_v46, %v3352_v6 }
 0x8b2   :  { %v2428_v50 = vadd.f32 %v1961_v48, %v3342_v17  ;;  %v1963_v51 = vpop.f32.mrb[30].mxu0  ;;  %v2006_v53 = vpop.f32.mrb[30].mxu1  ;;  %v2460_v10 = vadd.f32 %v2004_v49, %v3349_v35 }
 0x8b3   :  { %v2355_v54 = vmul.f32 -1.442695, %v2427_v47  ;;  %v2429_v55 = vadd.f32 %v1963_v51, %v3340_v16  ;;  %v1965_v56 = vpop.f32.mrb[31].mxu0  ;;  %v2008_v57 = vpop.f32.mrb[31].mxu1  ;;  %v2461_v16 = vadd.f32 %v2006_v53, %v3352_v6 }
 0x8b4   :  { %v2357_v58 = vmul.f32 -1.442695, %v2428_v50  ;;  %v2430_v59 = vadd.f32 %v1965_v56, %v3342_v17  ;;  %v2359_v27 = vmul.f32 -1.442695, %v2460_v10  ;;  %v2462_v26 = vadd.f32 %v2008_v57, %v3349_v35 }
 0x8b5   :  { %2878 = vpow2.f32 %v2355_v54  ;;  %v2356_v60 = vmul.f32 -1.442695, %v2429_v55 }
 0x8b6   :  { %2880 = vpow2.f32 %v2357_v58  ;;  %v2358_v20 = vmul.f32 -1.442695, %v2430_v59  ;;  %v2360_v17 = vmul.f32 -1.442695, %v2462_v26 }
 0x8b7   :  { %2882 = vpow2.f32 %v2356_v60 }
 0x8b8   :  { %2884 = vpow2.f32 %v2358_v20 }
 0x8b9   :  { %2886 = vtanh.f32 %v2459_v23 }
 0x8ba   :  { %2888 = vpow2.f32 %v2359_v27 }
 0x8bb   :  { %2890 = vtanh.f32 %v2461_v16 }
 0x8bf   :  { %v2879_v29 = vpop.eup %2878 }
 0x8c0   :  { %v2881_v8 = vpop.eup %2880  ;;  %v2025_v24 = vadd.f32 1.0, %v2879_v29 }
 0x8c1   :  { %v2037_v9 = vadd.f32 1.0, %v2881_v8  ;;  %v2883_v22 = vpop.eup %2882 }
 0x8c2   :  { %2892 = vrcp.f32 %v2025_v24  ;;  %v2026_v19 = vadd.f32 1.0, %v2883_v22  ;;  %v2885_v25 = vpop.eup %2884 }
 0x8c3   :  { %2894 = vrcp.f32 %v2037_v9  ;;  %v2038_v38 = vadd.f32 1.0, %v2885_v25  ;;  %v2887_v35 = vpop.eup %2886 }
 0x8c4   :  { %2896 = vpow2.f32 %v2360_v17  ;;  %v2889_v34 = vpop.eup %2888 }
 0x8c5   :  { %2898 = vrcp.f32 %v2026_v19  ;;  %v2891_v6 = vpop.eup %2890  ;;  %v2051_v40 = vadd.f32 1.0, %v2889_v34 }
 0x8c6   :  { %2900 = vrcp.f32 %v2038_v38 }
 0x8c7   :  { %2902 = vrcp.f32 %v2051_v40 }
 0x8cc   :  { %v2893_v39 = vpop.eup %2892 }
 0x8cd   :  { %v2895_v41 = vpop.eup %2894  ;;  %v2059_v42 = vmul.f32 %v2893_v39, %v2887_v35 }
 0x8ce   :  { %v2897_v28 = vpop.eup %2896  ;;  %v2057_v30 = vmul.f32 %v2895_v41, %v3719_v62  ;;  %v2361_v62 = vld [vmem:[%s3757_s5] ss:$0 sm:$0xff]  ;;  %s3078_s5 = smov [#allocation13]  }
 0x8cf   :  { %v2899_v63 = vpop.eup %2898  ;;  %v2052_v1 = vadd.f32 1.0, %v2897_v28  ;;  %s2227_s21 = sshll.u32 %s3078_s5, 4  ;;  %s2228_s21 = int_to_ptr.vmem [resolvable:$true] %s2227_s21 }
 0x8d0   :  { %v2061_v31 = vadd.f32 %v2059_v42, %v2057_v30  ;;  %v2060_v2 = vmul.f32 %v2899_v63, %v2891_v6  ;;  %v2901_v32 = vpop.eup %2900  ;;  %s3036_s24 = scalar_lea.vmem %s2228_s21, 256  ;;  %p3041_p5 = scmp.lt.s32.totalorder %s2228_s21, %s2228_s21 }
 0x8d1   :  { %v2058_v43 = vmul.f32 %v2901_v32, %v3723_v36  ;;  %v2903_v61 = vpop.eup %2902  ;;  %p3037_p4 = scmp.ne.s32.totalorder %s2228_s21, %s3036_s24  ;;  %p3042_p6 = scmp.lt.s32.totalorder %s3036_s24, %s3036_s24 }
 0x8d2   :  { %2904 = vtanh.f32 %v2061_v31 }
 0x8d3   :  { %v2062_v4 = vadd.f32 %v2060_v2, %v2058_v43  ;;  %2906 = vrcp.f32 %v2052_v1  ;;  %p3043_p7 = por %p3042_p6, %p3041_p5 }
 0x8d5   :  { %2908 = vtanh.f32 %v2062_v4  ;;  %p3044_p8 = pnand %p3043_p7, %p3037_p4 }
 0x8dc   :  { %v2905_v37 = vpop.eup %2904 }
 0x8dd   :  { %v2065_v5 = vmul.f32 %v2905_v37, %v2903_v61  ;;  %v2907_v7 = vpop.eup %2906 }
 0x8df   :  { %v2909_v11 = vpop.eup %2908 }
 0x8e0   :  { %v2066_v14 = vmul.f32 %v2909_v11, %v2907_v7 }
 0x8e2   :  { %v2076_v3 = vpack.c.bf16 %v2066_v14, %v2065_v5 }
 0x8e4   :  { %2396 = vmatmul.mubr.bf16.vlgmr.msra.gmra.mrb[32].mxu0 %v2076_v3 }
 0x9b7   :  { %v2182_v13 = vpop.f32.mrb[32].mxu0 }
 0x9b8   :  { %v2183_v33 = vadd.f32 %v2361_v62, %v2182_v13  ;;  %v2397_v36 = vpop.f32.mrb[33].mxu0 }
 0x9b9   :  { %v2185_v15 = vpop.f32.mrb[34].mxu0 }
 0x9ba   :  { %v2194_v18 = vsel %vm2192_vm1, %v2183_v33, -1e+30  ;;  %v2398_v52 = vpop.f32.mrb[35].mxu0 }
 0x9bb   :  { %v2196_v0 = vmax.f32 %v2194_v18, -1e+30 }
 0x9bd   :  { %v2197_v44 = vrot.slane %v2196_v0, 4 }
 0x9bf   :  { %v2198_v21 = vmax.f32 %v2196_v0, %v2197_v44 }
 0x9c1   :  { %v2199_v45 = vrot.slane %v2198_v21, 2 }
 0x9c3   :  { %v2200_v46 = vmax.f32 %v2198_v21, %v2199_v45 }
 0x9c5   :  { %v2201_v47 = vrot.slane %v2200_v46, 1 }
 0x9c7   :  { %v2202_v48 = vmax.f32 %v2200_v46, %v2201_v47 }
 0x9c9   :  { %v2203_v49 = vsub.f32 %v2194_v18, %v2202_v48  ;;  %v2204_v50 = vsub.f32 -1e+30, %v2202_v48 }
 0x9cb   :  { %v2205_v51 = vmul.f32 1.442695, %v2203_v49  ;;  %v2207_v53 = vmul.f32 1.442695, %v2204_v50 }
 0x9cd   :  { %2910 = vpow2.f32 %v2205_v51 }
 0x9ce   :  { %2912 = vpow2.f32 %v2207_v53 }
 0x9d7   :  { %v2911_v54 = vpop.eup %2910 }
 0x9d8   :  { %v2913_v12 = vpop.eup %2912 }
 0x9d9   :  { %v2209_v55 = vadd.f32 %v2913_v12, %v2911_v54 }
 0x9db   :  { %v2210_v56 = vrot.slane %v2209_v55, 4 }
 0x9dd   :  { %v2211_v57 = vadd.f32 %v2210_v56, %v2209_v55 }
 0x9df   :  { %v2212_v58 = vrot.slane %v2211_v57, 2 }
 0x9e1   :  { %v2213_v59 = vadd.f32 %v2212_v58, %v2211_v57 }
 0x9e3   :  { %v2214_v60 = vrot.slane %v2213_v59, 1 }
 0x9e5   :  { %v2215_v20 = vadd.f32 %v2214_v60, %v2213_v59 }
 0x9e7   :  { %2914 = vlog2.f32 %v2215_v20 }
 0x9f1   :  { %v2915_v10 = vpop.eup %2914 }
 0x9f2   :  { %v2217_v23 = vmul.f32 0.6931472, %v2915_v10 }
 0x9f4   :  { %v2218_v27 = vsub.f32 %v2203_v49, %v2217_v23  ;;  %v2219_v26 = vsub.f32 %v2204_v50, %v2217_v23 }
 0x9f6   :  { %2220 = vst [vmem:[#allocation13] sm:$0xff] %v2218_v27  ;;  %2221 = vst [vmem:[#allocation13 + $0x8] sm:$0xff] %v2219_v26 }
 0x9f7   :  { %3047 = shalt.err (!%p3044_p8)
}
 0x9f8   :  { %s3048_s27 = scalar_lea.hbm %s3758_s6, 256 }
 0x9f9   :  { %p3049_p9 = scmp.ne.s32.totalorder %s3758_s6, %s3048_s27  ;;  %p3052_p10 = scmp.lt.u32.totalorder %s3048_s27, %s3758_s6 }
 0x9fb   :  { %p3054_p11 = pnand %p3052_p10, %p3049_p9 }
 0x9fd   :  { %3057 = shalt.err (!%p3054_p11)
}
 0x9fe   :  { %s3079_s10 = smov 128   ;;  %s3080_s11 = smov 8  }
 0x9ff   :  { %2233 = dma.vmem_to_hbm [thread:$0]  %s2228_s21, 256, %s3758_s6, [#allocation7], %s3079_s10, %s3079_s10, %s3080_s11  }
 0xa00   :  { %3064 = dma.done.wait [#allocation7], 256  }
 0xa01   :  { %3065 = vsyncadd [#allocation7], 4294967040 }
 0xa02   :  { %2237 = vsyncpa [#allocation6], 1 }
 0xa03   :  { %2238 = vsyncpa [#allocation9], 1 }
 0xa04   :  { %2239 = vsyncpa [#allocation12], 1 }
 0xa05   :  { %2240 = vsyncpa [#allocation7], 1 }

</bundles_post_ra>
